<compile_context>
chip_gen: v5e
topology: v5e:2x2
jax: 0.10.0
libtpu: 0.0.40
codegen_flags: <defaults>
</compile_context>

<pallas_src>
import jax
import jax.numpy as jnp
from jax import lax
from jax.experimental import pallas as pl
from jax.experimental.pallas import tpu as pltpu

# ----- module defaults -----
SAMPLE_RATE = 16000
N_FFT = 512
WIN_LENGTH = int(0.025 * SAMPLE_RATE)      # 400
HOP_LENGTH = int(0.01 * SAMPLE_RATE)       # 160
N_MELS = 80
N_MELS_PAD = 128                           # lane-dense output width
F_MIN = 0.0
F_MAX = SAMPLE_RATE / 2.0
LOG_EPS = 1e-6
N_FREQS = N_FFT // 2 + 1                   # 257 (onesided)
NCOL = ((2 * N_FREQS + 127) // 128) * 128  # 640: cos|sin columns, lane aligned
TAIL = N_FFT - 3 * HOP_LENGTH              # 32: last partial row of a frame
TT_MAX = 1024                              # max time-tile (multiple of 128)
EXTRA_ROWS = 16                            # overflow rows per tile (>=3, mult of 16)
MIN_GRID_POINTS = 4                        # keep v7x megacore busy


def _hamming_periodic(win_length: int) -> jnp.ndarray:
    # torch.hamming_window(win_length, periodic=True)
    n = jnp.arange(win_length, dtype=jnp.float32)
    return 0.54 - 0.46 * jnp.cos(2.0 * jnp.pi * n / win_length)


def _mel_filterbank() -> jnp.ndarray:
    # torchaudio.functional.melscale_fbanks(n_freqs, f_min, f_max, n_mels,
    #                                       sample_rate, norm=None, mel_scale='htk')
    def hz_to_mel(f):
        return 2595.0 * jnp.log10(1.0 + f / 700.0)

    def mel_to_hz(m):
        return 700.0 * (10.0 ** (m / 2595.0) - 1.0)

    all_freqs = jnp.linspace(0.0, SAMPLE_RATE // 2, N_FREQS).astype(jnp.float32)
    m_min = hz_to_mel(jnp.float32(F_MIN))
    m_max = hz_to_mel(jnp.float32(F_MAX))
    m_pts = jnp.linspace(m_min, m_max, N_MELS + 2)
    f_pts = mel_to_hz(m_pts)
    f_diff = f_pts[1:] - f_pts[:-1]                        # (n_mels+1,)
    slopes = f_pts[None, :] - all_freqs[:, None]           # (n_freqs, n_mels+2)
    down = -slopes[:, :-2] / f_diff[:-1]
    up = slopes[:, 2:] / f_diff[1:]
    fb = jnp.maximum(0.0, jnp.minimum(down, up))           # (257, 80)
    return fb.astype(jnp.float32)


def _fbank_matrices():
    # Fused, window-folded real DFT:  spec = frames @ [cos*w | -sin*w]  (514 -> 640 cols)
    # power = spec*spec ; mel = power @ [melfb ; melfb ; 0]  (rows 0..256, 257..513, pad)
    win = _hamming_periodic(WIN_LENGTH)
    pad_left = (N_FFT - WIN_LENGTH) // 2
    w_pad = jnp.pad(win, (pad_left, N_FFT - WIN_LENGTH - pad_left))   # (n_fft,)
    n = jnp.arange(N_FFT, dtype=jnp.float32)[:, None]
    f = jnp.arange(N_FREQS, dtype=jnp.float32)[None, :]
    ang = 2.0 * jnp.pi * n * f / N_FFT
    cos_m = jnp.cos(ang) * w_pad[:, None]                             # (512, 257)
    sin_m = -jnp.sin(ang) * w_pad[:, None]                            # (512, 257)
    dftw = jnp.concatenate([cos_m, sin_m], axis=1)                    # (512, 514)
    dftw = jnp.pad(dftw, ((0, 0), (0, NCOL - 2 * N_FREQS)))           # (512, 640)
    dftw = dftw.astype(jnp.bfloat16)

    fb = _mel_filterbank()                                            # (257, 80)
    fb = jnp.pad(fb, ((0, 0), (0, N_MELS_PAD - N_MELS)))              # (257, 128)
    melfb2 = jnp.concatenate([fb, fb], axis=0)                        # (514, 128)
    melfb2 = jnp.pad(melfb2, ((0, NCOL - 2 * N_FREQS), (0, 0)))       # (640, 128)
    melfb2 = melfb2.astype(jnp.bfloat16)
    return dftw, melfb2


def fbank(signal: jnp.ndarray) -> jnp.ndarray:
    """signal: (B, L) float32 waveform -> (B, n_mels, T) log-mel features."""
    signal = signal.astype(jnp.float32)
    B, L = signal.shape
    T = 1 + L // HOP_LENGTH

    # dither=0.0 and preemph=None in the module defaults -> both are no-ops here.
    # center=True, pad_mode='reflect':
    pad = N_FFT // 2
    padded = jnp.pad(signal, ((0, 0), (pad, pad)), mode="reflect")    # (B, L+512) f32

    # ---- time tiling: multiple of 128; amortize grid-step overhead but keep
    # enough grid points for v7x's two TensorCores on short workloads.
    tt = min(TT_MAX, ((T + 127) // 128) * 128)
    while tt > 128 and B * pl.cdiv(T, tt) < MIN_GRID_POINTS:
        tt = max(128, ((tt // 2) // 128) * 128)
    n_t = pl.cdiv(T, tt)
    T_pad = n_t * tt

    # ---- rows-of-HOP layout for in-kernel framing.  Frame t = rows t, t+1, t+2
    # and the first 32 samples of row t+3, so keep EXTRA_ROWS spare rows.
    n_rows = T_pad + EXTRA_ROWS
    need = n_rows * HOP_LENGTH
    padded = jnp.pad(padded, ((0, 0), (0, need - padded.shape[1])))
    rows = padded.astype(jnp.bfloat16).reshape(B, n_rows, HOP_LENGTH)  # (B, R, 160) bf16

    dftw, melfb2 = _fbank_matrices()

    def fbank_kernel(main_ref, extra_ref, dftw_ref, melfb_ref, out_ref, sum_ref):
        # main_ref : (1, tt, 160) bf16     rows [t*tt, (t+1)*tt)
        # extra_ref: (1, 16, 160) bf16     rows [(t+1)*tt, (t+1)*tt+16)  (same array)
        # dftw_ref : (512, 640)  bf16      window-folded cos|sin real DFT
        # melfb_ref: (640, 128)  bf16      stacked mel filterbank
        # out_ref  : (1, 128, tt) f32      log-mel, time on the lane axis
        # sum_ref  : (1, 1, 8, 128) f32    per-tile masked time sums (row 0 valid)
        t_i = pl.program_id(1)
        allr = jnp.concatenate([main_ref[0], extra_ref[0]], axis=0)    # (tt+16, 160)
        # reassemble overlapping 512-sample frames: hop=160, 512 = 3*160 + 32
        x = jnp.concatenate(
            [allr[0:tt], allr[1:tt + 1], allr[2:tt + 2], allr[3:tt + 3, :TAIL]],
            axis=1)                                                    # (tt, 512) bf16
        spec = jnp.dot(x, dftw_ref[...],
                       preferred_element_type=jnp.float32)             # (tt, 640) f32
        power = spec * spec                                            # re^2 | im^2
        mel = jnp.dot(power.astype(jnp.bfloat16), melfb_ref[...],
                      preferred_element_type=jnp.float32)              # (tt, 128) f32
        logmel = jnp.log(mel + LOG_EPS)                                # _apply_log
        out_ref[0] = logmel.T                                          # lane-dense store
        # masked partial time sums for the CMVN mean (exclude padded tail frames)
        frame_idx = t_i * tt + lax.broadcasted_iota(jnp.int32, (tt, 1), 0)
        psum = jnp.sum(jnp.where(frame_idx < T, logmel, 0.0),
                       axis=0, keepdims=True)                          # (1, 128)
        sum_ref[0, 0] = jnp.broadcast_to(psum, (8, N_MELS_PAD))

    cost = pl.CostEstimate(
        flops=int(2 * B * T_pad * N_FFT * NCOL
                  + 2 * B * T_pad * NCOL * N_MELS_PAD),
        transcendentals=int(B * T_pad * N_MELS_PAD),
        bytes_accessed=int(rows.size * 2 + dftw.size * 2 + melfb2.size * 2
                           + B * N_MELS_PAD * T_pad * 4
                           + B * n_t * 8 * N_MELS_PAD * 4),
    )

    out, sums = pl.pallas_call(
        fbank_kernel,
        out_shape=(
            jax.ShapeDtypeStruct((B, N_MELS_PAD, T_pad), jnp.float32),
            jax.ShapeDtypeStruct((B, n_t, 8, N_MELS_PAD), jnp.float32),
        ),
        grid=(B, n_t),
        in_specs=[
            pl.BlockSpec((1, tt, HOP_LENGTH), lambda b, t: (b, t, 0)),
            pl.BlockSpec((1, EXTRA_ROWS, HOP_LENGTH),
                         lambda b, t: (b, (t + 1) * (tt // EXTRA_ROWS), 0)),
            pl.BlockSpec((N_FFT, NCOL), lambda b, t: (0, 0)),
            pl.BlockSpec((NCOL, N_MELS_PAD), lambda b, t: (0, 0)),
        ],
        out_specs=(
            pl.BlockSpec((1, N_MELS_PAD, tt), lambda b, t: (b, 0, t)),
            pl.BlockSpec((1, 1, 8, N_MELS_PAD), lambda b, t: (b, t, 0, 0)),
        ),
        compiler_params=pltpu.CompilerParams(
            dimension_semantics=("parallel", "parallel"),
            vmem_limit_bytes=48 * 1024 * 1024,
        ),
        cost_estimate=cost,
    )(rows, rows, dftw, melfb2)

    # slice off mel/time padding, then CMVN over time (norm_var=False); the mean
    # comes from the in-kernel partial sums so we avoid an extra feature-map read.
    feats = out[:, :N_MELS, :T]                                        # (B, 80, T)
    mean = jnp.sum(sums[:, :, 0, :N_MELS], axis=1) / T                 # (B, 80)
    feats = feats - mean[:, :, None]
    return feats


if __name__ == "__main__":
    key = jax.random.PRNGKey(0)
    # small input: batch=2, 0.1s of 16kHz audio -> T = 1 + 1600//160 = 11 frames
    input_signal = 0.1 * jax.random.normal(key, (2, 1600), dtype=jnp.float32)

    feats = jax.block_until_ready(fbank(input_signal))
    assert feats.shape == (2, N_MELS, 11), feats.shape
    assert bool(jnp.all(jnp.isfinite(feats)))
    # CMVN: per-(batch, mel) time-mean should be ~0
    assert float(jnp.max(jnp.abs(jnp.mean(feats, axis=2)))) < 1e-3
    print("KERNEL_OK")
</pallas_src>

<mosaic_0001>
module attributes {stable_mosaic.version = 11 : i64} {
  func.func @fbank_kernel(%arg0: i32, %arg1: i32, %arg2: memref<1x128x160xbf16, #tpu.memory_space<vmem>>, %arg3: memref<1x16x160xbf16, #tpu.memory_space<vmem>>, %arg4: memref<512x640xbf16, #tpu.memory_space<vmem>>, %arg5: memref<640x128xbf16, #tpu.memory_space<vmem>>, %arg6: memref<1x128x128xf32, #tpu.memory_space<vmem>>, %arg7: memref<1x1x8x128xf32, #tpu.memory_space<vmem>>) attributes {dimension_semantics = [#tpu.dimension_semantics<parallel>, #tpu.dimension_semantics<parallel>], iteration_bounds = array<i64: 2, 1>, scalar_prefetch = 0 : i64, scratch_operands = 0 : i64, tpu.core_type = #tpu.core_type<tc>, window_params = [{transform_indices = @transform_0, window_bounds = array<i64: 1, 128, 160>}, {transform_indices = @transform_1, window_bounds = array<i64: 1, 16, 160>}, {pipeline_mode = #tpu.pipeline_mode<synchronous>, transform_indices = @transform_2, window_bounds = array<i64: 512, 640>}, {pipeline_mode = #tpu.pipeline_mode<synchronous>, transform_indices = @transform_3, window_bounds = array<i64: 640, 128>}, {transform_indices = @transform_4, window_bounds = array<i64: 1, 128, 128>}, {transform_indices = @transform_5, window_bounds = array<i64: 1, 1, 8, 128>}]} {
    %c0 = arith.constant 0 : index
    %c0_0 = arith.constant 0 : index
    %c0_1 = arith.constant 0 : index
    %0 = vector.load %arg2[%c0, %c0_0, %c0_1] : memref<1x128x160xbf16, #tpu.memory_space<vmem>>, vector<1x128x160xbf16>
    %1 = vector.shape_cast %0 : vector<1x128x160xbf16> to vector<128x160xbf16>
    %c0_2 = arith.constant 0 : index
    %c0_3 = arith.constant 0 : index
    %c0_4 = arith.constant 0 : index
    %2 = vector.load %arg3[%c0_2, %c0_3, %c0_4] : memref<1x16x160xbf16, #tpu.memory_space<vmem>>, vector<1x16x160xbf16>
    %3 = vector.shape_cast %2 : vector<1x16x160xbf16> to vector<16x160xbf16>
    %4 = tpu.concatenate %1, %3 in 0 : vector<128x160xbf16>, vector<16x160xbf16> -> vector<144x160xbf16>
    %5 = vector.extract_strided_slice %4 {offsets = [0, 0], sizes = [128, 160], strides = [1, 1]} : vector<144x160xbf16> to vector<128x160xbf16>
    %6 = vector.extract_strided_slice %4 {offsets = [1, 0], sizes = [128, 160], strides = [1, 1]} : vector<144x160xbf16> to vector<128x160xbf16>
    %7 = vector.extract_strided_slice %4 {offsets = [2, 0], sizes = [128, 160], strides = [1, 1]} : vector<144x160xbf16> to vector<128x160xbf16>
    %8 = vector.extract_strided_slice %4 {offsets = [3, 0], sizes = [128, 32], strides = [1, 1]} : vector<144x160xbf16> to vector<128x32xbf16>
    %9 = tpu.concatenate %5, %6, %7, %8 in 1 : vector<128x160xbf16>, vector<128x160xbf16>, vector<128x160xbf16>, vector<128x32xbf16> -> vector<128x512xbf16>
    %c0_5 = arith.constant 0 : index
    %c0_6 = arith.constant 0 : index
    %10 = vector.load %arg4[%c0_5, %c0_6] : memref<512x640xbf16, #tpu.memory_space<vmem>>, vector<512x640xbf16>
    %cst = arith.constant dense<0.000000e+00> : vector<128x640xf32>
    %11 = tpu.matmul %9, %10, %cst {dimension_numbers = #tpu.dot_dimension_numbers<[1], [0], [0], [1], [0, 0, 1, 1], [], []>} : vector<128x512xbf16>, vector<512x640xbf16>, vector<128x640xf32> -> vector<128x640xf32>
    %12 = arith.mulf %11, %11 : vector<128x640xf32>
    %13 = arith.truncf %12 : vector<128x640xf32> to vector<128x640xbf16>
    %c0_7 = arith.constant 0 : index
    %c0_8 = arith.constant 0 : index
    %14 = vector.load %arg5[%c0_7, %c0_8] : memref<640x128xbf16, #tpu.memory_space<vmem>>, vector<640x128xbf16>
    %cst_9 = arith.constant dense<0.000000e+00> : vector<128x128xf32>
    %15 = tpu.matmul %13, %14, %cst_9 {dimension_numbers = #tpu.dot_dimension_numbers<[1], [0], [0], [1], [0, 0, 1, 1], [], []>} : vector<128x640xbf16>, vector<640x128xbf16>, vector<128x128xf32> -> vector<128x128xf32>
    %cst_10 = arith.constant 9.99999997E-7 : f32
    %16 = vector.broadcast %cst_10 : f32 to vector<128x128xf32>
    %17 = arith.addf %15, %16 : vector<128x128xf32>
    %18 = math.log %17 : vector<128x128xf32>
    %19 = tpu.transpose %18, [1, 0] : vector<128x128xf32> -> vector<128x128xf32>
    %c0_11 = arith.constant 0 : index
    %c0_12 = arith.constant 0 : index
    %c0_13 = arith.constant 0 : index
    %20 = vector.load %arg6[%c0_11, %c0_12, %c0_13] : memref<1x128x128xf32, #tpu.memory_space<vmem>>, vector<1x128x128xf32>
    %21 = vector.shape_cast %20 : vector<1x128x128xf32> to vector<128x128xf32>
    %22 = vector.shape_cast %19 : vector<128x128xf32> to vector<1x128x128xf32>
    tpu.vector_store %arg6[%c0_11, %c0_12, %c0_13], %22 {strides = array<i32>} : memref<1x128x128xf32, #tpu.memory_space<vmem>>, vector<1x128x128xf32>,
    %c128_i32 = arith.constant 128 : i32
    %23 = arith.muli %arg1, %c128_i32 : i32
    %24 = tpu.iota {dimensions = array<i32: 0>} : vector<128x1xi32>
    %25 = vector.broadcast %23 : i32 to vector<128x1xi32>
    %26 = arith.addi %25, %24 : vector<128x1xi32>
    %c11_i32 = arith.constant 11 : i32
    %27 = vector.broadcast %c11_i32 : i32 to vector<128x1xi32>
    %28 = arith.cmpi slt, %26, %27 : vector<128x1xi32>
    %cst_14 = arith.constant 0.000000e+00 : f32
    %29 = vector.shape_cast %28 : vector<128x1xi1> to vector<128x1xi1>
    %30 = vector.broadcast %29 : vector<128x1xi1> to vector<128x128xi1>
    %31 = vector.broadcast %cst_14 : f32 to vector<128x128xf32>
    %32 = arith.select %30, %18, %31 : vector<128x128xi1>, vector<128x128xf32>
    %cst_15 = arith.constant dense<0.000000e+00> : vector<128xf32>
    %33 = vector.multi_reduction <add>, %32, %cst_15 [0] : vector<128x128xf32> to vector<128xf32>
    %34 = vector.shape_cast %33 : vector<128xf32> to vector<1x128xf32>
    %35 = vector.shape_cast %34 : vector<1x128xf32> to vector<1x128xf32>
    %36 = vector.broadcast %35 : vector<1x128xf32> to vector<8x128xf32>
    %c0_16 = arith.constant 0 : index
    %c0_17 = arith.constant 0 : index
    %c0_18 = arith.constant 0 : index
    %c0_19 = arith.constant 0 : index
    %37 = vector.load %arg7[%c0_16, %c0_17, %c0_18, %c0_19] : memref<1x1x8x128xf32, #tpu.memory_space<vmem>>, vector<1x1x8x128xf32>
    %38 = vector.shape_cast %37 : vector<1x1x8x128xf32> to vector<8x128xf32>
    %39 = vector.shape_cast %36 : vector<8x128xf32> to vector<1x1x8x128xf32>
    tpu.vector_store %arg7[%c0_16, %c0_17, %c0_18, %c0_19], %39 {strides = array<i32>} : memref<1x1x8x128xf32, #tpu.memory_space<vmem>>, vector<1x1x8x128xf32>,
    return
  }
  func.func @transform_0(%arg0: i32, %arg1: i32) -> (i32, i32, i32) {
    %c0_i32 = arith.constant 0 : i32
    %c0_i32_0 = arith.constant 0 : i32
    return %arg0, %arg1, %c0_i32 : i32, i32, i32
  }
  func.func @transform_1(%arg0: i32, %arg1: i32) -> (i32, i32, i32) {
    %c1_i32 = arith.constant 1 : i32
    %0 = arith.addi %arg1, %c1_i32 : i32
    %c8_i32 = arith.constant 8 : i32
    %1 = arith.muli %0, %c8_i32 : i32
    %c0_i32 = arith.constant 0 : i32
    %c0_i32_0 = arith.constant 0 : i32
    return %arg0, %1, %c0_i32 : i32, i32, i32
  }
  func.func @transform_2(%arg0: i32, %arg1: i32) -> (i32, i32) {
    %c0_i32 = arith.constant 0 : i32
    %c0_i32_0 = arith.constant 0 : i32
    %c0_i32_1 = arith.constant 0 : i32
    return %c0_i32, %c0_i32_0 : i32, i32
  }
  func.func @transform_3(%arg0: i32, %arg1: i32) -> (i32, i32) {
    %c0_i32 = arith.constant 0 : i32
    %c0_i32_0 = arith.constant 0 : i32
    %c0_i32_1 = arith.constant 0 : i32
    return %c0_i32, %c0_i32_0 : i32, i32
  }
  func.func @transform_4(%arg0: i32, %arg1: i32) -> (i32, i32, i32) {
    %c0_i32 = arith.constant 0 : i32
    %c0_i32_0 = arith.constant 0 : i32
    return %arg0, %c0_i32, %arg1 : i32, i32, i32
  }
  func.func @transform_5(%arg0: i32, %arg1: i32) -> (i32, i32, i32, i32) {
    %c0_i32 = arith.constant 0 : i32
    %c0_i32_0 = arith.constant 0 : i32
    %c0_i32_1 = arith.constant 0 : i32
    return %arg0, %arg1, %c0_i32, %c0_i32_0 : i32, i32, i32, i32
  }
}

</mosaic_0001>

<bundles_post_ra>
// kernel: tpu_custom_call.1
= control target key start
LH: loop header
LB: loop body
LE: loop exit
PB: predicated region body
PF: predicated region fallthrough
CT: control target
= control target key end

     0   :  { %s6892_s0 = inlined_call_operand.hbm [shape: bf16[2,144,160], index: 0, kind: input, shape index: {}]   ;;  %s6893_s1 = inlined_call_operand.hbm [shape: bf16[2,144,160], index: 1, kind: input, shape index: {}]   ;;  %s6894_s2 = inlined_call_operand.hbm [shape: bf16[512,640], index: 2, kind: input, shape index: {}]   ;;  %s6895_s3 = inlined_call_operand.hbm [shape: bf16[640,128], index: 3, kind: input, shape index: {}]   ;;  %s6896_s4 = inlined_call_operand.hbm [shape: f32[2,128,128], index: 4, kind: output, shape index: {0}]   ;;  %s6897_s5 = inlined_call_operand.hbm [shape: f32[2,1,8,128], index: 5, kind: output, shape index: {1}]  }
   0x1   :  { %6950 = sst [smem:[#allocation68_spill]] %s6892_s0 }
   0x2   :  { %6951 = sst [smem:[#allocation69_spill]] %s6894_s2 }
   0x3   :  { %6952 = sst [smem:[#allocation70_spill]] %s6895_s3 }
   0x4   :  { %11 = vsyncpa [#allocation3], 0 }
   0x5   :  { %13 = vsyncpa [#allocation3 + $0x1], 0 }
   0x6   :  { %14 = vsyncpa [#allocation6], 0 }
   0x7   :  { %16 = vsyncpa [#allocation6 + $0x1], 0 }
   0x8   :  { %17 = vsyncpa [#allocation9], 0 }
   0x9   :  { %18 = vsyncpa [#allocation4], 0 }
   0xa   :  { %20 = vsyncpa [#allocation4 + $0x1], 0 }
   0xb   :  { %21 = vsyncpa [#allocation12], 0 }
   0xc   :  { %23 = vsyncpa [#allocation12 + $0x1], 0  ;;  %s5537_s18 = smov 0   ;;  %s5539_s19 = smov 0  }
   0xd   :  { %s5541_s20 = smov 0   ;;  %s5543_s21 = smov 0  }
   0xe   :  { %s5545_s22 = smov 0   ;;  %s5547_s23 = smov 0  }
   0xf LB: > { %6953 = sst [smem:[#allocation19_spill]] %s5488_s22  ;;  %s5568_s24 = sadd.s32 4294967295, %s5492_s23   ;;  %s5492_s23 = sphi %s5547_s23, %s29_s23   ;;  %s5488_s22 = sphi %s5545_s22, %s7132_s22   ;;  %s5484_s21 = sphi %s5543_s21, %s7131_s21   ;;  %s5480_s20 = sphi %s5541_s20, %s7135_s20   ;;  %s5476_s19 = sphi %s5539_s19, %s7134_s19   ;;  %s5472_s18 = sphi %s5537_s18, %s7133_s18  }
  0x10   : > { %s3971_s25 = sadd.s32 4294967294, %s5492_s23   ;;  %p63_p0 = scmp.ne.s32.totalorder %s5476_s19, %s5472_s18 }
  0x11   : > { %p64_p1 = scmp.eq.s32.totalorder %s5568_s24, 0  ;;  %p163_p2 = scmp.eq.s32.totalorder %s5568_s24, 1 }
  0x12   : > { %p169_p3 = scmp.eq.s32.totalorder %s3971_s25, 1  ;;  %p3972_p5 = scmp.ge.s32.totalorder %s5492_s23, 1 }
  0x13   : > { %p5577_p4 = por %p64_p1, %p63_p0  ;;  %p204_p7 = scmp.lt.s32.totalorder %s5492_s23, 3 }
  0x14   : > { %p5582_p6 = por %p169_p3, %p63_p0  ;;  %s6956_s2 = sld [smem:[#allocation69_spill]] }
  0x15   : > { %p5590_p8 = pnand %p3972_p5, %p204_p7  ;;  %s5494_s7 = smov [#allocation7]  }
  0x16   : > { %s217_s8 = sshll.u32 %s5494_s7, 4  ;;  %p3975_p11 = scmp.ge.s32.totalorder %s5492_s23, 2  ;;  %s218_s8 = int_to_ptr.vmem [resolvable:$true] %s217_s8 }
  0x17   : > { %p5126_p9 = pneg %p5590_p8  ;;  %s6958_s3 = sld [smem:[#allocation70_spill]] }
  0x18   : > { %s5495_s12 = smov 320   ;;  %s5496_s13 = smov 20  }
  0x19   : > { %p5127_p10 = pnand %p5126_p9, %p64_p1  ;;  %s5497_s14 = smov [#allocation8]  }
  0x1a   : > { %s215_s30 = sshll.u32 %s6956_s2, 4  ;;  %s231_s15 = sshll.u32 %s5497_s14, 4  ;;  %s216_s30 = int_to_ptr.hbm [resolvable:$true] %s215_s30  ;;  %s232_s15 = int_to_ptr.vmem [resolvable:$true] %s231_s15 }
  0x1b   : > { %5129 = dma.hbm_to_vmem [thread:$0]  (!%p5127_p10), %s216_s30, 20480, %s218_s8, [#allocation6], %s5495_s12, %s5495_s12, %s5496_s13  }
  0x1c   : > { %s5498_s16 = smov 64   ;;  %s5499_s17 = smov 4  }
  0x1d   : > { %s229_s11 = sshll.u32 %s6958_s3, 4  ;;  %s41_s25 = sadd.s32 1, %s5488_s22  ;;  %s230_s11 = int_to_ptr.hbm [resolvable:$true] %s229_s11 }
  0x1e   : > { %5132 = dma.hbm_to_vmem [thread:$0]  (!%p5127_p10), %s230_s11, 5120, %s232_s15, [#allocation9], %s5498_s16, %s5498_s16, %s5499_s17  }
  0x1f   : > { %s50_s28 = sadd.s32 1, %s5480_s20  ;;  %p43_p12 = scmp.ge.s32.totalorder %s41_s25, 2 }
  0x20   : > { %p57_p13 = scmp.ne.s32.totalorder %s5480_s20, %s5476_s19  ;;  %p58_p0 = scmp.eq.s32.totalorder %s5492_s23, 0 }
  0x21   : > { %p5149_p3 = scmp.lt.s32.totalorder %s5492_s23, 2  ;;  %s7137_s25 = smov (%p43_p12, %s41_s25), 0 }
  0x22   : > { %6959 = sst [smem:[#allocation20_spill]] %s7137_s25  ;;  %p5610_p5 = por %p58_p0, %p57_p13 }
  0x23   : > { %p5616_p7 = por %p163_p2, %p57_p13  ;;  %s45_s7 = ssub.s32 %s5488_s22, %s7137_s25 }
  0x24   : > { %s245_s8 = sand.u32 1, %s5480_s20   ;;  %p48_p9 = scmp.eq.s32.totalorder %s45_s7, 0 }
  0x25   : > { %s3976_s9 = sshll.u32 %s245_s8, 7  ;;  %s5109_s10 = smul.u32 144, %s5488_s22 }
  0x26   : > { %s5625_s11 = scalar_select %p48_p9, %s5480_s20, %s50_s28  }
  0x27   : > { %s6963_s0 = sld [smem:[#allocation68_spill]]  ;;  %s249_s16 = scalar_lea.vmem [#allocation2], %s3976_s9 }
  0x28   : > { %6962 = sst [smem:[#allocation21_spill]] %s5625_s11  ;;  %s268_s17 = sshll.u32 %s249_s16, 4  ;;  %s269_s17 = int_to_ptr.vmem [resolvable:$true] %s268_s17 }
  0x29   : > { %p5634_p2 = pnand %p5149_p3, %p5610_p5  ;;  %s278_s7 = sand.u32 1, %s5492_s23  }
  0x2a   : > { %s246_s28 = scalar_lea.sflag [#allocation3], %s245_s8  ;;  %s5500_s3 = smov 128  }
  0x2b   : > { %s5501_s25 = smov 8   ;;  %s3978_s12 = sshll.u32 %s245_s8, 4 }
  0x2c   : > { %s279_s11 = scalar_lea.sflag [#allocation6], %s278_s7 }
  0x2d   : > { %s264_s14 = scalar_lea.hbm %s6963_s0, %s5109_s10  ;;  %s282_s0 = scalar_lea.vmem [#allocation5], %s3978_s12 }
  0x2e   : > { %s266_s15 = sshll.u32 %s264_s14, 4  ;;  %s3863_s14 = scalar_lea.hbm %s6893_s1, %s5109_s10  ;;  %s267_s15 = int_to_ptr.hbm [resolvable:$true] %s266_s15 }
  0x2f   : > { %5136 = dma.hbm_to_vmem [thread:$0]  (!%p5634_p2), %s267_s15, 2048, %s269_s17, %s246_s28, %s5500_s3, %s5500_s3, %s5501_s25  }
  0x30   : > { %s3864_s16 = scalar_lea.hbm %s3863_s14, 128  ;;  %s295_s22 = sshll.u32 %s282_s0, 4  ;;  %s296_s22 = int_to_ptr.vmem [resolvable:$true] %s295_s22 }
  0x31   : > { %s293_s29 = sshll.u32 %s3864_s16, 4  ;;  %307 = sbr.rel (%p5590_p8) target bundleno = 1288 (0x508), region = 36  ;;  %s294_s29 = int_to_ptr.hbm [resolvable:$true] %s293_s29 }
  0x32   : > { %5139 = dma.hbm_to_vmem [thread:$0]  (!%p5634_p2), %s294_s29, 256, %s296_s22, %s279_s11, %s5500_s3, %s5500_s3, %s5501_s25  }
  0x36   : > { %s5649_s15 = sand.u32 1, %s5476_s19  }
  0x37   : > { %s3981_s8 = sshll.u32 %s5649_s15, 7  ;;  %s310_s10 = scalar_lea.sflag [#allocation3], %s5649_s15 }
  0x38   : > { %s5655_s17 = scalar_lea.vmem [#allocation2], %s3981_s8 }
  0x39   : > { %5447 = dma.done.wait (%p5577_p4), %s310_s10, 2048  }
  0x3a   : > { %5449 = vsyncadd (%p5577_p4), %s310_s10, 4294965248  ;;  %s319_s0 = sand.u32 1, %s5568_s24   ;;  %s3982_s2 = sshll.u32 %s5649_s15, 4 }
  0x3b   : > { %s320_s3 = scalar_lea.sflag [#allocation6], %s319_s0  ;;  %s5663_s22 = scalar_lea.vmem [#allocation5], %s3982_s2 }
  0x3c   : > { %5451 = dma.done.wait (%p5577_p4), %s320_s3, 256  }
  0x3d   : > { %5453 = vsyncadd (%p5577_p4), %s320_s3, 4294967040 }
  0x3e   : > { %5455 = dma.done.wait (%p64_p1), [#allocation6], 20480  }
  0x3f   : > { %5457 = vsyncadd (%p64_p1), [#allocation6], 4294946816 }
  0x40   : > { %5459 = dma.done.wait (%p64_p1), [#allocation9], 5120  }
  0x41   : > { %5461 = vsyncadd (%p64_p1), [#allocation9], 4294962176  ;;  %vm656_vm0 = vcmask 1046528   ;;  %v4201_v0 = vld [vmem:[#allocation7 + $0x118] sm:$0xf]  ;;  %s5502_s24 = smov 64  }
  0x42   : > { %v4921_v1 = vld [vmem:[#allocation7 + $0x128] sm:$0xf0]  ;;  %v3989_v2 = vld [vmem:[%s5655_s17] sm:$0xf]  ;;  %v4867_v4 = vld [vmem:[%s5655_s17 + $0x4] sm:$0xf0] }
  0x43   : > { %v4202_v3 = vor.u32 %v4921_v1, %v4201_v0  ;;  %v3997_v5 = vld [vmem:[%s5655_s17 + $0x10] sm:$0xf]  ;;  %v4869_v6 = vld [vmem:[%s5655_s17 + $0x14] sm:$0xf0]  ;;  %v5681_v7 = vor.u32 %v4867_v4, %v3989_v2  ;;  %v4916_v10 = vld [vmem:[#allocation7 + $0x100] sm:$0xf0] }
  0x44   : > { %v5683_v8 = vor.u32 %v4869_v6, %v3997_v5  ;;  %v4181_v9 = vld [vmem:[#allocation7 + $0xf0] sm:$0xf]  ;;  %v4161_v11 = vld [vmem:[#allocation7 + $0xc8] sm:$0xf]  ;;  %v4911_v13 = vld [vmem:[#allocation7 + $0xd8] sm:$0xf0] }
  0x45   : > { %1901 = vmatpush.bf16.msra.mxu0 %v4202_v3  ;;  %v4182_v12 = vor.u32 %v4916_v10, %v4181_v9  ;;  %v4866_v14 = vld [vmem:[%s5655_s17 + $0x4] sm:$0xf]  ;;  %v3991_v15 = vld [vmem:[%s5655_s17 + $0x8] sm:$0xf0]  ;;  %5085 = vmatpush.bf16.msra.mxu1 %v4202_v3  ;;  %v657_v16 = vrot.slane %v5681_v7, 1  ;;  %v480_v18 = vshrl.u32 %v5681_v7, 16  ;;  %v4162_v28 = vor.u32 %v4911_v13, %v4161_v11 }
  0x46   : > { %v658_v17 = vrot.slane %v5683_v8, 1  ;;  %v482_v19 = vshll.u32 %v5681_v7, 16  ;;  %v4868_v20 = vld [vmem:[%s5655_s17 + $0x14] sm:$0xf]  ;;  %5086 = vmatpush.bf16.msra.mxu2 %v4202_v3  ;;  %5087 = vmatpush.bf16.msra.mxu3 %v4202_v3  ;;  %v487_v21 = vshll.u32 %v5683_v8, 16  ;;  %v5694_v23 = vor.u32 %v4866_v14, %v3991_v15  ;;  %s5503_s26 = smov 32  }
  0x47   : > { %v3999_v22 = vld [vmem:[%s5655_s17 + $0x18] sm:$0xf0]  ;;  %vm478_vm1 = vsmask.f32 7424  ;;  %v4141_v30 = vld [vmem:[#allocation7 + $0xa0] sm:$0xf] }
  0x48   : > { %v659_v24 = vsel %vm656_vm0, %v657_v16, %v658_v17  ;;  %v484_v25 = vrot.slane %v482_v19, 1  ;;  %v5699_v26 = vor.u32 %v4868_v20, %v3999_v22  ;;  %v5702_v27 = vrot.slane %v487_v21, 1  ;;  %v4906_v34 = vld [vmem:[#allocation7 + $0xb0] sm:$0xf0]  ;;  %v4870_v37 = vld [vmem:[%s5655_s17 + $0x24] sm:$0xf] }
  0x49   : > { %691 = vrot.lane.b32.xlu1 %v659_v24, %s5502_s24  ;;  %1902 = vmatpush.bf16.msra.mxu0 %v4182_v12  ;;  %v660_v29 = vrot.slane %v5694_v23, 1  ;;  %v492_v31 = vshrl.u32 %v5694_v23, 16  ;;  %v494_v35 = vshll.u32 %v5694_v23, 16  ;;  %v4007_v38 = vld [vmem:[%s5655_s17 + $0x28] sm:$0xf0]  ;;  %v503_v39 = vshrl.u32 %v5683_v8, 16 }
  0x4a   : > { %v485_v32 = vor.u32 %v484_v25, %v480_v18  ;;  %v661_v33 = vrot.slane %v5699_v26, 1  ;;  %v499_v36 = vshll.u32 %v5699_v26, 16  ;;  %5088 = vmatpush.bf16.msra.mxu1 %v4182_v12  ;;  %5089 = vmatpush.bf16.msra.mxu2 %v4182_v12  ;;  %v4142_v43 = vor.u32 %v4906_v34, %v4141_v30  ;;  %v4005_v44 = vld [vmem:[%s5655_s17 + $0x20] sm:$0xf]  ;;  %v4871_v45 = vld [vmem:[%s5655_s17 + $0x24] sm:$0xf0] }
  0x4b   : > { %5090 = vmatpush.bf16.msra.mxu3 %v4182_v12  ;;  %v496_v41 = vrot.slane %v494_v35, 1  ;;  %v4121_v48 = vld [vmem:[#allocation7 + $0x78] sm:$0xf]  ;;  %v4901_v49 = vld [vmem:[#allocation7 + $0x88] sm:$0xf0]  ;;  %v5720_v50 = vor.u32 %v4870_v37, %v4007_v38  ;;  %v5722_v51 = vor.u32 %v4871_v45, %v4005_v44  ;;  %v736_v52 = vrot.slane %v503_v39, 1 }
  0x4c   : > { %v490_v40 = vsel %vm478_vm1, %v485_v32, %v5702_v27  ;;  %v662_v42 = vsel %vm656_vm0, %v660_v29, %v661_v33  ;;  %v501_v47 = vrot.slane %v499_v36, 1  ;;  %v733_v53 = vrot.slane %v480_v18, 1  ;;  %v4101_v54 = vld [vmem:[#allocation7 + $0x50] sm:$0xf]  ;;  %v4896_v56 = vld [vmem:[#allocation7 + $0x60] sm:$0xf0] }
  0x4d   : > { %615 = vrot.lane.b32.xlu0 %v490_v40, %s5503_s26  ;;  %1903 = vmatpush.bf16.msra.mxu0 %v4162_v28  ;;  %v497_v46 = vor.u32 %v496_v41, %v492_v31  ;;  %v4122_v55 = vor.u32 %v4901_v49, %v4121_v48  ;;  %v511_v57 = vshrl.u32 %v5699_v26, 16  ;;  %v737_v58 = vrot.slane %v487_v21, 2  ;;  %v4013_v63 = vld [vmem:[%s5655_s17 + $0x30] sm:$0xf]  ;;  %v4873_v0 = vld [vmem:[%s5655_s17 + $0x34] sm:$0xf0] }
  0x4e   : > { %5091 = vmatpush.bf16.msra.mxu1 %v4162_v28  ;;  %5092 = vmatpush.bf16.msra.mxu2 %v4162_v28  ;;  %v734_v59 = vrot.slane %v482_v19, 2  ;;  %v515_v61 = vshll.u32 %v5720_v50, 16  ;;  %v663_v62 = vrot.slane %v5722_v51, 1  ;;  %v5733_v3 = vor.u32 %v4873_v0, %v4013_v63  ;;  %v4081_v9 = vld [vmem:[#allocation7 + $0x28] sm:$0xf]  ;;  %s5504_s6 = smov 96  }
  0x4f   : > { %5093 = vmatpush.bf16.msra.mxu3 %v4162_v28  ;;  %v502_v60 = vsel %vm478_vm1, %v497_v46, %v501_v47  ;;  %v5731_v1 = vor.u32 %v737_v58, %v736_v52  ;;  %v507_v4 = vshll.u32 %v5722_v51, 16  ;;  %vm732_vm2 = vsmask.f32 6400  ;;  %v4891_v13 = vld [vmem:[#allocation7 + $0x38] sm:$0xf0]  ;;  %s3986_s25 = sshll.u32 %s5649_s15, 3 }
  0x50   : > { %v735_v2 = vor.u32 %v734_v59, %v733_v53  ;;  %v4102_v5 = vor.u32 %v4896_v56, %v4101_v54  ;;  %v513_v6 = vor.u32 %v511_v57, %v501_v47  ;;  %v519_v10 = vshrl.u32 %v5722_v51, 16  ;;  %v4061_v20 = vld [vmem:[#allocation7] sm:$0xf]  ;;  %v4886_v22 = vld [vmem:[#allocation7 + $0x10] sm:$0xf0]  ;;  %s6804_s11 = scalar_lea.vmem [#allocation11], %s3986_s25 }
  0x51   : > { %693 = vrot.lane.b32.xlu1 %v662_v42, %s5502_s24  ;;  %1904 = vmatpush.bf16.msra.mxu0 %v4142_v43  ;;  %v5740_v12 = vrot.slane %v515_v61, 1  ;;  %v664_v14 = vsel %vm656_vm0, %v658_v17, %v663_v62  ;;  %v509_v15 = vrot.slane %v507_v4, 1  ;;  %v523_v16 = vshll.u32 %v5733_v3, 16  ;;  %v4919_v25 = vld [vmem:[#allocation7 + $0x11c] sm:$0xf]  ;;  %s4863_s7 = sshll.u32 %s5484_s21, 3 }
  0x52   : > { %5094 = vmatpush.bf16.msra.mxu1 %v4142_v43  ;;  %5095 = vmatpush.bf16.msra.mxu2 %v4142_v43  ;;  %v739_v11 = vsel %vm732_vm2, %v735_v2, %v5731_v1  ;;  %v505_v18 = vor.u32 %v503_v39, %v5702_v27  ;;  %v4082_v19 = vor.u32 %v4891_v13, %v4081_v9  ;;  %v740_v21 = vrot.slane %v519_v10, 1  ;;  %v4203_v29 = vld [vmem:[#allocation7 + $0x12c] sm:$0xf0]  ;;  %v4872_v31 = vld [vmem:[%s5655_s17 + $0x34] sm:$0xf]  ;;  %s3802_s13 = scalar_lea.hbm %s6897_s5, %s4863_s7  ;;  %s3804_s9 = sshll.u32 %s6804_s11, 4  ;;  %s3805_s9 = int_to_ptr.vmem [resolvable:$true] %s3804_s9 }
  0x53   : > { %5096 = vmatpush.bf16.msra.mxu3 %v4142_v43  ;;  %770 = vrot.lane.b32.xlu2 %v739_v11, %s5504_s6  ;;  %v518_v17 = vsel %vm478_vm1, %v513_v6, %v5740_v12  ;;  %v741_v24 = vrot.slane %v507_v4, 2  ;;  %v521_v28 = vor.u32 %v519_v10, %v509_v15  ;;  %v5755_v27 = vrot.slane %v523_v16, 1  ;;  %v4015_v32 = vld [vmem:[%s5655_s17 + $0x38] sm:$0xf0]  ;;  %v4914_v37 = vld [vmem:[#allocation7 + $0xf4] sm:$0xf] }
  0x54   : > { %v510_v30 = vsel %vm478_vm1, %v505_v18, %v509_v15  ;;  %v4062_v34 = vor.u32 %v4886_v22, %v4061_v20  ;;  %v4206_v36 = vor.u32 %v4919_v25, %v4203_v29  ;;  %v4183_v38 = vld [vmem:[#allocation7 + $0x104] sm:$0xf0]  ;;  %v5766_v40 = vor.u32 %v4872_v31, %v4015_v32  ;;  %v4874_v41 = vld [vmem:[%s5655_s17 + $0x44] sm:$0xf]  ;;  %v4023_v42 = vld [vmem:[%s5655_s17 + $0x48] sm:$0xf0] }
  0x55   : > { %617 = vrot.lane.b32.xlu0 %v502_v60, %s5503_s26  ;;  %1905 = vmatpush.bf16.msra.mxu0 %v4122_v55  ;;  %v5761_v35 = vor.u32 %v741_v24, %v740_v21  ;;  %v526_v39 = vsel %vm478_vm1, %v521_v28, %v5755_v27  ;;  %v4186_v43 = vor.u32 %v4914_v37, %v4183_v38  ;;  %v4909_v44 = vld [vmem:[#allocation7 + $0xcc] sm:$0xf]  ;;  %v4163_v45 = vld [vmem:[#allocation7 + $0xdc] sm:$0xf0]  ;;  %v665_v46 = vrot.slane %v5720_v50, 1  ;;  %s3806_s14 = sshll.u32 %s3802_s13, 4  ;;  %s3807_s14 = int_to_ptr.hbm [resolvable:$true] %s3806_s14 }
  0x56   : > { %5097 = vmatpush.bf16.msra.mxu1 %v4122_v55  ;;  %5098 = vmatpush.bf16.msra.mxu2 %v4122_v55  ;;  %v669_v48 = vrot.slane %v5766_v40, 1  ;;  %v4021_v49 = vld [vmem:[%s5655_s17 + $0x40] sm:$0xf]  ;;  %v4875_v52 = vld [vmem:[%s5655_s17 + $0x44] sm:$0xf0]  ;;  %v5778_v53 = vor.u32 %v4874_v41, %v4023_v42  ;;  %v531_v54 = vshll.u32 %v5766_v40, 16  ;;  %v4166_v57 = vor.u32 %v4909_v44, %v4163_v45 }
  0x57   : > { %5099 = vmatpush.bf16.msra.mxu3 %v4122_v55  ;;  %v743_v47 = vsel %vm732_vm2, %v5731_v1, %v5761_v35  ;;  %v666_v55 = vsel %vm656_vm0, %v661_v33, %v665_v46  ;;  %v527_v56 = vshrl.u32 %v5720_v50, 16  ;;  %v667_v58 = vrot.slane %v5733_v3, 1  ;;  %v4904_v59 = vld [vmem:[#allocation7 + $0xa4] sm:$0xf]  ;;  %v4143_v61 = vld [vmem:[#allocation7 + $0xb4] sm:$0xf0] }
  0x58   : > { %v5788_v60 = vor.u32 %v4875_v52, %v4021_v49  ;;  %v670_v33 = vsel %vm656_vm0, %v665_v46, %v669_v48  ;;  %v533_v63 = vrot.slane %v531_v54, 1  ;;  %v543_v0 = vshrl.u32 %v5766_v40, 16  ;;  %v4899_v13 = vld [vmem:[#allocation7 + $0x7c] sm:$0xf]  ;;  %v4894_v25 = vld [vmem:[#allocation7 + $0x54] sm:$0xf] }
  0x59   : > { %1906 = vmatpush.bf16.msra.mxu0 %v4102_v5  ;;  %695 = vrot.lane.b32.xlu1 %v664_v14, %s5502_s24  ;;  %v547_v1 = vshll.u32 %v5778_v53, 16  ;;  %v529_v2 = vor.u32 %v527_v56, %v5740_v12  ;;  %v668_v4 = vsel %vm656_vm0, %v663_v62, %v667_v58  ;;  %v535_v9 = vshrl.u32 %v5733_v3, 16  ;;  %v4123_v14 = vld [vmem:[#allocation7 + $0x8c] sm:$0xf0]  ;;  %v4889_v31 = vld [vmem:[#allocation7 + $0x2c] sm:$0xf] }
  0x5a   : > { %5100 = vmatpush.bf16.msra.mxu1 %v4102_v5  ;;  %5101 = vmatpush.bf16.msra.mxu2 %v4102_v5  ;;  %6965 = vst [vmem:[#allocation22_spill] sm:$0xff] %v5788_v60  ;;  %v551_v6 = vshrl.u32 %v5788_v60, 16  ;;  %v539_v10 = vshll.u32 %v5788_v60, 16  ;;  %v545_v11 = vor.u32 %v543_v0, %v533_v63  ;;  %v745_v62 = vrot.slane %v523_v16, 2  ;;  %v4103_v16 = vld [vmem:[#allocation7 + $0x64] sm:$0xf0] }
  0x5b   : > { %5102 = vmatpush.bf16.msra.mxu3 %v4102_v5  ;;  %619 = vrot.lane.b32.xlu2 %v510_v30, %s5503_s26  ;;  %v4146_v5 = vor.u32 %v4904_v59, %v4143_v61  ;;  %v549_v12 = vrot.slane %v547_v1, 1  ;;  %v534_v15 = vsel %vm478_vm1, %v529_v2, %v533_v63  ;;  %v744_v18 = vrot.slane %v535_v9, 1  ;;  %v4083_v32 = vld [vmem:[#allocation7 + $0x3c] sm:$0xf0]  ;;  %v4031_v37 = vld [vmem:[%s5655_s17 + $0x58] sm:$0xf0] }
  0x5c   : > { %v749_v20 = vrot.slane %v539_v10, 2  ;;  %v4126_v21 = vor.u32 %v4899_v13, %v4123_v14  ;;  %v541_v22 = vrot.slane %v539_v10, 1  ;;  %v4106_v30 = vor.u32 %v4894_v25, %v4103_v16  ;;  %v4029_v38 = vld [vmem:[%s5655_s17 + $0x50] sm:$0xf]  ;;  %v4037_v41 = vld [vmem:[%s5655_s17 + $0x60] sm:$0xf] }
  0x5d   : > { %621 = vrot.lane.b32.xlu0 %v518_v17, %s5503_s26  ;;  %1907 = vmatpush.bf16.msra.mxu0 %v4082_v19  ;;  %v537_v17 = vor.u32 %v535_v9, %v5755_v27  ;;  %v550_v24 = vsel %vm478_vm1, %v545_v11, %v549_v12  ;;  %v746_v28 = vor.u32 %v745_v62, %v744_v18  ;;  %v4879_v42 = vld [vmem:[%s5655_s17 + $0x64] sm:$0xf0]  ;;  %v4361_v46 = vld [vmem:[#allocation7 + $0x258] sm:$0xf]  ;;  %v671_v59 = vrot.slane %v5788_v60, 1  ;;  %s3773_s16 = scalar_lea.sflag [#allocation12], %s5649_s15 }
  0x5e   : > { %5103 = vmatpush.bf16.msra.mxu1 %v4082_v19  ;;  %5104 = vmatpush.bf16.msra.mxu2 %v4082_v19  ;;  %v5833_v45 = vor.u32 %v4879_v42, %v4037_v41  ;;  %v4063_v56 = vld [vmem:[#allocation7 + $0x14] sm:$0xf0]  ;;  %v553_v11 = vor.u32 %v551_v6, %v541_v22  ;;  %v4878_v62 = vld [vmem:[%s5655_s17 + $0x64] sm:$0xf]  ;;  %v4321_v25 = vld [vmem:[#allocation7 + $0x208] sm:$0xf] }
  0x5f   : > { %5105 = vmatpush.bf16.msra.mxu3 %v4082_v19  ;;  %v748_v19 = vrot.slane %v551_v6, 1  ;;  %v542_v27 = vsel %vm478_vm1, %v537_v17, %v541_v22  ;;  %v672_v1 = vsel %vm656_vm0, %v667_v58, %v671_v59  ;;  %v4956_v17 = vld [vmem:[#allocation7 + $0x240] sm:$0xf0]  ;;  %v4681_v22 = vld [vmem:[#allocation7 + $0x4d8] sm:$0xf]  ;;  %vm647_vm3 = vcmask 261120  }
  0x60   : > { %v571_v58 = vshll.u32 %v5833_v45, 16  ;;  %v4045_v41 = vld [vmem:[%s5655_s17 + $0x70] sm:$0xf]  ;;  %vm723_vm4 = vcmask 523264   ;;  %vm844_vm5 = vcmask 785408   ;;  %s5380_s29 = sshra.s32 %s3807_s14, 4  ;;  %s5381_s29 = int_to_ptr.hbm [resolvable:$true] %s5380_s29 }
  0x61   : > { %1908 = vmatpush.bf16.msra.mxu0 %v4062_v34  ;;  %623 = vrot.lane.b32.xlu1 %v526_v39, %s5503_s26  ;;  %v5818_v29 = vor.u32 %v749_v20, %v748_v19  ;;  %v4877_v39 = vld [vmem:[%s5655_s17 + $0x54] sm:$0xf0]  ;;  %v4039_v19 = vld [vmem:[%s5655_s17 + $0x68] sm:$0xf0]  ;;  %s5382_s10 = scalar_lea.hbm %s5381_s29, 8  ;;  %s5386_s2 = scalar_lea.hbm %s6897_s5, 16 }
  0x62   : > { %5106 = vmatpush.bf16.msra.mxu1 %v4062_v34  ;;  %5107 = vmatpush.bf16.msra.mxu2 %v4062_v34  ;;  %v5839_v52 = vor.u32 %v4877_v39, %v4029_v38  ;;  %v5874_v18 = vrot.slane %v571_v58, 1  ;;  %v4661_v38 = vld [vmem:[#allocation7 + $0x4b0] sm:$0xf]  ;;  %v5036_v39 = vld [vmem:[#allocation7 + $0x4c0] sm:$0xf0]  ;;  %p5383_p1 = scmp.ne.s32.totalorder %s5381_s29, %s5382_s10  ;;  %p5387_p10 = scmp.lt.s32.totalorder %s5381_s29, %s6897_s5 }
  0x63   : > { %5108 = vmatpush.bf16.msra.mxu3 %v4062_v34  ;;  %697 = vrot.lane.b32.xlu2 %v666_v55, %s5502_s24  ;;  %v4876_v34 = vld [vmem:[%s5655_s17 + $0x54] sm:$0xf]  ;;  %v751_v44 = vsel %vm732_vm2, %v746_v28, %v5818_v29  ;;  %v4884_v55 = vld [vmem:[#allocation7 + $0x4] sm:$0xf]  ;;  %v4662_v42 = vor.u32 %v5036_v39, %v4661_v38  ;;  %p5388_p12 = scmp.lt.s32.totalorder %s5386_s2, %s5382_s10 }
  0x64   : > { %1909 = vmatmul.bf16.vlgmr.msra.gmra.mxu0 %v5681_v7  ;;  %v5837_v49 = vor.u32 %v4876_v34, %v4031_v37  ;;  %v4066_v61 = vor.u32 %v4884_v55, %v4063_v56  ;;  %v675_v0 = vrot.slane %v5839_v52, 1  ;;  %v555_v2 = vshll.u32 %v5839_v52, 16  ;;  %p5384_p4 = pnand %p5383_p1, %p5616_p7 }
  0x65   : > { %2097 = vmatpush.bf16.msrb.mxu0 %v4206_v36  ;;  %772 = vrot.lane.b32.xlu0 %v743_v47, %s5504_s6  ;;  %v747_v36 = vsel %vm732_vm2, %v5761_v35, %v746_v28  ;;  %v4961_v47 = vld [vmem:[#allocation7 + $0x268] sm:$0xf0]  ;;  %v673_v35 = vrot.slane %v5778_v53, 1  ;;  %v5883_v28 = vor.u32 %v4878_v62, %v4039_v19  ;;  %p5389_p13 = por %p5388_p12, %p5387_p10 }
  0x66   : > { %1919 = vmatmul.bf16.vlgmr.msra.gmra.mxu1 %v5722_v51  ;;  %1929 = vmatmul.bf16.vlgmr.msra.gmra.mxu2 %v5788_v60  ;;  %v4362_v54 = vor.u32 %v4961_v47, %v4361_v46  ;;  %v563_v63 = vshll.u32 %v5837_v49, 16  ;;  %v557_v10 = vrot.slane %v555_v2, 1  ;;  %v753_v13 = vrot.slane %v555_v2, 2  ;;  %v4047_v47 = vld [vmem:[%s5655_s17 + $0x78] sm:$0xf0]  ;;  %p5385_p8 = pneg %p5384_p4 }
  0x67   : > { %1939 = vmatmul.bf16.vlgmr.msra.gmra.mxu3 %v5833_v45  ;;  %v677_v55 = vrot.slane %v5837_v49, 1  ;;  %v579_v56 = vshll.u32 %v5883_v28, 16  ;;  %v4996_v2 = vld [vmem:[#allocation7 + $0x380] sm:$0xf0] }
  0x68   : > { %1950 = vmatpush.bf16.msrb.mxu1 %v4362_v54  ;;  %v5860_v9 = vrot.slane %v563_v63, 1  ;;  %v558_v20 = vsel %vm478_vm1, %v553_v11, %v557_v10  ;;  %v4301_v54 = vld [vmem:[#allocation7 + $0x1e0] sm:$0xf]  ;;  %v4281_v11 = vld [vmem:[#allocation7 + $0x1b8] sm:$0xf]  ;;  %p5390_p0 = pnand %p5389_p13, %p5385_p8 }
  0x69   : > { %2098 = vmatpush.bf16.msrb.mxu0 %v4186_v43  ;;  %701 = vrot.lane.b32.xlu1 %v670_v33, %s5502_s24  ;;  %v4086_v43 = vor.u32 %v4889_v31, %v4083_v32  ;;  %v674_v33 = vsel %vm656_vm0, %v669_v48, %v673_v35  ;;  %v676_v48 = vsel %vm656_vm0, %v671_v59, %v675_v0  ;;  %v4521_v31 = vld [vmem:[#allocation7 + $0x398] sm:$0xf]  ;;  %v5001_v32 = vld [vmem:[#allocation7 + $0x3a8] sm:$0xf0]  ;;  %v4501_v59 = vld [vmem:[#allocation7 + $0x370] sm:$0xf] }
  0x6a   : > { %v4522_v37 = vor.u32 %v5001_v32, %v4521_v31  ;;  %v581_v19 = vrot.slane %v579_v56, 1  ;;  %v575_v31 = vshrl.u32 %v5837_v49, 16  ;;  %v4986_v56 = vld [vmem:[#allocation7 + $0x330] sm:$0xf0] }
  0x6b   : > { %625 = vrot.lane.b32.xlu2 %v534_v15, %s5503_s26 }
  0x6c   : > { %1999 = vmatpush.bf16.msrb.mxu2 %v4522_v37  ;;  %v577_v38 = vor.u32 %v575_v31, %v5860_v9  ;;  %v4561_v31 = vld [vmem:[#allocation7 + $0x3e8] sm:$0xf] }
  0x6d   : > { %2099 = vmatpush.bf16.msrb.mxu0 %v4166_v57  ;;  %699 = vrot.lane.b32.xlu0 %v668_v4, %s5502_s24  ;;  %v559_v57 = vshrl.u32 %v5778_v53, 16 }
  0x6f   : > { %v561_v4 = vor.u32 %v559_v57, %v549_v12  ;;  %v4946_v57 = vld [vmem:[#allocation7 + $0x1f0] sm:$0xf0] }
  0x71   : > { %2100 = vmatpush.bf16.msrb.mxu0 %v4146_v5  ;;  %629 = vrot.lane.b32.xlu1 %v550_v24, %s5503_s26  ;;  %v567_v5 = vshrl.u32 %v5839_v52, 16  ;;  %v566_v14 = vsel %vm478_vm1, %v561_v4, %v5860_v9  ;;  %v5041_v24 = vld [vmem:[#allocation7 + $0x4e8] sm:$0xf0]  ;;  %v4641_v4 = vld [vmem:[#allocation7 + $0x488] sm:$0xf] }
  0x73   : > { %774 = vrot.lane.b32.xlu2 %v747_v36, %s5504_s6  ;;  %v752_v12 = vrot.slane %v567_v5, 1  ;;  %v569_v15 = vor.u32 %v567_v5, %v557_v10  ;;  %v678_v5 = vsel %vm656_vm0, %v673_v35, %v677_v55  ;;  %v5031_v10 = vld [vmem:[#allocation7 + $0x498] sm:$0xf0] }
  0x74   : > { %1914 = vmatmul.bf16.gmra.mxu0 %v5683_v8 }
  0x75   : > { %2101 = vmatpush.bf16.msrb.mxu0 %v4126_v21  ;;  %627 = vrot.lane.b32.xlu0 %v542_v27, %s5503_s26  ;;  %v4341_v21 = vld [vmem:[#allocation7 + $0x230] sm:$0xf]  ;;  %v5881_v16 = vor.u32 %v753_v13, %v752_v12  ;;  %v4951_v27 = vld [vmem:[#allocation7 + $0x218] sm:$0xf0]  ;;  %v574_v34 = vsel %vm478_vm1, %v569_v15, %v5874_v18  ;;  %v591_v12 = vshrl.u32 %v5883_v28, 16  ;;  %v4642_v13 = vor.u32 %v5031_v10, %v4641_v4 }
  0x76   : > { %1924 = vmatmul.bf16.gmra.mxu1 %v5733_v3  ;;  %1934 = vmatmul.bf16.gmra.mxu2 %v5839_v52  ;;  %v4342_v6 = vor.u32 %v4956_v17, %v4341_v21  ;;  %v4322_v36 = vor.u32 %v4951_v27, %v4321_v25  ;;  %v4481_v15 = vld [vmem:[#allocation7 + $0x348] sm:$0xf]  ;;  %v4621_v21 = vld [vmem:[#allocation7 + $0x460] sm:$0xf]  ;;  %v583_v27 = vshrl.u32 %v5833_v45, 16 }
  0x77   : > { %v4981_v10 = vld [vmem:[#allocation7 + $0x308] sm:$0xf0] }
  0x78   : > { %1951 = vmatpush.bf16.msrb.mxu1 %v4342_v6  ;;  %v756_v39 = vrot.slane %v583_v27, 1  ;;  %v585_v9 = vor.u32 %v583_v27, %v5874_v18  ;;  %v4976_v27 = vld [vmem:[#allocation7 + $0x2e0] sm:$0xf0] }
  0x79   : > { %2102 = vmatpush.bf16.msrb.mxu0 %v4106_v30  ;;  %776 = vrot.lane.b32.xlu1 %v751_v44, %s5504_s6  ;;  %v4682_v30 = vor.u32 %v5041_v24, %v4681_v22  ;;  %v4880_v44 = vld [vmem:[%s5655_s17 + $0x74] sm:$0xf] }
  0x7a   : > { %v5901_v63 = vor.u32 %v4880_v44, %v4047_v47  ;;  %v5026_v24 = vld [vmem:[#allocation7 + $0x470] sm:$0xf0]  ;;  %v4936_v44 = vld [vmem:[#allocation7 + $0x1a0] sm:$0xf0]  ;;  %v582_v47 = vsel %vm478_vm1, %v577_v38, %v581_v19 }
  0x7b   : > { %703 = vrot.lane.b32.xlu2 %v672_v1, %s5502_s24  ;;  %2048 = vmatpush.bf16.msrb.mxu3 %v4682_v30  ;;  %v4302_v1 = vor.u32 %v4946_v57, %v4301_v54  ;;  %v4622_v25 = vor.u32 %v5026_v24, %v4621_v21  ;;  %v4601_v57 = vld [vmem:[#allocation7 + $0x438] sm:$0xf]  ;;  %v4053_v21 = vld [vmem:[%s5663_s22] sm:$0xf] }
  0x7c   : > { %1952 = vmatpush.bf16.msrb.mxu1 %v4322_v36  ;;  %v595_v17 = vshll.u32 %v5901_v63, 16  ;;  %v593_v36 = vor.u32 %v591_v12, %v581_v19  ;;  %v5016_v12 = vld [vmem:[#allocation7 + $0x420] sm:$0xf0]  ;;  %v4421_v24 = vld [vmem:[#allocation7 + $0x2d0] sm:$0xf] }
  0x7d   : > { %2103 = vmatpush.bf16.msrb.mxu0 %v4086_v43  ;;  %705 = vrot.lane.b32.xlu0 %v674_v33, %s5502_s24  ;;  %v4881_v43 = vld [vmem:[%s5655_s17 + $0x74] sm:$0xf0]  ;;  %v681_v33 = vrot.slane %v5883_v28, 1  ;;  %v4422_v38 = vor.u32 %v4976_v27, %v4421_v24 }
  0x7e   : > { %v5891_v46 = vor.u32 %v4881_v43, %v4045_v41  ;;  %v5927_v37 = vrot.slane %v595_v17, 1  ;;  %v757_v41 = vrot.slane %v571_v58, 2  ;;  %v4261_v43 = vld [vmem:[#allocation7 + $0x190] sm:$0xf] }
  0x7f   : > { %2049 = vmatpush.bf16.msrb.mxu3 %v4662_v42  ;;  %v682_v35 = vsel %vm656_vm0, %v677_v55, %v681_v33  ;;  %v4262_v54 = vor.u32 %v4936_v44, %v4261_v43  ;;  %v4461_v55 = vld [vmem:[#allocation7 + $0x320] sm:$0xf]  ;;  %v4971_v43 = vld [vmem:[#allocation7 + $0x2b8] sm:$0xf0] }
  0x80   : > { %1944 = vmatmul.bf16.gmra.mxu3 %v5891_v46  ;;  %v587_v62 = vshll.u32 %v5891_v46, 16  ;;  %1953 = vmatpush.bf16.msrb.mxu1 %v4302_v1  ;;  %v599_v30 = vshrl.u32 %v5891_v46, 16  ;;  %v4462_v58 = vor.u32 %v4986_v56, %v4461_v55  ;;  %v4931_v1 = vld [vmem:[#allocation7 + $0x178] sm:$0xf0]  ;;  %v4541_v44 = vld [vmem:[#allocation7 + $0x3c0] sm:$0xf] }
  0x81   : > { %2104 = vmatpush.bf16.msrb.mxu0 %v4066_v61  ;;  %707 = vrot.lane.b32.xlu1 %v676_v48, %s5502_s24  ;;  %v755_v61 = vsel %vm732_vm2, %v5818_v29, %v5881_v16  ;;  %v4502_v48 = vor.u32 %v4996_v2, %v4501_v59  ;;  %v679_v29 = vrot.slane %v5833_v45, 1  ;;  %v5021_v59 = vld [vmem:[#allocation7 + $0x448] sm:$0xf0]  ;;  %v598_v2 = vsel %vm478_vm1, %v593_v36, %v5927_v37  ;;  %v5006_v56 = vld [vmem:[#allocation7 + $0x3d0] sm:$0xf0] }
  0x82   : > { %v760_v42 = vrot.slane %v599_v30, 1  ;;  %v4602_v4 = vor.u32 %v5021_v59, %v4601_v57  ;;  %v4542_v59 = vor.u32 %v5006_v56, %v4541_v44 }
  0x83   : > { %631 = vrot.lane.b32.xlu2 %v558_v20, %s5503_s26  ;;  %2000 = vmatpush.bf16.msrb.mxu2 %v4502_v48  ;;  %v4991_v20 = vld [vmem:[#allocation7 + $0x358] sm:$0xf0]  ;;  %v680_v32 = vsel %vm656_vm0, %v675_v0, %v679_v29  ;;  %v761_v0 = vrot.slane %v587_v62, 2  ;;  %v4441_v48 = vld [vmem:[#allocation7 + $0x2f8] sm:$0xf] }
  0x84   : > { %2105 = vmatmul.bf16.vlgmr.msrb.gmra.mxu0 %v5681_v7  ;;  %v4482_v22 = vor.u32 %v4991_v20, %v4481_v15  ;;  %2050 = vmatpush.bf16.msrb.mxu3 %v4642_v13  ;;  %v4442_v18 = vor.u32 %v4981_v10, %v4441_v48  ;;  %v4055_v20 = vld [vmem:[%s5663_s22 + $0x8] sm:$0xf0] }
  0x85   : > { %633 = vrot.lane.b32.xlu0 %v566_v14, %s5503_s26  ;;  %v4941_v14 = vld [vmem:[#allocation7 + $0x1c8] sm:$0xf0]  ;;  %v5942_v15 = vor.u32 %v761_v0, %v760_v42  ;;  %v4401_v0 = vld [vmem:[#allocation7 + $0x2a8] sm:$0xf] }
  0x86   : > { %v4282_v6 = vor.u32 %v4941_v14, %v4281_v11  ;;  %v4581_v11 = vld [vmem:[#allocation7 + $0x410] sm:$0xf]  ;;  %v758_v14 = vor.u32 %v757_v41, %v756_v39  ;;  %v5011_v39 = vld [vmem:[#allocation7 + $0x3f8] sm:$0xf0]  ;;  %v4402_v55 = vor.u32 %v4971_v43, %v4401_v0  ;;  %v4343_v0 = vld [vmem:[#allocation7 + $0x244] sm:$0xf0] }
  0x87   : > { %2001 = vmatpush.bf16.msrb.mxu2 %v4482_v22  ;;  %v4582_v13 = vor.u32 %v5016_v12, %v4581_v11  ;;  %v4926_v22 = vld [vmem:[#allocation7 + $0x150] sm:$0xf0] }
  0x88   : > { %1954 = vmatpush.bf16.msrb.mxu1 %v4282_v6  ;;  %2051 = vmatpush.bf16.msrb.mxu3 %v4622_v25  ;;  %v759_v17 = vsel %vm732_vm2, %v5881_v16, %v758_v14  ;;  %v4221_v6 = vld [vmem:[#allocation7 + $0x140] sm:$0xf]  ;;  %v763_v36 = vsel %vm732_vm2, %v758_v14, %v5942_v15  ;;  %v4562_v16 = vor.u32 %v5011_v39, %v4561_v31  ;;  %v4999_v14 = vld [vmem:[#allocation7 + $0x39c] sm:$0xf]  ;;  %v5034_v39 = vld [vmem:[#allocation7 + $0x4b4] sm:$0xf] }
  0x89   : > { %635 = vrot.lane.b32.xlu1 %v574_v34, %s5503_s26  ;;  %v5925_v34 = vrot.slane %v587_v62, 1  ;;  %v4882_v62 = vld [vmem:[%s5663_s22 + $0x4] sm:$0xf]  ;;  %v4222_v25 = vor.u32 %v4926_v22, %v4221_v6 }
  0x8a   : > { %v5957_v41 = vor.u32 %v4882_v62, %v4055_v20  ;;  %v4523_v62 = vld [vmem:[#allocation7 + $0x3ac] sm:$0xf0] }
  0x8b   : > { %709 = vrot.lane.b32.xlu2 %v678_v5, %s5502_s24  ;;  %2002 = vmatpush.bf16.msrb.mxu2 %v4462_v58  ;;  %v590_v19 = vsel %vm478_vm1, %v585_v9, %v5925_v34  ;;  %v683_v9 = vrot.slane %v5891_v46, 1  ;;  %v4683_v20 = vld [vmem:[#allocation7 + $0x4ec] sm:$0xf0]  ;;  %v601_v22 = vor.u32 %v599_v30, %v5925_v34  ;;  %v4663_v30 = vld [vmem:[#allocation7 + $0x4c4] sm:$0xf0] }
  0x8c   : > { %1955 = vmatpush.bf16.msrb.mxu1 %v4262_v54  ;;  %2052 = vmatpush.bf16.msrb.mxu3 %v4602_v4  ;;  %v607_v54 = vshrl.u32 %v5901_v63, 16  ;;  %v611_v57 = vshll.u32 %v5957_v41, 16  ;;  %v689_v31 = vrot.slane %v5957_v41, 1  ;;  %v4666_v43 = vor.u32 %v5034_v39, %v4663_v30 }
  0x8d   : > { %778 = vrot.lane.b32.xlu0 %v755_v61, %s5504_s6  ;;  %v4241_v61 = vld [vmem:[#allocation7 + $0x168] sm:$0xf]  ;;  %v684_v11 = vsel %vm656_vm0, %v679_v29, %v683_v9 }
  0x8e   : > { %v4242_v5 = vor.u32 %v4931_v1, %v4241_v61  ;;  %v4381_v61 = vld [vmem:[#allocation7 + $0x280] sm:$0xf]  ;;  %v4966_v1 = vld [vmem:[#allocation7 + $0x290] sm:$0xf0]  ;;  %v613_v48 = vrot.slane %v611_v57, 1 }
  0x8f   : > { %2003 = vmatpush.bf16.msrb.mxu2 %v4442_v18  ;;  %v4382_v4 = vor.u32 %v4966_v1, %v4381_v61  ;;  %v4189_v1 = vld [vmem:[#allocation7 + $0xf8] sm:$0xf] }
  0x90   : > { %1956 = vmatpush.bf16.msrb.mxu1 %v4242_v5  ;;  %2053 = vmatpush.bf16.msrb.mxu3 %v4582_v13  ;;  %v609_v5 = vor.u32 %v607_v54, %v5927_v37  ;;  %v4526_v37 = vor.u32 %v4999_v14, %v4523_v62  ;;  %v4922_v54 = vld [vmem:[#allocation7 + $0x130] sm:$0xf0] }
  0x91   : > { %713 = vrot.lane.b32.xlu1 %v682_v35, %s5502_s24  ;;  %v4883_v35 = vld [vmem:[%s5663_s22 + $0x4] sm:$0xf0] }
  0x92   : > { %v4054_v42 = vor.u32 %v4883_v35, %v4053_v21  ;;  %v614_v13 = vsel %vm478_vm1, %v609_v5, %v613_v48  ;;  %v4959_v21 = vld [vmem:[#allocation7 + $0x25c] sm:$0xf]  ;;  %v4363_v35 = vld [vmem:[#allocation7 + $0x26c] sm:$0xf0]  ;;  %v4989_v5 = vld [vmem:[#allocation7 + $0x34c] sm:$0xf] }
  0x93   : > { %637 = vrot.lane.b32.xlu2 %v582_v47, %s5503_s26  ;;  %2004 = vmatpush.bf16.msrb.mxu2 %v4422_v38  ;;  %v4366_v6 = vor.u32 %v4959_v21, %v4363_v35  ;;  %v4503_v38 = vld [vmem:[#allocation7 + $0x384] sm:$0xf0]  ;;  %v4483_v48 = vld [vmem:[#allocation7 + $0x35c] sm:$0xf0] }
  0x94   : > { %2110 = vmatmul.bf16.gmra.mxu0 %v5683_v8  ;;  %1957 = vmatpush.bf16.msrb.mxu1 %v4222_v25  ;;  %v687_v58 = vrot.slane %v4054_v42, 1 }
  0x95   : > { %711 = vrot.lane.b32.xlu0 %v680_v32, %s5502_s24  ;;  %v685_v32 = vrot.slane %v5901_v63, 1  ;;  %2054 = vmatpush.bf16.msrb.mxu3 %v4562_v16 }
  0x96   : > { %v688_v10 = vsel %vm656_vm0, %v683_v9, %v687_v58 }
  0x97   : > { %v686_v47 = vsel %vm656_vm0, %v681_v33, %v685_v32  ;;  %2005 = vmatpush.bf16.msrb.mxu2 %v4402_v55  ;;  %v603_v33 = vshll.u32 %v4054_v42, 16  ;;  %v690_v34 = vsel %vm656_vm0, %v685_v32, %v689_v31 }
  0x98   : > { %2146 = vmatpush.bf16.msra.mxu1 %v4366_v6 }
  0x99   : > { %641 = vrot.lane.b32.xlu1 %v598_v2, %s5503_s26  ;;  %2055 = vmatpush.bf16.msrb.mxu3 %v4542_v59  ;;  %v764_v2 = vshrl.u32 %v4054_v42, 16  ;;  %v767_v12 = vrot.slane %v603_v33, 2  ;;  %v605_v24 = vrot.slane %v603_v33, 1  ;;  %v4917_v33 = vld [vmem:[#allocation7 + $0x108] sm:$0xf0] }
  0x9b   : > { %780 = vrot.lane.b32.xlu2 %v759_v17, %s5504_s6  ;;  %2006 = vmatpush.bf16.msrb.mxu2 %v4382_v4  ;;  %v766_v18 = vrot.slane %v764_v2, 1  ;;  %v606_v27 = vsel %vm478_vm1, %v601_v22, %v605_v24  ;;  %v4190_v2 = vor.u32 %v4917_v33, %v4189_v1  ;;  %v4907_v22 = vld [vmem:[#allocation7 + $0xb8] sm:$0xf0] }
  0x9d   : > { %639 = vrot.lane.b32.xlu0 %v590_v19, %s5503_s26  ;;  %v5039_v19 = vld [vmem:[#allocation7 + $0x4dc] sm:$0xf]  ;;  %v768_v29 = vor.u32 %v767_v12, %v766_v18  ;;  %v4643_v18 = vld [vmem:[#allocation7 + $0x49c] sm:$0xf0]  ;;  %v4949_v12 = vld [vmem:[#allocation7 + $0x20c] sm:$0xf] }
  0x9e   : > { %v4686_v17 = vor.u32 %v5039_v19, %v4683_v20  ;;  %v4169_v19 = vld [vmem:[#allocation7 + $0xd0] sm:$0xf] }
  0x9f   : > { %2195 = vmatpush.bf16.msra.mxu2 %v4526_v37  ;;  %v769_v25 = vsel %vm732_vm2, %v5942_v15, %v768_v29  ;;  %v4954_v15 = vld [vmem:[#allocation7 + $0x234] sm:$0xf]  ;;  %v4912_v37 = vld [vmem:[#allocation7 + $0xe0] sm:$0xf0]  ;;  %v4149_v29 = vld [vmem:[#allocation7 + $0xa8] sm:$0xf] }
  0xa0   : > { %2244 = vmatpush.bf16.msra.mxu3 %v4686_v17  ;;  %v4346_v44 = vor.u32 %v4954_v15, %v4343_v0  ;;  %v4170_v21 = vor.u32 %v4912_v37, %v4169_v19  ;;  %v4150_v24 = vor.u32 %v4907_v22, %v4149_v29  ;;  %v4603_v29 = vld [vmem:[#allocation7 + $0x44c] sm:$0xf0]  ;;  %v4939_v22 = vld [vmem:[#allocation7 + $0x1bc] sm:$0xf] }
  0xa1   : > { %782 = vrot.lane.b32.xlu1 %v763_v36, %s5504_s6  ;;  %v4994_v36 = vld [vmem:[#allocation7 + $0x374] sm:$0xf] }
  0xa2   : > { %v4506_v42 = vor.u32 %v4994_v36, %v4503_v38  ;;  %2147 = vmatpush.bf16.msra.mxu1 %v4346_v44  ;;  %v4463_v44 = vld [vmem:[#allocation7 + $0x334] sm:$0xf0] }
  0xa3   : > { %715 = vrot.lane.b32.xlu2 %v684_v11, %s5502_s24  ;;  %v4486_v11 = vor.u32 %v4989_v5, %v4483_v48  ;;  %v4069_v5 = vld [vmem:[#allocation7 + $0x8] sm:$0xf]  ;;  %v4887_v48 = vld [vmem:[#allocation7 + $0x18] sm:$0xf0] }
  0xa4   : > { %2115 = vmatmul.bf16.gmra.mxu0 %v5722_v51  ;;  %2196 = vmatpush.bf16.msra.mxu2 %v4506_v42  ;;  %v4897_v42 = vld [vmem:[#allocation7 + $0x68] sm:$0xf0] }
  0xa5   : > { %717 = vrot.lane.b32.xlu0 %v686_v47, %s5502_s24  ;;  %v4209_v47 = vld [vmem:[#allocation7 + $0x120] sm:$0xf]  ;;  %2245 = vmatpush.bf16.msra.mxu3 %v4666_v43  ;;  %v4984_v43 = vld [vmem:[#allocation7 + $0x324] sm:$0xf] }
  0xa6   : > { %v4210_v55 = vor.u32 %v4922_v54, %v4209_v47  ;;  %v5024_v47 = vld [vmem:[#allocation7 + $0x464] sm:$0xf]  ;;  %v4466_v54 = vor.u32 %v4984_v43, %v4463_v44 }
  0xa8   : > { %2293 = vmatpush.bf16.msra.mxu0 %v4210_v55  ;;  %2197 = vmatpush.bf16.msra.mxu2 %v4486_v11  ;;  %v4944_v55 = vld [vmem:[#allocation7 + $0x1e4] sm:$0xf] }
  0xa9   : > { %719 = vrot.lane.b32.xlu1 %v688_v10, %s5502_s24  ;;  %v5029_v10 = vld [vmem:[#allocation7 + $0x48c] sm:$0xf] }
  0xaa   : > { %v4646_v14 = vor.u32 %v5029_v10, %v4643_v18  ;;  %v4070_v10 = vor.u32 %v4887_v48, %v4069_v5 }
  0xab   : > { %643 = vrot.lane.b32.xlu2 %v606_v27, %s5503_s26  ;;  %v4902_v27 = vld [vmem:[#allocation7 + $0x90] sm:$0xf0] }
  0xac   : > { %2294 = vmatpush.bf16.msra.mxu0 %v4190_v2  ;;  %2246 = vmatpush.bf16.msra.mxu3 %v4646_v14 }
  0xad   : > { %645 = vrot.lane.b32.xlu0 %v614_v13, %s5503_s26  ;;  %v771_v41 = vpop.permute.xlu2 %770  ;;  %v4323_v13 = vld [vmem:[#allocation7 + $0x21c] sm:$0xf0]  ;;  %2198 = vmatpush.bf16.msra.mxu2 %v4466_v54  ;;  %v4423_v54 = vld [vmem:[#allocation7 + $0x2e4] sm:$0xf0] }
  0xae   : > { %v4326_v62 = vor.u32 %v4949_v12, %v4323_v13 }
  0xb0   : > { %2148 = vmatpush.bf16.msra.mxu1 %v4326_v62  ;;  %2295 = vmatpush.bf16.msra.mxu0 %v4170_v21  ;;  %v4443_v21 = vld [vmem:[#allocation7 + $0x30c] sm:$0xf0] }
  0xb3   : > { %721 = vrot.lane.b32.xlu2 %v690_v34, %s5502_s24 }
  0xb4   : > { %2120 = vmatmul.bf16.gmra.mxu0 %v5733_v3 }
  0xb5   : > { %784 = vrot.lane.b32.xlu0 %v769_v25, %s5504_s6  ;;  %v620_v59 = vpop.permute.xlu2 %619  ;;  %2296 = vmatpush.bf16.msra.mxu0 %v4150_v24  ;;  %v4129_v25 = vld [vmem:[#allocation7 + $0x80] sm:$0xf]  ;;  %v4283_v24 = vld [vmem:[#allocation7 + $0x1cc] sm:$0xf0] }
  0xb6   : > { %v6011_v35 = vsel %vm647_vm3, %v5699_v26, %v620_v59  ;;  %v4130_v31 = vor.u32 %v4902_v27, %v4129_v25  ;;  %v4286_v27 = vor.u32 %v4939_v22, %v4283_v24  ;;  %v4929_v22 = vld [vmem:[#allocation7 + $0x16c] sm:$0xf]  ;;  %v4243_v24 = vld [vmem:[#allocation7 + $0x17c] sm:$0xf0] }
  0xb9   : > { %2297 = vmatpush.bf16.msra.mxu0 %v4130_v31 }
  0xbb   : > { %v692_v16 = vpop.permute.xlu1 %691 }
  0xbd   : > { %v698_v6 = vpop.permute.xlu2 %697 }
  0xbf   : > { %v616_v56 = vpop.permute.xlu0 %615 }
  0xc0   : > { %v5995_v57 = vsel %vm647_vm3, %v5694_v23, %v616_v56 }
  0xc1   : > { %6966 = vst [vmem:[#allocation23_spill] sm:$0xff] %v5995_v57  ;;  %1958 = vmatmul.bf16.vlgmr.msrb.gmra.mxu1 %v5995_v57 }
  0xc3   : > { %v694_v32 = vpop.permute.xlu1 %693 }
  0xc4   : > { %v724_v9 = vsel %vm723_vm4, %v692_v16, %v694_v32  ;;  %2125 = vmatmul.bf16.gmra.mxu0 %v5788_v60 }
  0xc5   : > { %v6001_v58 = vsel %vm844_vm5, %v724_v9, %v771_v41  ;;  %v626_v0 = vpop.permute.xlu2 %625  ;;  %v4623_v41 = vld [vmem:[#allocation7 + $0x474] sm:$0xf0] }
  0xc6   : > { %6967 = vst [vmem:[#allocation24_spill] sm:$0xff] %v6001_v58  ;;  %2056 = vmatmul.bf16.vlgmr.msrb.gmra.mxu3 %v6001_v58  ;;  %v4626_v32 = vor.u32 %v5024_v47, %v4623_v41  ;;  %v4974_v47 = vld [vmem:[#allocation7 + $0x2d4] sm:$0xf] }
  0xc7   : > { %v618_v61 = vpop.permute.xlu0 %617  ;;  %v5014_v41 = vld [vmem:[#allocation7 + $0x414] sm:$0xf] }
  0xc8   : > { %v648_v23 = vsel %vm647_vm3, %v616_v56, %v618_v61  ;;  %v4303_v56 = vld [vmem:[#allocation7 + $0x1f4] sm:$0xf0]  ;;  %v4892_v61 = vld [vmem:[#allocation7 + $0x40] sm:$0xf0]  ;;  %2247 = vmatpush.bf16.msra.mxu3 %v4626_v32  ;;  %v4934_v32 = vld [vmem:[#allocation7 + $0x194] sm:$0xf] }
  0xc9   : > { %v6006_v4 = vsel %vm723_vm4, %v648_v23, %v692_v16  ;;  %v4109_v16 = vld [vmem:[#allocation7 + $0x58] sm:$0xf]  ;;  %v4306_v9 = vor.u32 %v4944_v55, %v4303_v56  ;;  %v4426_v55 = vor.u32 %v4974_v47, %v4423_v54  ;;  %v4583_v56 = vld [vmem:[#allocation7 + $0x424] sm:$0xf0] }
  0xca   : > { %6968 = vst [vmem:[#allocation25_spill] sm:$0xff] %v6006_v4  ;;  %2007 = vmatmul.bf16.vlgmr.msrb.gmra.mxu2 %v6006_v4  ;;  %v4110_v34 = vor.u32 %v4897_v42, %v4109_v16 }
  0xcb   : > { %v696_v20 = vpop.permute.xlu1 %695  ;;  %2149 = vmatpush.bf16.msra.mxu1 %v4306_v9  ;;  %v4263_v9 = vld [vmem:[#allocation7 + $0x1a4] sm:$0xf0] }
  0xcc   : > { %v725_v36 = vsel %vm723_vm4, %v696_v20, %v698_v6  ;;  %2298 = vmatpush.bf16.msra.mxu0 %v4110_v34 }
  0xcd   : > { %v775_v12 = vpop.permute.xlu2 %774 }
  0xcf   : > { %v622_v17 = vpop.permute.xlu0 %621  ;;  %2150 = vmatpush.bf16.msra.mxu1 %v4286_v27  ;;  %v4246_v27 = vor.u32 %v4929_v22, %v4243_v24 }
  0xd0   : > { %v649_v38 = vsel %vm647_vm3, %v620_v59, %v622_v17  ;;  %v4089_v59 = vld [vmem:[#allocation7 + $0x30] sm:$0xf]  ;;  %v5019_v17 = vld [vmem:[#allocation7 + $0x43c] sm:$0xf] }
  0xd1   : > { %1963 = vmatmul.bf16.gmra.mxu1 %v6011_v35  ;;  %v6021_v15 = vsel %vm723_vm4, %v649_v38, %v696_v20  ;;  %v4090_v1 = vor.u32 %v4892_v61, %v4089_v59  ;;  %v4979_v20 = vld [vmem:[#allocation7 + $0x2fc] sm:$0xf]  ;;  %v4606_v25 = vor.u32 %v5019_v17, %v4603_v29  ;;  %v4586_v59 = vor.u32 %v5014_v41, %v4583_v56  ;;  %v5009_v17 = vld [vmem:[#allocation7 + $0x3ec] sm:$0xf]  ;;  %v4563_v29 = vld [vmem:[#allocation7 + $0x3fc] sm:$0xf0] }
  0xd2   : > { %v4446_v6 = vor.u32 %v4979_v20, %v4443_v21  ;;  %v4266_v61 = vor.u32 %v4934_v32, %v4263_v9  ;;  %v4969_v20 = vld [vmem:[#allocation7 + $0x2ac] sm:$0xf]  ;;  %v4403_v21 = vld [vmem:[#allocation7 + $0x2bc] sm:$0xf0]  ;;  %v4964_v32 = vld [vmem:[#allocation7 + $0x284] sm:$0xf] }
  0xd3   : > { %v624_v26 = vpop.permute.xlu1 %623  ;;  %2299 = vmatpush.bf16.msra.mxu0 %v4090_v1  ;;  %2248 = vmatpush.bf16.msra.mxu3 %v4606_v25  ;;  %v4566_v25 = vor.u32 %v5009_v17, %v4563_v29  ;;  %v4383_v9 = vld [vmem:[#allocation7 + $0x294] sm:$0xf0] }
  0xd4   : > { %2130 = vmatmul.bf16.gmra.mxu0 %v5839_v52  ;;  %v6027_v33 = vsel %vm647_vm3, %v5720_v50, %v624_v26  ;;  %v650_v50 = vsel %vm647_vm3, %v624_v26, %v626_v0  ;;  %2199 = vmatpush.bf16.msra.mxu2 %v4446_v6  ;;  %v4406_v6 = vor.u32 %v4969_v20, %v4403_v21 }
  0xd5   : > { %v704_v31 = vpop.permute.xlu2 %703  ;;  %2151 = vmatpush.bf16.msra.mxu1 %v4266_v61  ;;  %v4386_v61 = vor.u32 %v4964_v32, %v4383_v9  ;;  %v5042_v9 = vld [vmem:[#allocation7 + $0x4f0] sm:$0xf0] }
  0xd7   : > { %v773_v39 = vpop.permute.xlu0 %772  ;;  %2300 = vmatpush.bf16.msra.mxu0 %v4070_v10  ;;  %2249 = vmatpush.bf16.msra.mxu3 %v4586_v59  ;;  %v5004_v59 = vld [vmem:[#allocation7 + $0x3c4] sm:$0xf] }
  0xd8   : > { %v6018_v30 = vsel %vm844_vm5, %v725_v36, %v773_v39  ;;  %2200 = vmatpush.bf16.msra.mxu2 %v4426_v55 }
  0xd9   : > { %2061 = vmatmul.bf16.gmra.mxu3 %v6018_v30  ;;  %2152 = vmatpush.bf16.msra.mxu1 %v4246_v27 }
  0xda   : > { %2012 = vmatmul.bf16.gmra.mxu2 %v6021_v15 }
  0xdb   : > { %v702_v2 = vpop.permute.xlu1 %701  ;;  %2250 = vmatpush.bf16.msra.mxu3 %v4566_v25 }
  0xdc   : > { %2201 = vmatpush.bf16.msra.mxu2 %v4406_v6 }
  0xdd   : > { %v632_v42 = vpop.permute.xlu2 %631 }
  0xdf   : > { %v700_v23 = vpop.permute.xlu0 %699 }
  0xe0   : > { %v726_v18 = vsel %vm723_vm4, %v700_v23, %v702_v2  ;;  %v6039_v62 = vsel %vm723_vm4, %v650_v50, %v700_v23  ;;  %v6067_v23 = vsel %vm647_vm3, %v5778_v53, %v632_v42  ;;  %2202 = vmatpush.bf16.msra.mxu2 %v4386_v61 }
  0xe1   : > { %1968 = vmatmul.bf16.gmra.mxu1 %v6027_v33  ;;  %v6030_v11 = vpop.f32.mrf.mxu0  ;;  %v6036_v13 = vsel %vm844_vm5, %v726_v18, %v775_v12 }
  0xe3   : > { %v630_v37 = vpop.permute.xlu1 %629 }
  0xe4   : > { %2135 = vmatmul.bf16.gmra.mxu0 %v5833_v45 }
  0xe5   : > { %v710_v2 = vpop.permute.xlu2 %709 }
  0xe7   : > { %v628_v14 = vpop.permute.xlu0 %627 }
  0xe8   : > { %v6047_v36 = vsel %vm647_vm3, %v5766_v40, %v628_v14  ;;  %v651_v34 = vsel %vm647_vm3, %v628_v14, %v630_v37 }
  0xe9   : > { %2066 = vmatmul.bf16.gmra.mxu3 %v6036_v13  ;;  %v6042_v19 = vpop.f32.mrf.mxu0  ;;  %v6059_v40 = vsel %vm723_vm4, %v651_v34, %v704_v31  ;;  %v6124_v27 = vpop.f32.mrf.mxu2 }
  0xea   : > { %2017 = vmatmul.bf16.gmra.mxu2 %v6039_v62  ;;  %v6118_v22 = vpop.f32.mrf.mxu3 }
  0xeb   : > { %v777_v16 = vpop.permute.xlu1 %776 }
  0xed   : > { %v638_v37 = vpop.permute.xlu2 %637 }
  0xef   : > { %v706_v26 = vpop.permute.xlu0 %705 }
  0xf0   : > { %v727_v39 = vsel %vm723_vm4, %v704_v31, %v706_v26 }
  0xf1   : > { %1973 = vmatmul.bf16.gmra.mxu1 %v6047_v36  ;;  %v6050_v38 = vpop.f32.mrf.mxu0  ;;  %v6056_v0 = vsel %vm844_vm5, %v727_v39, %v777_v16 }
  0xf3   : > { %v708_v1 = vpop.permute.xlu1 %707 }
  0xf4   : > { %2140 = vmatmul.bf16.gmra.mxu0 %v5891_v46  ;;  %v728_v48 = vsel %vm723_vm4, %v708_v1, %v710_v2  ;;  %v4924_v2 = vld [vmem:[#allocation7 + $0x144] sm:$0xf] }
  0xf5   : > { %v781_v34 = vpop.permute.xlu2 %780 }
  0xf7   : > { %v634_v44 = vpop.permute.xlu0 %633 }
  0xf8   : > { %v652_v12 = vsel %vm647_vm3, %v632_v42, %v634_v44 }
  0xf9   : > { %2071 = vmatmul.bf16.gmra.mxu3 %v6056_v0  ;;  %v6062_v43 = vpop.f32.mrf.mxu0  ;;  %v6079_v53 = vsel %vm723_vm4, %v652_v12, %v708_v1  ;;  %v4543_v1 = vld [vmem:[#allocation7 + $0x3d4] sm:$0xf0] }
  0xfa   : > { %2022 = vmatmul.bf16.gmra.mxu2 %v6059_v40 }
  0xfb   : > { %v636_v18 = vpop.permute.xlu1 %635 }
  0xfc   : > { %v6087_v26 = vsel %vm647_vm3, %v5837_v49, %v636_v18  ;;  %v653_v47 = vsel %vm647_vm3, %v636_v18, %v638_v37  ;;  %v6098_v49 = vpop.f32.mrf.mxu1 }
  0xfd   : > { %v716_v37 = vpop.permute.xlu2 %715 }
  0xff   : > { %v779_v10 = vpop.permute.xlu0 %778 }
 0x100   : > { %v6076_v50 = vsel %vm844_vm5, %v728_v48, %v779_v10  ;;  %v4223_v48 = vld [vmem:[#allocation7 + $0x154] sm:$0xf0]  ;;  %v4546_v10 = vor.u32 %v5004_v59, %v4543_v1  ;;  %v6139_v1 = vpop.f32.mrf.mxu3 }
 0x101   : > { %1978 = vmatmul.bf16.gmra.mxu1 %v6067_v23  ;;  %v6070_v5 = vpop.f32.mrf.mxu0  ;;  %v4226_v18 = vor.u32 %v4924_v2, %v4223_v48  ;;  %v6141_v48 = vpop.f32.mrf.mxu2 }
 0x102   : > { %6969 = vst [vmem:[#allocation26_spill] sm:$0xff] %v6070_v5  ;;  %2251 = vmatpush.bf16.msra.mxu3 %v4546_v10 }
 0x103   : > { %v714_v39 = vpop.permute.xlu1 %713  ;;  %2153 = vmatpush.bf16.msra.mxu1 %v4226_v18 }
 0x104   : > { %2301 = vmatmul.bf16.vlgmr.msra.gmra.mxu0 %v5681_v7  ;;  %v6111_v21 = vpop.f32.mrf.mxu1 }
 0x105   : > { %v644_v25 = vpop.permute.xlu2 %643 }
 0x106   : > { %v6137_v61 = vsel %vm647_vm3, %v5901_v63, %v644_v25 }
 0x107   : > { %v712_v31 = vpop.permute.xlu0 %711 }
 0x108   : > { %v729_v42 = vsel %vm723_vm4, %v712_v31, %v714_v39  ;;  %v6101_v41 = vsel %vm723_vm4, %v653_v47, %v712_v31  ;;  %v4529_v47 = vld [vmem:[#allocation7 + $0x3a0] sm:$0xf] }
 0x109   : > { %2076 = vmatmul.bf16.gmra.mxu3 %v6076_v50  ;;  %v6082_v14 = vpop.f32.mrf.mxu0  ;;  %v6096_v54 = vsel %vm844_vm5, %v729_v42, %v781_v34 }
 0x10a   : > { %6970 = vst [vmem:[#allocation27_spill] sm:$0xff] %v6082_v14  ;;  %2027 = vmatmul.bf16.gmra.mxu2 %v6079_v53  ;;  %v4649_v14 = vld [vmem:[#allocation7 + $0x490] sm:$0xf] }
 0x10b   : > { %v642_v56 = vpop.permute.xlu1 %641 }
 0x10c   : > { %v6133_v34 = vpop.f32.mrf.mxu1 }
 0x10d   : > { %v722_v2 = vpop.permute.xlu2 %721 }
 0x10f   : > { %v640_v44 = vpop.permute.xlu0 %639 }
 0x110   : > { %v6109_v12 = vsel %vm647_vm3, %v5883_v28, %v640_v44  ;;  %v654_v28 = vsel %vm647_vm3, %v640_v44, %v642_v56  ;;  %v5002_v44 = vld [vmem:[#allocation7 + $0x3b0] sm:$0xf0]  ;;  %v4689_v56 = vld [vmem:[#allocation7 + $0x4e0] sm:$0xf] }
 0x111   : > { %1983 = vmatmul.bf16.gmra.mxu1 %v6087_v26  ;;  %v6090_v16 = vpop.f32.mrf.mxu0  ;;  %v6127_v31 = vsel %vm723_vm4, %v654_v28, %v716_v37  ;;  %v4530_v32 = vor.u32 %v5002_v44, %v4529_v47  ;;  %v4690_v59 = vor.u32 %v5042_v9, %v4689_v56  ;;  %v6154_v56 = vpop.f32.mrf.mxu3 }
 0x112   : > { %6971 = vst [vmem:[#allocation28_spill] sm:$0xff] %v6090_v16 }
 0x113   : > { %v783_v29 = vpop.permute.xlu1 %782  ;;  %2391 = vmatpush.bf16.msrb.mxu2 %v4530_v32  ;;  %2440 = vmatpush.bf16.msrb.mxu3 %v4690_v59  ;;  %v6163_v59 = vpop.f32.mrf.mxu2 }
 0x114   : > { %2306 = vmatmul.bf16.gmra.mxu0 %v5683_v8  ;;  %v6148_v63 = vpop.f32.mrf.mxu1 }
 0x117   : > { %v718_v20 = vpop.permute.xlu0 %717 }
 0x118   : > { %v730_v6 = vsel %vm723_vm4, %v716_v37, %v718_v20  ;;  %v4369_v37 = vld [vmem:[#allocation7 + $0x260] sm:$0xf]  ;;  %v4962_v20 = vld [vmem:[#allocation7 + $0x270] sm:$0xf0] }
 0x119   : > { %2081 = vmatmul.bf16.gmra.mxu3 %v6096_v54  ;;  %v6104_v55 = vpop.f32.mrf.mxu0  ;;  %v6122_v24 = vsel %vm844_vm5, %v730_v6, %v783_v29  ;;  %v4370_v28 = vor.u32 %v4962_v20, %v4369_v37  ;;  %v4997_v37 = vld [vmem:[#allocation7 + $0x388] sm:$0xf0]  ;;  %v4669_v20 = vld [vmem:[#allocation7 + $0x4b8] sm:$0xf] }
 0x11a   : > { %6972 = vst [vmem:[#allocation29_spill] sm:$0xff] %v6104_v55  ;;  %2032 = vmatmul.bf16.gmra.mxu2 %v6101_v41 }
 0x11b   : > { %v720_v18 = vpop.permute.xlu1 %719  ;;  %2342 = vmatpush.bf16.msrb.mxu1 %v4370_v28  ;;  %v6168_v28 = vpop.f32.mrf.mxu3 }
 0x11c   : > { %v731_v6 = vsel %vm723_vm4, %v720_v18, %v722_v2  ;;  %v4509_v2 = vld [vmem:[#allocation7 + $0x378] sm:$0xf]  ;;  %6978 = vst [vmem:[#allocation35_spill] sm:$0xff] %v6168_v28 }
 0x11f   : > { %v646_v42 = vpop.permute.xlu0 %645 }
 0x120   : > { %v655_v47 = vsel %vm647_vm3, %v644_v25, %v646_v42  ;;  %v4510_v25 = vor.u32 %v4997_v37, %v4509_v2  ;;  %v5037_v42 = vld [vmem:[#allocation7 + $0x4c8] sm:$0xf0]  ;;  %v6171_v2 = vpop.f32.mrf.mxu2 }
 0x121   : > { %1988 = vmatmul.bf16.gmra.mxu1 %v6109_v12  ;;  %v6114_v17 = vpop.f32.mrf.mxu0  ;;  %v6157_v32 = vsel %vm723_vm4, %v655_v47, %v720_v18  ;;  %v4349_v47 = vld [vmem:[#allocation7 + $0x238] sm:$0xf] }
 0x122   : > { %6973 = vst [vmem:[#allocation30_spill] sm:$0xff] %v6114_v17  ;;  %2392 = vmatpush.bf16.msrb.mxu2 %v4510_v25  ;;  %v4211_v17 = vld [vmem:[#allocation7 + $0x134] sm:$0xf0]  ;;  %v4191_v25 = vld [vmem:[#allocation7 + $0x10c] sm:$0xf0] }
 0x124   : > { %2311 = vmatmul.bf16.gmra.mxu0 %v5722_v51 }
 0x127   : > { %v785_v29 = vpop.permute.xlu0 %784 }
 0x128   : > { %v6152_v44 = vsel %vm844_vm5, %v731_v6, %v785_v29  ;;  %v4670_v29 = vor.u32 %v5037_v42, %v4669_v20  ;;  %v4915_v20 = vld [vmem:[#allocation7 + $0xfc] sm:$0xf] }
 0x129   : > { %2086 = vmatmul.bf16.gmra.mxu3 %v6122_v24  ;;  %v6130_v39 = vpop.f32.mrf.mxu0  ;;  %v4194_v42 = vor.u32 %v4915_v20, %v4191_v25 }
 0x12a   : > { %6974 = vst [vmem:[#allocation31_spill] sm:$0xff] %v6130_v39  ;;  %2037 = vmatmul.bf16.gmra.mxu2 %v6127_v31  ;;  %2441 = vmatpush.bf16.msrb.mxu3 %v4670_v29 }
 0x131   : > { %1993 = vmatmul.bf16.gmra.mxu1 %v6137_v61  ;;  %v6144_v10 = vpop.f32.mrf.mxu0 }
 0x132   : > { %6975 = vst [vmem:[#allocation32_spill] sm:$0xff] %v6144_v10  ;;  %v4920_v10 = vld [vmem:[#allocation7 + $0x124] sm:$0xf] }
 0x133   : > { %v4214_v55 = vor.u32 %v4920_v10, %v4211_v17  ;;  %v4910_v17 = vld [vmem:[#allocation7 + $0xd4] sm:$0xf]  ;;  %v4171_v10 = vld [vmem:[#allocation7 + $0xe4] sm:$0xf0] }
 0x134   : > { %2316 = vmatmul.bf16.gmra.mxu0 %v5733_v3  ;;  %v4174_v5 = vor.u32 %v4910_v17, %v4171_v10  ;;  %v4131_v17 = vld [vmem:[#allocation7 + $0x94] sm:$0xf0]  ;;  %v4111_v10 = vld [vmem:[#allocation7 + $0x6c] sm:$0xf0] }
 0x135   : > { %2489 = vmatpush.bf16.msrb.mxu0 %v4214_v55  ;;  %v5032_v55 = vld [vmem:[#allocation7 + $0x4a0] sm:$0xf0] }
 0x136   : > { %v4650_v20 = vor.u32 %v5032_v55, %v4649_v14 }
 0x138   : > { %2442 = vmatpush.bf16.msrb.mxu3 %v4650_v20 }
 0x139   : > { %2091 = vmatmul.bf16.gmra.mxu3 %v6152_v44  ;;  %v6160_v9 = vpop.f32.mrf.mxu0  ;;  %2490 = vmatpush.bf16.msrb.mxu0 %v4194_v42 }
 0x13a   : > { %6976 = vst [vmem:[#allocation33_spill] sm:$0xff] %v6160_v9  ;;  %2042 = vmatmul.bf16.gmra.mxu2 %v6157_v32  ;;  %v4957_v9 = vld [vmem:[#allocation7 + $0x248] sm:$0xf0] }
 0x13b   : > { %v4350_v39 = vor.u32 %v4957_v9, %v4349_v47  ;;  %v4489_v9 = vld [vmem:[#allocation7 + $0x350] sm:$0xf]  ;;  %v4992_v47 = vld [vmem:[#allocation7 + $0x360] sm:$0xf0] }
 0x13c   : > { %v4490_v16 = vor.u32 %v4992_v47, %v4489_v9  ;;  %v4329_v9 = vld [vmem:[#allocation7 + $0x210] sm:$0xf]  ;;  %v4900_v47 = vld [vmem:[#allocation7 + $0x84] sm:$0xf] }
 0x13d   : > { %2343 = vmatpush.bf16.msrb.mxu1 %v4350_v39  ;;  %2491 = vmatpush.bf16.msrb.mxu0 %v4174_v5  ;;  %v4134_v5 = vor.u32 %v4900_v47, %v4131_v17  ;;  %v4947_v17 = vld [vmem:[#allocation7 + $0x1f8] sm:$0xf0] }
 0x13e   : > { %v1959_v6 = vpop.f32.mrf.mxu1  ;;  %2393 = vmatpush.bf16.msrb.mxu2 %v4490_v16 }
 0x13f   : > { %v1960_v39 = vadd.f32 %v1959_v6, %v6030_v11  ;;  %v4952_v11 = vld [vmem:[#allocation7 + $0x220] sm:$0xf0] }
 0x140   : > { %v4330_v6 = vor.u32 %v4952_v11, %v4329_v9  ;;  %v4890_v11 = vld [vmem:[#allocation7 + $0x34] sm:$0xf] }
 0x141   : > { %2154 = vmatmul.bf16.vlgmr.msra.gmra.mxu1 %v5995_v57  ;;  %v6166_v18 = vpop.f32.mrf.mxu0 }
 0x142   : > { %6977 = vst [vmem:[#allocation34_spill] sm:$0xff] %v6166_v18  ;;  %2344 = vmatpush.bf16.msrb.mxu1 %v4330_v6  ;;  %v4091_v6 = vld [vmem:[#allocation7 + $0x44] sm:$0xf0] }
 0x144   : > { %2321 = vmatmul.bf16.gmra.mxu0 %v5788_v60 }
 0x146   : > { %v1961_v37 = vpop.f32.mrf.mxu1 }
 0x147   : > { %v1962_v14 = vadd.f32 %v1961_v37, %v6042_v19  ;;  %v4469_v37 = vld [vmem:[#allocation7 + $0x328] sm:$0xf] }
 0x149   : > { %2252 = vmatmul.bf16.vlgmr.msra.gmra.mxu3 %v6001_v58  ;;  %v6174_v29 = vpop.f32.mrf.mxu0  ;;  %v2057_v18 = vpop.f32.mrf.mxu3 }
 0x14a   : > { %6979 = vst [vmem:[#allocation36_spill] sm:$0xff] %v6174_v29  ;;  %2203 = vmatmul.bf16.vlgmr.msra.gmra.mxu2 %v6006_v4  ;;  %v4905_v29 = vld [vmem:[#allocation7 + $0xac] sm:$0xf]  ;;  %v4151_v4 = vld [vmem:[#allocation7 + $0xbc] sm:$0xf0] }
 0x14b   : > { %v4154_v57 = vor.u32 %v4905_v29, %v4151_v4  ;;  %v4895_v29 = vld [vmem:[#allocation7 + $0x5c] sm:$0xf] }
 0x14c   : > { %v4114_v55 = vor.u32 %v4895_v29, %v4111_v10 }
 0x14d   : > { %v2008_v60 = vpop.f32.mrf.mxu2  ;;  %2492 = vmatpush.bf16.msrb.mxu0 %v4154_v57 }
 0x14e   : > { %v2009_v25 = vadd.f32 %v2008_v60, %v1960_v39  ;;  %v1964_v58 = vpop.f32.mrf.mxu1 }
 0x14f   : > { %v1965_v47 = vadd.f32 %v1964_v58, %v6050_v38  ;;  %v4309_v38 = vld [vmem:[#allocation7 + $0x1e8] sm:$0xf] }
 0x150   : > { %v2058_v28 = vadd.f32 %v2057_v18, %v2009_v25  ;;  %v4987_v25 = vld [vmem:[#allocation7 + $0x338] sm:$0xf0] }
 0x151   : > { %2159 = vmatmul.bf16.gmra.mxu1 %v6011_v35  ;;  %v6179_v42 = vpop.f32.mrf.mxu0  ;;  %v2059_v60 = vpop.f32.mrf.mxu3  ;;  %2493 = vmatpush.bf16.msrb.mxu0 %v4134_v5  ;;  %v4470_v9 = vor.u32 %v4987_v25, %v4469_v37  ;;  %v5027_v5 = vld [vmem:[#allocation7 + $0x478] sm:$0xf0] }
 0x152   : > { %v6186_v20 = vmul.f32 %v2058_v28, %v2058_v28  ;;  %v4094_v28 = vor.u32 %v4890_v11, %v4091_v6 }
 0x153   : > { %2394 = vmatpush.bf16.msrb.mxu2 %v4470_v9 }
 0x154   : > { %2326 = vmatmul.bf16.gmra.mxu0 %v5839_v52  ;;  %6980 = vst [vmem:[#allocation37_spill] sm:$0xff] %v6186_v20  ;;  %v4310_v20 = vor.u32 %v4947_v17, %v4309_v38  ;;  %v4449_v17 = vld [vmem:[#allocation7 + $0x300] sm:$0xf] }
 0x155   : > { %v2010_v16 = vpop.f32.mrf.mxu2  ;;  %2494 = vmatpush.bf16.msrb.mxu0 %v4114_v55  ;;  %v4071_v55 = vld [vmem:[#allocation7 + $0x1c] sm:$0xf0] }
 0x156   : > { %v2011_v18 = vadd.f32 %v2010_v16, %v1962_v14  ;;  %v1966_v4 = vpop.f32.mrf.mxu1  ;;  %2345 = vmatpush.bf16.msrb.mxu1 %v4310_v20  ;;  %v4609_v20 = vld [vmem:[#allocation7 + $0x440] sm:$0xf] }
 0x157   : > { %v1967_v11 = vadd.f32 %v1966_v4, %v6062_v43  ;;  %v4982_v43 = vld [vmem:[#allocation7 + $0x310] sm:$0xf0] }
 0x158   : > { %v2060_v39 = vadd.f32 %v2059_v60, %v2011_v18  ;;  %v4629_v60 = vld [vmem:[#allocation7 + $0x468] sm:$0xf]  ;;  %v4450_v4 = vor.u32 %v4982_v43, %v4449_v17 }
 0x159   : > { %2257 = vmatmul.bf16.gmra.mxu3 %v6018_v30  ;;  %v6184_v57 = vpop.f32.mrf.mxu0  ;;  %v4630_v18 = vor.u32 %v5027_v5, %v4629_v60  ;;  %2495 = vmatpush.bf16.msrb.mxu0 %v4094_v28 }
 0x15a   : > { %v6188_v19 = vmul.f32 %v2060_v39, %v2060_v39  ;;  %2208 = vmatmul.bf16.gmra.mxu2 %v6021_v15  ;;  %v4885_v39 = vld [vmem:[#allocation7 + $0xc] sm:$0xf] }
 0x15b   : > { %2443 = vmatpush.bf16.msrb.mxu3 %v4630_v18  ;;  %v4074_v25 = vor.u32 %v4885_v39, %v4071_v55  ;;  %v5022_v39 = vld [vmem:[#allocation7 + $0x450] sm:$0xf0]  ;;  %2395 = vmatpush.bf16.msrb.mxu2 %v4450_v4 }
 0x15c   : > { %6981 = vst [vmem:[#allocation38_spill] sm:$0xff] %v6188_v19  ;;  %v2062_v14 = vpop.f32.mrf.mxu3  ;;  %v4610_v38 = vor.u32 %v5022_v39, %v4609_v20 }
 0x15d   : > { %v2013_v16 = vpop.f32.mrf.mxu2  ;;  %2496 = vmatpush.bf16.msrb.mxu0 %v4074_v25 }
 0x15e   : > { %v2014_v29 = vadd.f32 %v2013_v16, %v1965_v47  ;;  %v1969_v10 = vpop.f32.mrf.mxu1 }
 0x15f   : > { %v1970_v18 = vadd.f32 %v1969_v10, %v6098_v49  ;;  %2444 = vmatpush.bf16.msrb.mxu3 %v4610_v38 }
 0x160   : > { %v2063_v37 = vadd.f32 %v2062_v14, %v2014_v29 }
 0x161   : > { %2164 = vmatmul.bf16.gmra.mxu1 %v6027_v33  ;;  %v6195_v58 = vpop.f32.mrf.mxu0 }
 0x162   : > { %v6202_v28 = vmul.f32 %v2063_v37, %v2063_v37 }
 0x164   : > { %v2064_v9 = vpop.f32.mrf.mxu3  ;;  %2331 = vmatmul.bf16.gmra.mxu0 %v5833_v45  ;;  %6982 = vst [vmem:[#allocation39_spill] sm:$0xff] %v6202_v28 }
 0x165   : > { %v2015_v6 = vpop.f32.mrf.mxu2 }
 0x166   : > { %v2016_v47 = vadd.f32 %v2015_v6, %v1967_v11  ;;  %v1971_v60 = vpop.f32.mrf.mxu1 }
 0x167   : > { %v1972_v10 = vadd.f32 %v1971_v60, %v6111_v21  ;;  %v4429_v21 = vld [vmem:[#allocation7 + $0x2d8] sm:$0xf]  ;;  %v4977_v60 = vld [vmem:[#allocation7 + $0x2e8] sm:$0xf0] }
 0x168   : > { %v2065_v5 = vadd.f32 %v2064_v9, %v2016_v47  ;;  %v4289_v47 = vld [vmem:[#allocation7 + $0x1c0] sm:$0xf] }
 0x169   : > { %2262 = vmatmul.bf16.gmra.mxu3 %v6036_v13  ;;  %v6200_v14 = vpop.f32.mrf.mxu0 }
 0x16a   : > { %v6204_v16 = vmul.f32 %v2065_v5, %v2065_v5  ;;  %2213 = vmatmul.bf16.gmra.mxu2 %v6039_v62  ;;  %v4942_v5 = vld [vmem:[#allocation7 + $0x1d0] sm:$0xf0] }
 0x16b   : > { %v4290_v49 = vor.u32 %v4942_v5, %v4289_v47 }
 0x16c   : > { %6983 = vst [vmem:[#allocation40_spill] sm:$0xff] %v6204_v16  ;;  %v2067_v29 = vpop.f32.mrf.mxu3 }
 0x16d   : > { %v2018_v25 = vpop.f32.mrf.mxu2  ;;  %2346 = vmatpush.bf16.msrb.mxu1 %v4290_v49  ;;  %v4589_v49 = vld [vmem:[#allocation7 + $0x418] sm:$0xf] }
 0x16e   : > { %v2019_v37 = vadd.f32 %v2018_v25, %v1970_v18  ;;  %v1974_v11 = vpop.f32.mrf.mxu1 }
 0x16f   : > { %v1975_v47 = vadd.f32 %v1974_v11, %v6133_v34 }
 0x170   : > { %v2068_v9 = vadd.f32 %v2067_v29, %v2019_v37  ;;  %v4430_v37 = vor.u32 %v4977_v60, %v4429_v21  ;;  %v4269_v21 = vld [vmem:[#allocation7 + $0x198] sm:$0xf]  ;;  %v4937_v60 = vld [vmem:[#allocation7 + $0x1a8] sm:$0xf0] }
 0x171   : > { %2169 = vmatmul.bf16.gmra.mxu1 %v6047_v36  ;;  %v6211_v6 = vpop.f32.mrf.mxu0  ;;  %v4270_v34 = vor.u32 %v4937_v60, %v4269_v21  ;;  %v4569_v60 = vld [vmem:[#allocation7 + $0x3f0] sm:$0xf] }
 0x172   : > { %v6219_v25 = vmul.f32 %v2068_v9, %v2068_v9  ;;  %2396 = vmatpush.bf16.msrb.mxu2 %v4430_v37 }
 0x173   : > { %2347 = vmatpush.bf16.msrb.mxu1 %v4270_v34 }
 0x174   : > { %v2069_v17 = vpop.f32.mrf.mxu3  ;;  %2336 = vmatmul.bf16.gmra.mxu0 %v5891_v46  ;;  %6984 = vst [vmem:[#allocation41_spill] sm:$0xff] %v6219_v25 }
 0x175   : > { %v2020_v43 = vpop.f32.mrf.mxu2 }
 0x176   : > { %v2021_v4 = vadd.f32 %v2020_v43, %v1972_v10  ;;  %v1976_v20 = vpop.f32.mrf.mxu1  ;;  %v5017_v10 = vld [vmem:[#allocation7 + $0x428] sm:$0xf0] }
 0x177   : > { %v1977_v18 = vadd.f32 %v1976_v20, %v6148_v63  ;;  %v4590_v43 = vor.u32 %v5017_v10, %v4589_v49  ;;  %v4409_v10 = vld [vmem:[#allocation7 + $0x2b0] sm:$0xf] }
 0x178   : > { %v2070_v39 = vadd.f32 %v2069_v17, %v2021_v4 }
 0x179   : > { %2267 = vmatmul.bf16.gmra.mxu3 %v6056_v0  ;;  %v6217_v29 = vpop.f32.mrf.mxu0 }
 0x17a   : > { %v6221_v38 = vmul.f32 %v2070_v39, %v2070_v39  ;;  %2218 = vmatmul.bf16.gmra.mxu2 %v6059_v40  ;;  %2445 = vmatpush.bf16.msrb.mxu3 %v4590_v43 }
 0x17c   : > { %6985 = vst [vmem:[#allocation42_spill] sm:$0xff] %v6221_v38  ;;  %v2072_v5 = vpop.f32.mrf.mxu3 }
 0x17d   : > { %v2023_v17 = vpop.f32.mrf.mxu2 }
 0x17e   : > { %v2024_v9 = vadd.f32 %v2023_v17, %v1975_v47  ;;  %v1979_v4 = vpop.f32.mrf.mxu1  ;;  %v4972_v17 = vld [vmem:[#allocation7 + $0x2c0] sm:$0xf0] }
 0x17f   : > { %v4410_v43 = vor.u32 %v4972_v17, %v4409_v10  ;;  %v4249_v10 = vld [vmem:[#allocation7 + $0x170] sm:$0xf]  ;;  %v4932_v17 = vld [vmem:[#allocation7 + $0x180] sm:$0xf0] }
 0x180   : > { %v2073_v20 = vadd.f32 %v2072_v5, %v2024_v9  ;;  %v1980_v9 = vadd.f32 %v1979_v4, %v6124_v27  ;;  %v4250_v27 = vor.u32 %v4932_v17, %v4249_v10  ;;  %v4927_v10 = vld [vmem:[#allocation7 + $0x158] sm:$0xf0] }
 0x181   : > { %2174 = vmatmul.bf16.gmra.mxu1 %v6067_v23  ;;  %v6228_v39 = vpop.f32.mrf.mxu0  ;;  %2397 = vmatpush.bf16.msrb.mxu2 %v4410_v43 }
 0x182   : > { %v6234_v5 = vmul.f32 %v2073_v20, %v2073_v20  ;;  %2348 = vmatpush.bf16.msrb.mxu1 %v4250_v27  ;;  %v4549_v27 = vld [vmem:[#allocation7 + $0x3c8] sm:$0xf] }
 0x184   : > { %v2074_v11 = vpop.f32.mrf.mxu3  ;;  %2497 = vmatmul.bf16.vlgmr.msrb.gmra.mxu0 %v5681_v7  ;;  %6986 = vst [vmem:[#allocation43_spill] sm:$0xff] %v6234_v5 }
 0x185   : > { %v2025_v55 = vpop.f32.mrf.mxu2 }
 0x186   : > { %v2026_v63 = vadd.f32 %v2025_v55, %v1977_v18  ;;  %v1981_v25 = vpop.f32.mrf.mxu1  ;;  %v5012_v55 = vld [vmem:[#allocation7 + $0x400] sm:$0xf0] }
 0x187   : > { %v4570_v34 = vor.u32 %v5012_v55, %v4569_v60  ;;  %v1982_v4 = vadd.f32 %v1981_v25, %v6141_v48  ;;  %v4967_v48 = vld [vmem:[#allocation7 + $0x298] sm:$0xf0] }
 0x188   : > { %v2075_v37 = vadd.f32 %v2074_v11, %v2026_v63 }
 0x189   : > { %2272 = vmatmul.bf16.gmra.mxu3 %v6076_v50  ;;  %v6232_v47 = vpop.f32.mrf.mxu0 }
 0x18a   : > { %v6236_v49 = vmul.f32 %v2075_v37, %v2075_v37  ;;  %2223 = vmatmul.bf16.gmra.mxu2 %v6079_v53  ;;  %2446 = vmatpush.bf16.msrb.mxu3 %v4570_v34  ;;  %v4389_v34 = vld [vmem:[#allocation7 + $0x288] sm:$0xf] }
 0x18b   : > { %v4390_v25 = vor.u32 %v4967_v48, %v4389_v34 }
 0x18c   : > { %6987 = vst [vmem:[#allocation44_spill] sm:$0xff] %v6236_v49  ;;  %v2077_v21 = vpop.f32.mrf.mxu3 }
 0x18d   : > { %v2028_v63 = vpop.f32.mrf.mxu2  ;;  %2398 = vmatpush.bf16.msrb.mxu2 %v4390_v25 }
 0x18e   : > { %v2029_v20 = vadd.f32 %v2028_v63, %v1980_v9  ;;  %v1984_v11 = vpop.f32.mrf.mxu1 }
 0x18f   : > { %v1985_v17 = vadd.f32 %v1984_v11, %v6163_v59 }
 0x190   : > { %v2078_v37 = vadd.f32 %v2077_v21, %v2029_v20  ;;  %v4229_v20 = vld [vmem:[#allocation7 + $0x148] sm:$0xf] }
 0x191   : > { %2179 = vmatmul.bf16.gmra.mxu1 %v6087_v26  ;;  %v6243_v38 = vpop.f32.mrf.mxu0 }
 0x192   : > { %v6250_v55 = vmul.f32 %v2078_v37, %v2078_v37 }
 0x194   : > { %v2079_v28 = vpop.f32.mrf.mxu3  ;;  %2502 = vmatmul.bf16.gmra.mxu0 %v5683_v8  ;;  %6988 = vst [vmem:[#allocation45_spill] sm:$0xff] %v6250_v55 }
 0x195   : > { %v2030_v18 = vpop.f32.mrf.mxu2 }
 0x196   : > { %v2031_v43 = vadd.f32 %v2030_v18, %v1982_v4  ;;  %v1986_v60 = vpop.f32.mrf.mxu1  ;;  %v4230_v4 = vor.u32 %v4927_v10, %v4229_v20 }
 0x197   : > { %v1987_v59 = vadd.f32 %v1986_v60, %v6171_v2 }
 0x198   : > { %v2080_v9 = vadd.f32 %v2079_v28, %v2031_v43  ;;  %v5007_v28 = vld [vmem:[#allocation7 + $0x3d8] sm:$0xf0]  ;;  %2349 = vmatpush.bf16.msrb.mxu1 %v4230_v4  ;;  %v5040_v4 = vld [vmem:[#allocation7 + $0x4e4] sm:$0xf] }
 0x199   : > { %2277 = vmatmul.bf16.gmra.mxu3 %v6096_v54  ;;  %v6248_v21 = vpop.f32.mrf.mxu0 }
 0x19a   : > { %v6252_v63 = vmul.f32 %v2080_v9, %v2080_v9  ;;  %2228 = vmatmul.bf16.gmra.mxu2 %v6101_v41  ;;  %v4550_v9 = vor.u32 %v5007_v28, %v4549_v27  ;;  %v4531_v27 = vld [vmem:[#allocation7 + $0x3b4] sm:$0xf0] }
 0x19c   : > { %6989 = vst [vmem:[#allocation46_spill] sm:$0xff] %v6252_v63  ;;  %v2082_v18 = vpop.f32.mrf.mxu3  ;;  %2447 = vmatpush.bf16.msrb.mxu3 %v4550_v9  ;;  %v4217_v63 = vld [vmem:[#allocation7 + $0x128] sm:$0xf] }
 0x19d   : > { %v2033_v37 = vpop.f32.mrf.mxu2 }
 0x19e   : > { %v2034_v5 = vadd.f32 %v2033_v37, %v1985_v17  ;;  %v1989_v49 = vpop.f32.mrf.mxu1  ;;  %v4691_v37 = vld [vmem:[#allocation7 + $0x4f4] sm:$0xf0] }
 0x19f   : > { %v1990_v60 = vadd.f32 %v1989_v49, %v6118_v22 }
 0x1a0   : > { %v2083_v16 = vadd.f32 %v2082_v18, %v2034_v5  ;;  %v5000_v18 = vld [vmem:[#allocation7 + $0x3a4] sm:$0xf] }
 0x1a1   : > { %2184 = vmatmul.bf16.gmra.mxu1 %v6109_v12  ;;  %v6259_v34 = vpop.f32.mrf.mxu0  ;;  %v4534_v2 = vor.u32 %v5000_v18, %v4531_v27  ;;  %v4960_v18 = vld [vmem:[#allocation7 + $0x264] sm:$0xf]  ;;  %v4371_v27 = vld [vmem:[#allocation7 + $0x274] sm:$0xf0] }
 0x1a2   : > { %6990 = vst [vmem:[#allocation47_spill] sm:$0xff] %v6259_v34  ;;  %v6266_v17 = vmul.f32 %v2083_v16, %v2083_v16  ;;  %v4374_v22 = vor.u32 %v4960_v18, %v4371_v27  ;;  %v5035_v18 = vld [vmem:[#allocation7 + $0x4bc] sm:$0xf] }
 0x1a3   : > { %2587 = vmatpush.bf16.msra.mxu2 %v4534_v2 }
 0x1a4   : > { %v2084_v11 = vpop.f32.mrf.mxu3  ;;  %2507 = vmatmul.bf16.gmra.mxu0 %v5722_v51  ;;  %6992 = vst [vmem:[#allocation49_spill] sm:$0xff] %v6266_v17  ;;  %2538 = vmatpush.bf16.msra.mxu1 %v4374_v22  ;;  %v4671_v22 = vld [vmem:[#allocation7 + $0x4cc] sm:$0xf0]  ;;  %v6998_v17 = vld [vmem:[#allocation23_spill] sm:$0xff] }
 0x1a5   : > { %v2035_v48 = vpop.f32.mrf.mxu2 }
 0x1a6   : > { %v2036_v20 = vadd.f32 %v2035_v48, %v1987_v59  ;;  %v1991_v10 = vpop.f32.mrf.mxu1 }
 0x1a7   : > { %v1992_v49 = vadd.f32 %v1991_v10, %v6139_v1 }
 0x1a8   : > { %v2085_v43 = vadd.f32 %v2084_v11, %v2036_v20  ;;  %v4694_v11 = vor.u32 %v5040_v4, %v4691_v37 }
 0x1a9   : > { %2282 = vmatmul.bf16.gmra.mxu3 %v6122_v24  ;;  %v6264_v25 = vpop.f32.mrf.mxu0 }
 0x1aa   : > { %6991 = vst [vmem:[#allocation48_spill] sm:$0xff] %v6264_v25  ;;  %v6268_v5 = vmul.f32 %v2085_v43, %v2085_v43  ;;  %2233 = vmatmul.bf16.gmra.mxu2 %v6127_v31  ;;  %2636 = vmatpush.bf16.msra.mxu3 %v4694_v11  ;;  %v4995_v11 = vld [vmem:[#allocation7 + $0x37c] sm:$0xf] }
 0x1ac   : > { %6993 = vst [vmem:[#allocation50_spill] sm:$0xff] %v6268_v5  ;;  %v2087_v28 = vpop.f32.mrf.mxu3 }
 0x1ad   : > { %v2038_v59 = vpop.f32.mrf.mxu2 }
 0x1ae   : > { %v2039_v16 = vadd.f32 %v2038_v59, %v1990_v60  ;;  %v1994_v48 = vpop.f32.mrf.mxu1 }
 0x1af   : > { %v1995_v1 = vadd.f32 %v1994_v48, %v6154_v56  ;;  %v4955_v56 = vld [vmem:[#allocation7 + $0x23c] sm:$0xf]  ;;  %v4351_v48 = vld [vmem:[#allocation7 + $0x24c] sm:$0xf0] }
 0x1b0   : > { %v2088_v43 = vadd.f32 %v2087_v28, %v2039_v16  ;;  %v4511_v16 = vld [vmem:[#allocation7 + $0x38c] sm:$0xf0]  ;;  %v4354_v19 = vor.u32 %v4955_v56, %v4351_v48  ;;  %v4913_v48 = vld [vmem:[#allocation7 + $0xe8] sm:$0xf0] }
 0x1b1   : > { %2189 = vmatmul.bf16.gmra.mxu1 %v6137_v61  ;;  %v6275_v20 = vpop.f32.mrf.mxu0  ;;  %v4514_v27 = vor.u32 %v4995_v11, %v4511_v16  ;;  %v7001_v11 = vld [vmem:[#allocation22_spill] sm:$0xff] }
 0x1b2   : > { %6994 = vst [vmem:[#allocation51_spill] sm:$0xff] %v6275_v20  ;;  %v6282_v37 = vmul.f32 %v2088_v43, %v2088_v43  ;;  %v4674_v43 = vor.u32 %v5035_v18, %v4671_v22  ;;  %v7000_v20 = vld [vmem:[#allocation35_spill] sm:$0xff]  ;;  %2539 = vmatpush.bf16.msra.mxu1 %v4354_v19 }
 0x1b3   : > { %2588 = vmatpush.bf16.msra.mxu2 %v4514_v27  ;;  %v4918_v27 = vld [vmem:[#allocation7 + $0x110] sm:$0xf0] }
 0x1b4   : > { %v2089_v55 = vpop.f32.mrf.mxu3  ;;  %2512 = vmatmul.bf16.gmra.mxu0 %v5733_v3  ;;  %6996 = vst [vmem:[#allocation53_spill] sm:$0xff] %v6282_v37  ;;  %2637 = vmatpush.bf16.msra.mxu3 %v4674_v43  ;;  %v7002_v43 = vld [vmem:[#allocation24_spill] sm:$0xff] }
 0x1b5   : > { %v2040_v9 = vpop.f32.mrf.mxu2 }
 0x1b6   : > { %v2041_v2 = vadd.f32 %v2040_v9, %v1992_v49  ;;  %v1996_v4 = vpop.f32.mrf.mxu1 }
 0x1b7   : > { %v1997_v9 = vadd.f32 %v1996_v4, %v7000_v20  ;;  %v7006_v4 = vld [vmem:[#allocation25_spill] sm:$0xff] }
 0x1b8   : > { %v2090_v60 = vadd.f32 %v2089_v55, %v2041_v2 }
 0x1b9   : > { %2287 = vmatmul.bf16.gmra.mxu3 %v6152_v44  ;;  %v6280_v28 = vpop.f32.mrf.mxu0 }
 0x1ba   : > { %6995 = vst [vmem:[#allocation52_spill] sm:$0xff] %v6280_v28  ;;  %v6284_v59 = vmul.f32 %v2090_v60, %v2090_v60  ;;  %2238 = vmatmul.bf16.gmra.mxu2 %v6157_v32  ;;  %v4923_v28 = vld [vmem:[#allocation7 + $0x138] sm:$0xf0] }
 0x1bc   : > { %6997 = vst [vmem:[#allocation54_spill] sm:$0xff] %v6284_v59  ;;  %v2092_v10 = vpop.f32.mrf.mxu3 }
 0x1bd   : > { %v2043_v55 = vpop.f32.mrf.mxu2 }
 0x1be   : > { %v2044_v49 = vadd.f32 %v2043_v55, %v1995_v1  ;;  %v2155_v2 = vpop.f32.mrf.mxu1  ;;  %v4218_v1 = vor.u32 %v4923_v28, %v4217_v63  ;;  %v4197_v55 = vld [vmem:[#allocation7 + $0x100] sm:$0xf]  ;;  %v4990_v63 = vld [vmem:[#allocation7 + $0x354] sm:$0xf]  ;;  %v4491_v28 = vld [vmem:[#allocation7 + $0x364] sm:$0xf0] }
 0x1bf   : > { %v4494_v19 = vor.u32 %v4990_v63, %v4491_v28  ;;  %v4908_v63 = vld [vmem:[#allocation7 + $0xc0] sm:$0xf0] }
 0x1c0   : > { %v2093_v60 = vadd.f32 %v2092_v10, %v2044_v49  ;;  %2685 = vmatpush.bf16.msra.mxu0 %v4218_v1  ;;  %v4198_v49 = vor.u32 %v4918_v27, %v4197_v55  ;;  %v7007_v1 = vld [vmem:[#allocation26_spill] sm:$0xff]  ;;  %v4651_v55 = vld [vmem:[#allocation7 + $0x4a4] sm:$0xf0] }
 0x1c1   : > { %2350 = vmatmul.bf16.vlgmr.msrb.gmra.mxu1 %v6998_v17  ;;  %v6291_v5 = vpop.f32.mrf.mxu0  ;;  %2589 = vmatpush.bf16.msra.mxu2 %v4494_v19  ;;  %v7009_v19 = vld [vmem:[#allocation27_spill] sm:$0xff] }
 0x1c2   : > { %6999 = vst [vmem:[#allocation23_spill] sm:$0xff] %v6291_v5  ;;  %v6298_v56 = vmul.f32 %v2093_v60, %v2093_v60  ;;  %v4137_v60 = vld [vmem:[#allocation7 + $0x88] sm:$0xf] }
 0x1c4   : > { %v2094_v37 = vpop.f32.mrf.mxu3  ;;  %2517 = vmatmul.bf16.gmra.mxu0 %v7001_v11  ;;  %7004 = vst [vmem:[#allocation22_spill] sm:$0xff] %v6298_v56  ;;  %v4903_v56 = vld [vmem:[#allocation7 + $0x98] sm:$0xf0] }
 0x1c5   : > { %v2045_v16 = vpop.f32.mrf.mxu2  ;;  %2686 = vmatpush.bf16.msra.mxu0 %v4198_v49  ;;  %v4157_v49 = vld [vmem:[#allocation7 + $0xb0] sm:$0xf] }
 0x1c6   : > { %v2046_v18 = vadd.f32 %v2045_v16, %v1997_v9  ;;  %v2157_v10 = vpop.f32.mrf.mxu1  ;;  %v4177_v9 = vld [vmem:[#allocation7 + $0xd8] sm:$0xf]  ;;  %v2156_v16 = vadd.f32 %v2155_v2, %v7007_v1  ;;  %v4158_v34 = vor.u32 %v4908_v63, %v4157_v49  ;;  %v4950_v1 = vld [vmem:[#allocation7 + $0x214] sm:$0xf] }
 0x1c7   : > { %v4178_v27 = vor.u32 %v4913_v48, %v4177_v9  ;;  %v4331_v9 = vld [vmem:[#allocation7 + $0x224] sm:$0xf0] }
 0x1c8   : > { %v2095_v22 = vadd.f32 %v2094_v37, %v2046_v18  ;;  %v5030_v18 = vld [vmem:[#allocation7 + $0x494] sm:$0xf]  ;;  %v4334_v48 = vor.u32 %v4950_v1, %v4331_v9 }
 0x1c9   : > { %2448 = vmatmul.bf16.vlgmr.msrb.gmra.mxu3 %v7002_v43  ;;  %v6296_v59 = vpop.f32.mrf.mxu0  ;;  %2687 = vmatpush.bf16.msra.mxu0 %v4178_v27  ;;  %v4117_v27 = vld [vmem:[#allocation7 + $0x60] sm:$0xf] }
 0x1ca   : > { %7003 = vst [vmem:[#allocation35_spill] sm:$0xff] %v6296_v59  ;;  %v6300_v20 = vmul.f32 %v2095_v22, %v2095_v22  ;;  %2399 = vmatmul.bf16.vlgmr.msrb.gmra.mxu2 %v7006_v4  ;;  %v4654_v22 = vor.u32 %v5030_v18, %v4651_v55  ;;  %v2158_v18 = vadd.f32 %v2157_v10, %v7009_v19  ;;  %v4893_v19 = vld [vmem:[#allocation7 + $0x48] sm:$0xf0] }
 0x1cb   : > { %2540 = vmatpush.bf16.msra.mxu1 %v4334_v48  ;;  %v4097_v48 = vld [vmem:[#allocation7 + $0x38] sm:$0xf] }
 0x1cc   : > { %7005 = vst [vmem:[#allocation24_spill] sm:$0xff] %v6300_v20  ;;  %v2253_v37 = vpop.f32.mrf.mxu3  ;;  %2638 = vmatpush.bf16.msra.mxu3 %v4654_v22  ;;  %v4898_v22 = vld [vmem:[#allocation7 + $0x70] sm:$0xf0] }
 0x1cd   : > { %v2204_v59 = vpop.f32.mrf.mxu2  ;;  %2688 = vmatpush.bf16.msra.mxu0 %v4158_v34  ;;  %v4118_v63 = vor.u32 %v4898_v22, %v4117_v27  ;;  %v4631_v27 = vld [vmem:[#allocation7 + $0x47c] sm:$0xf0] }
 0x1ce   : > { %v2205_v5 = vadd.f32 %v2204_v59, %v2156_v16  ;;  %v2160_v25 = vpop.f32.mrf.mxu1  ;;  %v4138_v16 = vor.u32 %v4903_v56, %v4137_v60  ;;  %v4985_v56 = vld [vmem:[#allocation7 + $0x32c] sm:$0xf]  ;;  %v4471_v60 = vld [vmem:[#allocation7 + $0x33c] sm:$0xf0] }
 0x1cf   : > { %v4474_v9 = vor.u32 %v4985_v56, %v4471_v60  ;;  %v4888_v56 = vld [vmem:[#allocation7 + $0x20] sm:$0xf0] }
 0x1d0   : > { %v2254_v28 = vadd.f32 %v2253_v37, %v2205_v5 }
 0x1d1   : > { %2355 = vmatmul.bf16.gmra.mxu1 %v6011_v35  ;;  %v6307_v2 = vpop.f32.mrf.mxu0  ;;  %2689 = vmatpush.bf16.msra.mxu0 %v4138_v16 }
 0x1d2   : > { %7008 = vst [vmem:[#allocation25_spill] sm:$0xff] %v6307_v2  ;;  %v6314_v1 = vmul.f32 %v2254_v28, %v2254_v28  ;;  %v4098_v28 = vor.u32 %v4893_v19, %v4097_v48  ;;  %2590 = vmatpush.bf16.msra.mxu2 %v4474_v9  ;;  %v7014_v48 = vld [vmem:[#allocation29_spill] sm:$0xff] }
 0x1d4   : > { %v2255_v59 = vpop.f32.mrf.mxu3  ;;  %2522 = vmatmul.bf16.gmra.mxu0 %v5839_v52  ;;  %7011 = vst [vmem:[#allocation27_spill] sm:$0xff] %v6314_v1 }
 0x1d5   : > { %v2206_v55 = vpop.f32.mrf.mxu2  ;;  %2690 = vmatpush.bf16.msra.mxu0 %v4118_v63  ;;  %v4077_v63 = vld [vmem:[#allocation7 + $0x10] sm:$0xf] }
 0x1d6   : > { %v2207_v5 = vadd.f32 %v2206_v55, %v2158_v18  ;;  %v2162_v37 = vpop.f32.mrf.mxu1  ;;  %v7013_v18 = vld [vmem:[#allocation28_spill] sm:$0xff]  ;;  %v4078_v2 = vor.u32 %v4888_v56, %v4077_v63 }
 0x1d7   : > { %v2161_v16 = vadd.f32 %v2160_v25, %v7013_v18  ;;  %v4945_v18 = vld [vmem:[#allocation7 + $0x1ec] sm:$0xf]  ;;  %v2163_v19 = vadd.f32 %v2162_v37, %v7014_v48  ;;  %v4451_v37 = vld [vmem:[#allocation7 + $0x314] sm:$0xf0] }
 0x1d8   : > { %v2256_v49 = vadd.f32 %v2255_v59, %v2207_v5  ;;  %v5025_v5 = vld [vmem:[#allocation7 + $0x46c] sm:$0xf]  ;;  %v4311_v59 = vld [vmem:[#allocation7 + $0x1fc] sm:$0xf0] }
 0x1d9   : > { %2453 = vmatmul.bf16.gmra.mxu3 %v6018_v30  ;;  %v6312_v34 = vpop.f32.mrf.mxu0  ;;  %2691 = vmatpush.bf16.msra.mxu0 %v4098_v28  ;;  %v4314_v1 = vor.u32 %v4945_v18, %v4311_v59  ;;  %v4611_v18 = vld [vmem:[#allocation7 + $0x454] sm:$0xf0] }
 0x1da   : > { %7010 = vst [vmem:[#allocation26_spill] sm:$0xff] %v6312_v34  ;;  %v6316_v10 = vmul.f32 %v2256_v49, %v2256_v49  ;;  %2404 = vmatmul.bf16.gmra.mxu2 %v6021_v15  ;;  %v4634_v49 = vor.u32 %v5025_v5, %v4631_v27 }
 0x1db   : > { %2541 = vmatpush.bf16.msra.mxu1 %v4314_v1  ;;  %v5020_v1 = vld [vmem:[#allocation7 + $0x444] sm:$0xf] }
 0x1dc   : > { %7012 = vst [vmem:[#allocation55_spill] sm:$0xff] %v6316_v10  ;;  %v2258_v55 = vpop.f32.mrf.mxu3  ;;  %2639 = vmatpush.bf16.msra.mxu3 %v4634_v49  ;;  %v7018_v49 = vld [vmem:[#allocation30_spill] sm:$0xff] }
 0x1dd   : > { %v2209_v22 = vpop.f32.mrf.mxu2  ;;  %2692 = vmatpush.bf16.msra.mxu0 %v4078_v2  ;;  %v4980_v2 = vld [vmem:[#allocation7 + $0x304] sm:$0xf] }
 0x1de   : > { %v2210_v20 = vadd.f32 %v2209_v22, %v2161_v16  ;;  %v2165_v34 = vpop.f32.mrf.mxu1  ;;  %v4454_v59 = vor.u32 %v4980_v2, %v4451_v37  ;;  %v4940_v2 = vld [vmem:[#allocation7 + $0x1c4] sm:$0xf]  ;;  %v4291_v37 = vld [vmem:[#allocation7 + $0x1d4] sm:$0xf0] }
 0x1df   : > { %v2166_v63 = vadd.f32 %v2165_v34, %v7018_v49  ;;  %v4294_v34 = vor.u32 %v4940_v2, %v4291_v37  ;;  %v7020_v49 = vld [vmem:[#allocation31_spill] sm:$0xff]  ;;  %v7024_v2 = vld [vmem:[#allocation32_spill] sm:$0xff] }
 0x1e0   : > { %v2259_v60 = vadd.f32 %v2258_v55, %v2210_v20  ;;  %2591 = vmatpush.bf16.msra.mxu2 %v4454_v59 }
 0x1e1   : > { %2360 = vmatmul.bf16.gmra.mxu1 %v6027_v33  ;;  %v6323_v25 = vpop.f32.mrf.mxu0 }
 0x1e2   : > { %v6330_v55 = vmul.f32 %v2259_v60, %v2259_v60  ;;  %2542 = vmatpush.bf16.msra.mxu1 %v4294_v34  ;;  %v5015_v34 = vld [vmem:[#allocation7 + $0x41c] sm:$0xf] }
 0x1e4   : > { %v2260_v9 = vpop.f32.mrf.mxu3  ;;  %2527 = vmatmul.bf16.gmra.mxu0 %v5833_v45  ;;  %7016 = vst [vmem:[#allocation29_spill] sm:$0xff] %v6330_v55 }
 0x1e5   : > { %v2211_v16 = vpop.f32.mrf.mxu2 }
 0x1e6   : > { %v2212_v5 = vadd.f32 %v2211_v16, %v2163_v19  ;;  %v2167_v27 = vpop.f32.mrf.mxu1 }
 0x1e7   : > { %v2168_v10 = vadd.f32 %v2167_v27, %v7020_v49  ;;  %v4431_v27 = vld [vmem:[#allocation7 + $0x2ec] sm:$0xf0] }
 0x1e8   : > { %v2261_v28 = vadd.f32 %v2260_v9, %v2212_v5  ;;  %v4614_v9 = vor.u32 %v5020_v1, %v4611_v18 }
 0x1e9   : > { %2458 = vmatmul.bf16.gmra.mxu3 %v6036_v13  ;;  %v6328_v20 = vpop.f32.mrf.mxu0 }
 0x1ea   : > { %7015 = vst [vmem:[#allocation28_spill] sm:$0xff] %v6328_v20  ;;  %v6332_v22 = vmul.f32 %v2261_v28, %v2261_v28  ;;  %2409 = vmatmul.bf16.gmra.mxu2 %v6039_v62  ;;  %2640 = vmatpush.bf16.msra.mxu3 %v4614_v9  ;;  %v4975_v9 = vld [vmem:[#allocation7 + $0x2dc] sm:$0xf] }
 0x1ec   : > { %7017 = vst [vmem:[#allocation56_spill] sm:$0xff] %v6332_v22  ;;  %v2263_v56 = vpop.f32.mrf.mxu3 }
 0x1ed   : > { %v2214_v19 = vpop.f32.mrf.mxu2 }
 0x1ee   : > { %v2215_v60 = vadd.f32 %v2214_v19, %v2166_v63  ;;  %v2170_v16 = vpop.f32.mrf.mxu1 }
 0x1ef   : > { %v2171_v37 = vadd.f32 %v2170_v16, %v7024_v2  ;;  %v7025_v2 = vld [vmem:[#allocation33_spill] sm:$0xff] }
 0x1f0   : > { %v2264_v5 = vadd.f32 %v2263_v56, %v2215_v60  ;;  %v4434_v60 = vor.u32 %v4975_v9, %v4431_v27  ;;  %v4935_v9 = vld [vmem:[#allocation7 + $0x19c] sm:$0xf]  ;;  %v4271_v27 = vld [vmem:[#allocation7 + $0x1ac] sm:$0xf0] }
 0x1f1   : > { %2365 = vmatmul.bf16.gmra.mxu1 %v6047_v36  ;;  %v6339_v28 = vpop.f32.mrf.mxu0  ;;  %v4274_v16 = vor.u32 %v4935_v9, %v4271_v27  ;;  %v7029_v9 = vld [vmem:[#allocation34_spill] sm:$0xff] }
 0x1f2   : > { %7019 = vst [vmem:[#allocation30_spill] sm:$0xff] %v6339_v28  ;;  %v6346_v18 = vmul.f32 %v2264_v5, %v2264_v5  ;;  %2592 = vmatpush.bf16.msra.mxu2 %v4434_v60 }
 0x1f3   : > { %2543 = vmatpush.bf16.msra.mxu1 %v4274_v16  ;;  %v5010_v16 = vld [vmem:[#allocation7 + $0x3f4] sm:$0xf] }
 0x1f4   : > { %v2265_v20 = vpop.f32.mrf.mxu3  ;;  %2532 = vmatmul.bf16.gmra.mxu0 %v5891_v46  ;;  %7022 = vst [vmem:[#allocation57_spill] sm:$0xff] %v6346_v18 }
 0x1f5   : > { %v2216_v48 = vpop.f32.mrf.mxu2 }
 0x1f6   : > { %v2217_v59 = vadd.f32 %v2216_v48, %v2168_v10  ;;  %v2172_v1 = vpop.f32.mrf.mxu1  ;;  %v4591_v10 = vld [vmem:[#allocation7 + $0x42c] sm:$0xf0] }
 0x1f8   : > { %v2266_v63 = vadd.f32 %v2265_v20, %v2217_v59  ;;  %v4594_v59 = vor.u32 %v5015_v34, %v4591_v10 }
 0x1f9   : > { %2463 = vmatmul.bf16.gmra.mxu3 %v6056_v0  ;;  %v6344_v56 = vpop.f32.mrf.mxu0 }
 0x1fa   : > { %7021 = vst [vmem:[#allocation31_spill] sm:$0xff] %v6344_v56  ;;  %v6348_v19 = vmul.f32 %v2266_v63, %v2266_v63  ;;  %2414 = vmatmul.bf16.gmra.mxu2 %v6059_v40  ;;  %2641 = vmatpush.bf16.msra.mxu3 %v4594_v59  ;;  %v2173_v56 = vadd.f32 %v2172_v1, %v7025_v2  ;;  %v4970_v59 = vld [vmem:[#allocation7 + $0x2b4] sm:$0xf]  ;;  %v4411_v1 = vld [vmem:[#allocation7 + $0x2c4] sm:$0xf0] }
 0x1fc   : > { %7023 = vst [vmem:[#allocation58_spill] sm:$0xff] %v6348_v19  ;;  %v2268_v49 = vpop.f32.mrf.mxu3 }
 0x1fd   : > { %v2219_v48 = vpop.f32.mrf.mxu2 }
 0x1fe   : > { %v2220_v5 = vadd.f32 %v2219_v48, %v2171_v37  ;;  %v2175_v55 = vpop.f32.mrf.mxu1 }
 0x200   : > { %v2269_v63 = vadd.f32 %v2268_v49, %v2220_v5  ;;  %v4414_v5 = vor.u32 %v4970_v59, %v4411_v1  ;;  %v4930_v59 = vld [vmem:[#allocation7 + $0x174] sm:$0xf]  ;;  %v4251_v1 = vld [vmem:[#allocation7 + $0x184] sm:$0xf0] }
 0x201   : > { %2370 = vmatmul.bf16.gmra.mxu1 %v6067_v23  ;;  %v6355_v22 = vpop.f32.mrf.mxu0 }
 0x202   : > { %v6362_v10 = vmul.f32 %v2269_v63, %v2269_v63  ;;  %2593 = vmatpush.bf16.msra.mxu2 %v4414_v5 }
 0x204   : > { %v2270_v28 = vpop.f32.mrf.mxu3  ;;  %2693 = vmatmul.bf16.vlgmr.msra.gmra.mxu0 %v5681_v7  ;;  %7027 = vst [vmem:[#allocation33_spill] sm:$0xff] %v6362_v10  ;;  %v2176_v7 = vadd.f32 %v2175_v55, %v7029_v9  ;;  %v4254_v55 = vor.u32 %v4930_v59, %v4251_v1  ;;  %v7030_v9 = vld [vmem:[#allocation36_spill] sm:$0xff]  ;;  %v4925_v59 = vld [vmem:[#allocation7 + $0x14c] sm:$0xf] }
 0x205   : > { %v2221_v20 = vpop.f32.mrf.mxu2 }
 0x206   : > { %v2222_v60 = vadd.f32 %v2221_v20, %v2173_v56  ;;  %v2177_v34 = vpop.f32.mrf.mxu1  ;;  %v4571_v56 = vld [vmem:[#allocation7 + $0x404] sm:$0xf0]  ;;  %2544 = vmatpush.bf16.msra.mxu1 %v4254_v55 }
 0x207   : > { %v4574_v2 = vor.u32 %v5010_v16, %v4571_v56  ;;  %v2178_v19 = vadd.f32 %v2177_v34, %v7030_v9 }
 0x208   : > { %v2271_v37 = vadd.f32 %v2270_v28, %v2222_v60 }
 0x209   : > { %2468 = vmatmul.bf16.gmra.mxu3 %v6076_v50  ;;  %v6360_v49 = vpop.f32.mrf.mxu0 }
 0x20a   : > { %7026 = vst [vmem:[#allocation32_spill] sm:$0xff] %v6360_v49  ;;  %v6364_v48 = vmul.f32 %v2271_v37, %v2271_v37  ;;  %2419 = vmatmul.bf16.gmra.mxu2 %v6079_v53  ;;  %2642 = vmatpush.bf16.msra.mxu3 %v4574_v2  ;;  %v4391_v2 = vld [vmem:[#allocation7 + $0x29c] sm:$0xf0] }
 0x20c   : > { %7028 = vst [vmem:[#allocation59_spill] sm:$0xff] %v6364_v48  ;;  %v2273_v27 = vpop.f32.mrf.mxu3 }
 0x20d   : > { %v2224_v20 = vpop.f32.mrf.mxu2 }
 0x20e   : > { %v2225_v63 = vadd.f32 %v2224_v20, %v2176_v7  ;;  %v2180_v60 = vpop.f32.mrf.mxu1  ;;  %v4965_v20 = vld [vmem:[#allocation7 + $0x28c] sm:$0xf] }
 0x20f   : > { %v4394_v34 = vor.u32 %v4965_v20, %v4391_v2  ;;  %v2181_v1 = vadd.f32 %v2180_v60, %v6179_v42 }
 0x210   : > { %v2274_v37 = vadd.f32 %v2273_v27, %v2225_v63 }
 0x211   : > { %2375 = vmatmul.bf16.gmra.mxu1 %v6087_v26  ;;  %v6371_v18 = vpop.f32.mrf.mxu0  ;;  %2594 = vmatpush.bf16.msra.mxu2 %v4394_v34 }
 0x212   : > { %v6376_v27 = vmul.f32 %v2274_v37, %v2274_v37 }
 0x214   : > { %v2275_v49 = vpop.f32.mrf.mxu3  ;;  %2698 = vmatmul.bf16.gmra.mxu0 %v5683_v8  ;;  %7031 = vst [vmem:[#allocation34_spill] sm:$0xff] %v6376_v27  ;;  %v4231_v8 = vld [vmem:[#allocation7 + $0x15c] sm:$0xf0]  ;;  %v7047_v27 = vld [vmem:[#allocation38_spill] sm:$0xff] }
 0x215   : > { %v2226_v28 = vpop.f32.mrf.mxu2  ;;  %v4234_v55 = vor.u32 %v4925_v59, %v4231_v8 }
 0x216   : > { %v2227_v5 = vadd.f32 %v2226_v28, %v2178_v19  ;;  %v2182_v16 = vpop.f32.mrf.mxu1  ;;  %v5005_v28 = vld [vmem:[#allocation7 + $0x3cc] sm:$0xf] }
 0x217   : > { %2545 = vmatpush.bf16.msra.mxu1 %v4234_v55  ;;  %v2183_v20 = vadd.f32 %v2182_v16, %v6184_v57  ;;  %v5043_v55 = vld [vmem:[#allocation7 + $0x4f8] sm:$0xf0] }
 0x218   : > { %v2276_v7 = vadd.f32 %v2275_v49, %v2227_v5  ;;  %v4551_v49 = vld [vmem:[#allocation7 + $0x3dc] sm:$0xf0] }
 0x219   : > { %2473 = vmatmul.bf16.gmra.mxu3 %v6096_v54  ;;  %v6381_v63 = vpop.f32.mrf.mxu0  ;;  %v4554_v5 = vor.u32 %v5005_v28, %v4551_v49  ;;  %v5003_v28 = vld [vmem:[#allocation7 + $0x3b8] sm:$0xf0]  ;;  %v4697_v49 = vld [vmem:[#allocation7 + $0x4e8] sm:$0xf] }
 0x21a   : > { %v6378_v56 = vmul.f32 %v2276_v7, %v2276_v7  ;;  %2424 = vmatmul.bf16.gmra.mxu2 %v6101_v41 }
 0x21b   : > { %2643 = vmatpush.bf16.msra.mxu3 %v4554_v5 }
 0x21c   : > { %7032 = vst [vmem:[#allocation36_spill] sm:$0xff] %v6378_v56  ;;  %v2278_v19 = vpop.f32.mrf.mxu3  ;;  %v7048_v56 = vld [vmem:[#allocation37_spill] sm:$0xff] }
 0x21d   : > { %v2229_v9 = vpop.f32.mrf.mxu2 }
 0x21e   : > { %v2230_v7 = vadd.f32 %v2229_v9, %v2181_v1  ;;  %v2185_v10 = vpop.f32.mrf.mxu1 }
 0x21f   : > { %v2186_v16 = vadd.f32 %v2185_v10, %v6195_v58 }
 0x220   : > { %v2279_v48 = vadd.f32 %v2278_v19, %v2230_v7  ;;  %v4537_v19 = vld [vmem:[#allocation7 + $0x3a8] sm:$0xf]  ;;  %v4698_v7 = vor.u32 %v5043_v55, %v4697_v49 }
 0x221   : > { %2380 = vmatmul.bf16.gmra.mxu1 %v6109_v12  ;;  %v6389_v60 = vpop.f32.mrf.mxu0  ;;  %v4538_v57 = vor.u32 %v5003_v28, %v4537_v19 }
 0x222   : > { %v6392_v34 = vmul.f32 %v2279_v48, %v2279_v48  ;;  %2832 = vmatpush.bf16.msrb.mxu3 %v4698_v7  ;;  %v4517_v7 = vld [vmem:[#allocation7 + $0x380] sm:$0xf] }
 0x223   : > { %2783 = vmatpush.bf16.msrb.mxu2 %v4538_v57 }
 0x224   : > { %v2280_v42 = vpop.f32.mrf.mxu3  ;;  %2703 = vmatmul.bf16.gmra.mxu0 %v5722_v51  ;;  %7033 = vst [vmem:[#allocation60_spill] sm:$0xff] %v6392_v34 }
 0x225   : > { %v2231_v2 = vpop.f32.mrf.mxu2 }
 0x226   : > { %v2232_v59 = vadd.f32 %v2231_v2, %v2183_v20  ;;  %v2187_v8 = vpop.f32.mrf.mxu1  ;;  %v4377_v2 = vld [vmem:[#allocation7 + $0x268] sm:$0xf] }
 0x227   : > { %v2188_v10 = vadd.f32 %v2187_v8, %v6200_v14 }
 0x228   : > { %v2281_v37 = vadd.f32 %v2280_v42, %v2232_v59  ;;  %v4963_v59 = vld [vmem:[#allocation7 + $0x278] sm:$0xf0] }
 0x229   : > { %2478 = vmatmul.bf16.gmra.mxu3 %v6122_v24  ;;  %v4378_v58 = vor.u32 %v4963_v59, %v4377_v2 }
 0x22a   : > { %v6394_v1 = vmul.f32 %v2281_v37, %v2281_v37  ;;  %2429 = vmatmul.bf16.gmra.mxu2 %v6127_v31  ;;  %v6400_v37 = vpop.f32.mrf.mxu0 }
 0x22b   : > { %2734 = vmatpush.bf16.msrb.mxu1 %v4378_v58 }
 0x22c   : > { %7034 = vst [vmem:[#allocation61_spill] sm:$0xff] %v6394_v1  ;;  %v2283_v51 = vpop.f32.mrf.mxu3 }
 0x22d   : > { %v2234_v5 = vpop.f32.mrf.mxu2 }
 0x22e   : > { %v2235_v48 = vadd.f32 %v2234_v5, %v2186_v16  ;;  %v2190_v20 = vpop.f32.mrf.mxu1 }
 0x22f   : > { %v2191_v14 = vadd.f32 %v2190_v20, %v6211_v6  ;;  %v4958_v6 = vld [vmem:[#allocation7 + $0x250] sm:$0xf0]  ;;  %v5051_v20 = vld [vmem:[#allocation8 + $0x38] sm:$0xff] }
 0x230   : > { %v2284_v42 = vadd.f32 %v2283_v51, %v2235_v48  ;;  %v4677_v48 = vld [vmem:[#allocation7 + $0x4c0] sm:$0xf]  ;;  %3321 = vmatpush.bf16.msrb.mxu0 %v5051_v20 }
 0x231   : > { %2385 = vmatmul.bf16.gmra.mxu1 %v6137_v61 }
 0x232   : > { %v6405_v55 = vpop.f32.mrf.mxu0  ;;  %v6408_v51 = vmul.f32 %v2284_v42, %v2284_v42 }
 0x234   : > { %v2285_v19 = vpop.f32.mrf.mxu3  ;;  %2708 = vmatmul.bf16.gmra.mxu0 %v5733_v3  ;;  %7035 = vst [vmem:[#allocation62_spill] sm:$0xff] %v6408_v51  ;;  %v4998_v3 = vld [vmem:[#allocation7 + $0x390] sm:$0xf0] }
 0x235   : > { %v2236_v28 = vpop.f32.mrf.mxu2  ;;  %v4518_v58 = vor.u32 %v4998_v3, %v4517_v7 }
 0x236   : > { %v2237_v57 = vadd.f32 %v2236_v28, %v2188_v10  ;;  %v2192_v49 = vpop.f32.mrf.mxu1  ;;  %v5038_v10 = vld [vmem:[#allocation7 + $0x4d0] sm:$0xf0] }
 0x237   : > { %v4678_v42 = vor.u32 %v5038_v10, %v4677_v48  ;;  %2784 = vmatpush.bf16.msrb.mxu2 %v4518_v58  ;;  %v2193_v1 = vadd.f32 %v2192_v49, %v6217_v29  ;;  %v5050_v48 = vld [vmem:[#allocation8 + $0x30] sm:$0xff]  ;;  %v4497_v10 = vld [vmem:[#allocation7 + $0x358] sm:$0xf]  ;;  %v4993_v29 = vld [vmem:[#allocation7 + $0x368] sm:$0xf0] }
 0x238   : > { %v2286_v16 = vadd.f32 %v2285_v19, %v2237_v57  ;;  %3322 = vmatpush.bf16.msrb.mxu0 %v5050_v48  ;;  %v4498_v49 = vor.u32 %v4993_v29, %v4497_v10 }
 0x239   : > { %2483 = vmatmul.bf16.gmra.mxu3 %v6152_v44 }
 0x23a   : > { %v6410_v5 = vmul.f32 %v2286_v16, %v2286_v16  ;;  %2434 = vmatmul.bf16.gmra.mxu2 %v6157_v32  ;;  %2833 = vmatpush.bf16.msrb.mxu3 %v4678_v42  ;;  %v4357_v16 = vld [vmem:[#allocation7 + $0x240] sm:$0xf]  ;;  %v6417_v9 = vpop.f32.mrf.mxu0  ;;  %v5049_v42 = vld [vmem:[#allocation8 + $0x28] sm:$0xff] }
 0x23b   : > { %v4358_v34 = vor.u32 %v4958_v6, %v4357_v16  ;;  %2785 = vmatpush.bf16.msrb.mxu2 %v4498_v49 }
 0x23c   : > { %7036 = vst [vmem:[#allocation63_spill] sm:$0xff] %v6410_v5  ;;  %v2288_v8 = vpop.f32.mrf.mxu3  ;;  %3323 = vmatpush.bf16.msrb.mxu0 %v5049_v42  ;;  %v5046_v42 = vld [vmem:[#allocation8 + $0x10] sm:$0xff] }
 0x23d   : > { %v2239_v59 = vpop.f32.mrf.mxu2  ;;  %2735 = vmatpush.bf16.msrb.mxu1 %v4358_v34 }
 0x23e   : > { %v2240_v19 = vadd.f32 %v2239_v59, %v2191_v14  ;;  %v2351_v28 = vpop.f32.mrf.mxu1 }
 0x240   : > { %v2289_v57 = vadd.f32 %v2288_v8, %v2240_v19  ;;  %v4657_v19 = vld [vmem:[#allocation7 + $0x498] sm:$0xf] }
 0x241   : > { %2546 = vmatmul.bf16.vlgmr.msra.gmra.mxu1 %v6998_v17 }
 0x242   : > { %v6422_v59 = vmul.f32 %v2289_v57, %v2289_v57  ;;  %v6430_v16 = vpop.f32.mrf.mxu0 }
 0x244   : > { %v2290_v2 = vpop.f32.mrf.mxu3  ;;  %2713 = vmatmul.bf16.gmra.mxu0 %v7001_v11  ;;  %7037 = vst [vmem:[#allocation64_spill] sm:$0xff] %v6422_v59  ;;  %v2352_v11 = vadd.f32 %v2351_v28, %v6228_v39  ;;  %v4337_v39 = vld [vmem:[#allocation7 + $0x218] sm:$0xf]  ;;  %v4953_v28 = vld [vmem:[#allocation7 + $0x228] sm:$0xf0] }
 0x245   : > { %v2241_v7 = vpop.f32.mrf.mxu2  ;;  %v4338_v48 = vor.u32 %v4953_v28, %v4337_v39  ;;  %v4637_v39 = vld [vmem:[#allocation7 + $0x470] sm:$0xf]  ;;  %v5028_v28 = vld [vmem:[#allocation7 + $0x480] sm:$0xf0]  ;;  %v4943_v59 = vld [vmem:[#allocation7 + $0x1d8] sm:$0xf0] }
 0x246   : > { %v2242_v14 = vadd.f32 %v2241_v7, %v2193_v1  ;;  %v2353_v3 = vpop.f32.mrf.mxu1  ;;  %v5033_v1 = vld [vmem:[#allocation7 + $0x4a8] sm:$0xf0] }
 0x247   : > { %v4658_v6 = vor.u32 %v5033_v1, %v4657_v19  ;;  %v2354_v10 = vadd.f32 %v2353_v3, %v6232_v47  ;;  %2736 = vmatpush.bf16.msrb.mxu1 %v4338_v48  ;;  %v4477_v47 = vld [vmem:[#allocation7 + $0x330] sm:$0xf]  ;;  %v5045_v48 = vld [vmem:[#allocation8 + $0x8] sm:$0xff] }
 0x248   : > { %v2291_v8 = vadd.f32 %v2290_v2, %v2242_v14  ;;  %v5047_v2 = vld [vmem:[#allocation8 + $0x18] sm:$0xff] }
 0x249   : > { %2644 = vmatmul.bf16.vlgmr.msra.gmra.mxu3 %v7002_v43 }
 0x24a   : > { %v6424_v58 = vmul.f32 %v2291_v8, %v2291_v8  ;;  %2595 = vmatmul.bf16.vlgmr.msra.gmra.mxu2 %v7006_v4  ;;  %2834 = vmatpush.bf16.msrb.mxu3 %v4658_v6  ;;  %v5048_v8 = vld [vmem:[#allocation8 + $0x20] sm:$0xff]  ;;  %v6435_v1 = vpop.f32.mrf.mxu0 }
 0x24b   : > { %3324 = vmatpush.bf16.msrb.mxu0 %v5048_v8 }
 0x24c   : > { %7038 = vst [vmem:[#allocation65_spill] sm:$0xff] %v6424_v58  ;;  %v2449_v34 = vpop.f32.mrf.mxu3 }
 0x24d   : > { %v2400_v57 = vpop.f32.mrf.mxu2 }
 0x24e   : > { %v2401_v20 = vadd.f32 %v2400_v57, %v2352_v11  ;;  %v2356_v7 = vpop.f32.mrf.mxu1 }
 0x24f   : > { %3325 = vmatpush.bf16.msrb.mxu0 %v5047_v2 }
 0x250   : > { %v2450_v14 = vadd.f32 %v2449_v34, %v2401_v20  ;;  %v2357_v20 = vadd.f32 %v2356_v7, %v6243_v38  ;;  %v4317_v38 = vld [vmem:[#allocation7 + $0x1f0] sm:$0xf]  ;;  %v4948_v7 = vld [vmem:[#allocation7 + $0x200] sm:$0xf0] }
 0x251   : > { %2551 = vmatmul.bf16.gmra.mxu1 %v6011_v35 }
 0x252   : > { %v6438_v57 = vmul.f32 %v2450_v14, %v2450_v14  ;;  %v4638_v14 = vor.u32 %v5028_v28, %v4637_v39 }
 0x253   : > { %3326 = vmatpush.bf16.msrb.mxu0 %v5046_v42  ;;  %v6446_v42 = vpop.f32.mrf.mxu0 }
 0x254   : > { %v2451_v29 = vpop.f32.mrf.mxu3  ;;  %2718 = vmatmul.bf16.gmra.mxu0 %v5839_v52  ;;  %v4988_v52 = vld [vmem:[#allocation7 + $0x340] sm:$0xf0]  ;;  %2835 = vmatpush.bf16.msrb.mxu3 %v4638_v14  ;;  %v4983_v14 = vld [vmem:[#allocation7 + $0x318] sm:$0xf0] }
 0x255   : > { %v2402_v49 = vpop.f32.mrf.mxu2  ;;  %v4478_v3 = vor.u32 %v4988_v52, %v4477_v47  ;;  %v4318_v47 = vor.u32 %v4948_v7, %v4317_v38  ;;  %v4617_v38 = vld [vmem:[#allocation7 + $0x448] sm:$0xf]  ;;  %v5023_v7 = vld [vmem:[#allocation7 + $0x458] sm:$0xf0] }
 0x256   : > { %v2403_v11 = vadd.f32 %v2402_v49, %v2354_v10  ;;  %v2358_v19 = vpop.f32.mrf.mxu1 }
 0x257   : > { %2786 = vmatpush.bf16.msrb.mxu2 %v4478_v3  ;;  %3327 = vmatpush.bf16.msrb.mxu0 %v5045_v48  ;;  %v2359_v52 = vadd.f32 %v2358_v19, %v6248_v21  ;;  %v7041_v19 = vld [vmem:[#allocation47_spill] sm:$0xff] }
 0x258   : > { %v2452_v34 = vadd.f32 %v2451_v29, %v2403_v11  ;;  %2737 = vmatpush.bf16.msrb.mxu1 %v4318_v47 }
 0x259   : > { %2649 = vmatmul.bf16.gmra.mxu3 %v6018_v30 }
 0x25a   : > { %v6440_v6 = vmul.f32 %v2452_v34, %v2452_v34  ;;  %2600 = vmatmul.bf16.gmra.mxu2 %v6021_v15  ;;  %v5044_v34 = vld [vmem:[#allocation8] sm:$0xff] }
 0x25b   : > { %3328 = vmatpush.bf16.msrb.mxu0 %v5044_v34 }
 0x25c   : > { %v2454_v8 = vpop.f32.mrf.mxu3 }
 0x25d   : > { %v2405_v10 = vpop.f32.mrf.mxu2 }
 0x25e   : > { %v2406_v29 = vadd.f32 %v2405_v10, %v2357_v20  ;;  %v2361_v49 = vpop.f32.mrf.mxu1  ;;  %v4457_v10 = vld [vmem:[#allocation7 + $0x308] sm:$0xf] }
 0x25f   : > { %v4458_v21 = vor.u32 %v4983_v14, %v4457_v10  ;;  %v7042_v14 = vld [vmem:[#allocation48_spill] sm:$0xff] }
 0x260   : > { %v2455_v11 = vadd.f32 %v2454_v8, %v2406_v29  ;;  %v6457_v29 = vpop.f32.mrf.mxu0 }
 0x261   : > { %2556 = vmatmul.bf16.gmra.mxu1 %v6027_v33  ;;  %2787 = vmatpush.bf16.msrb.mxu2 %v4458_v21 }
 0x262   : > { %v6452_v8 = vmul.f32 %v2455_v11, %v2455_v11  ;;  %v4618_v11 = vor.u32 %v5023_v7, %v4617_v38 }
 0x264   : > { %v2456_v2 = vpop.f32.mrf.mxu3  ;;  %2723 = vmatmul.bf16.gmra.mxu0 %v5833_v45  ;;  %7039 = vst [vmem:[#allocation66_spill] sm:$0xff] %v6452_v8  ;;  %v2362_v45 = vadd.f32 %v2361_v49, %v7041_v19  ;;  %2836 = vmatpush.bf16.msrb.mxu3 %v4618_v11  ;;  %v7045_v11 = vld [vmem:[#allocation51_spill] sm:$0xff]  ;;  %v7054_v8 = vld [vmem:[#allocation40_spill] sm:$0xff] }
 0x265   : > { %v2407_v3 = vpop.f32.mrf.mxu2 }
 0x266   : > { %v2408_v20 = vadd.f32 %v2407_v3, %v2359_v52  ;;  %v2363_v39 = vpop.f32.mrf.mxu1 }
 0x267   : > { %v2364_v49 = vadd.f32 %v2363_v39, %v7042_v14  ;;  %v4978_v39 = vld [vmem:[#allocation7 + $0x2f0] sm:$0xf0] }
 0x268   : > { %v2457_v28 = vadd.f32 %v2456_v2, %v2408_v20  ;;  %v6465_v58 = vpop.f32.mrf.mxu0  ;;  %v5018_v14 = vld [vmem:[#allocation7 + $0x430] sm:$0xf0] }
 0x269   : > { %2654 = vmatmul.bf16.gmra.mxu3 %v6036_v13 }
 0x26a   : > { %v6454_v48 = vmul.f32 %v2457_v28, %v2457_v28  ;;  %2605 = vmatmul.bf16.gmra.mxu2 %v6039_v62  ;;  %v4297_v28 = vld [vmem:[#allocation7 + $0x1c8] sm:$0xf] }
 0x26b   : > { %v4298_v10 = vor.u32 %v4943_v59, %v4297_v28  ;;  %v4437_v59 = vld [vmem:[#allocation7 + $0x2e0] sm:$0xf] }
 0x26c   : > { %7040 = vst [vmem:[#allocation67_spill] sm:$0xff] %v6454_v48  ;;  %v2459_v34 = vpop.f32.mrf.mxu3  ;;  %v4597_v28 = vld [vmem:[#allocation7 + $0x420] sm:$0xf]  ;;  %v7055_v48 = vld [vmem:[#allocation39_spill] sm:$0xff] }
 0x26d   : > { %v2410_v47 = vpop.f32.mrf.mxu2  ;;  %2738 = vmatpush.bf16.msrb.mxu1 %v4298_v10 }
 0x26e   : > { %v2411_v52 = vadd.f32 %v2410_v47, %v2362_v45  ;;  %v2366_v3 = vpop.f32.mrf.mxu1  ;;  %v4438_v47 = vor.u32 %v4978_v39, %v4437_v59  ;;  %v4277_v59 = vld [vmem:[#allocation7 + $0x1a0] sm:$0xf]  ;;  %v4938_v39 = vld [vmem:[#allocation7 + $0x1b0] sm:$0xf0] }
 0x270   : > { %v2460_v20 = vadd.f32 %v2459_v34, %v2411_v52  ;;  %2788 = vmatpush.bf16.msrb.mxu2 %v4438_v47 }
 0x271   : > { %2561 = vmatmul.bf16.gmra.mxu1 %v6047_v36 }
 0x272   : > { %v6468_v34 = vmul.f32 %v2460_v20, %v2460_v20 }
 0x274   : > { %v2461_v19 = vpop.f32.mrf.mxu3  ;;  %2728 = vmatmul.bf16.gmra.mxu0 %v5891_v46  ;;  %7043 = vst [vmem:[#allocation47_spill] sm:$0xff] %v6468_v34  ;;  %v2367_v46 = vadd.f32 %v2366_v3, %v7045_v11  ;;  %v4278_v3 = vor.u32 %v4938_v39, %v4277_v59  ;;  %v7046_v11 = vld [vmem:[#allocation52_spill] sm:$0xff]  ;;  %v4577_v39 = vld [vmem:[#allocation7 + $0x3f8] sm:$0xf]  ;;  %v4933_v34 = vld [vmem:[#allocation7 + $0x188] sm:$0xf0] }
 0x275   : > { %v2412_v2 = vpop.f32.mrf.mxu2 }
 0x276   : > { %v2413_v21 = vadd.f32 %v2412_v2, %v2364_v49  ;;  %v2368_v38 = vpop.f32.mrf.mxu1  ;;  %v4598_v49 = vor.u32 %v5018_v14, %v4597_v28  ;;  %v7049_v2 = vpack.c.bf16 %v7047_v27, %v7048_v56  ;;  %2739 = vmatpush.bf16.msrb.mxu1 %v4278_v3  ;;  %v7052_v27 = vld [vmem:[#allocation23_spill] sm:$0xff] }
 0x277   : > { %v2369_v51 = vadd.f32 %v2368_v38, %v7046_v11  ;;  %v4417_v38 = vld [vmem:[#allocation7 + $0x2b8] sm:$0xf] }
 0x278   : > { %v2462_v45 = vadd.f32 %v2461_v19, %v2413_v21  ;;  %v6476_v21 = vpop.f32.mrf.mxu0  ;;  %2837 = vmatpush.bf16.msrb.mxu3 %v4598_v49 }
 0x279   : > { %2659 = vmatmul.bf16.gmra.mxu3 %v6056_v0 }
 0x27a   : > { %v6470_v7 = vmul.f32 %v2462_v45, %v2462_v45  ;;  %2610 = vmatmul.bf16.gmra.mxu2 %v6059_v40 }
 0x27c   : > { %7044 = vst [vmem:[#allocation48_spill] sm:$0xff] %v6470_v7  ;;  %v2464_v52 = vpop.f32.mrf.mxu3 }
 0x27d   : > { %v2415_v10 = vpop.f32.mrf.mxu2 }
 0x27e   : > { %v2416_v20 = vadd.f32 %v2415_v10, %v2367_v46  ;;  %v2371_v19 = vpop.f32.mrf.mxu1 }
 0x27f   : > { %v2372_v56 = vadd.f32 %v2371_v19, %v7052_v27 }
 0x280   : > { %v2465_v45 = vadd.f32 %v2464_v52, %v2416_v20  ;;  %v6483_v10 = vpop.f32.mrf.mxu0  ;;  %v4973_v20 = vld [vmem:[#allocation7 + $0x2c8] sm:$0xf0] }
 0x281   : > { %2566 = vmatmul.bf16.gmra.mxu1 %v6067_v23  ;;  %v4418_v59 = vor.u32 %v4973_v20, %v4417_v38  ;;  %v7053_v20 = vld [vmem:[#allocation35_spill] sm:$0xff] }
 0x282   : > { %v6486_v52 = vmul.f32 %v2465_v45, %v2465_v45 }
 0x283   : > { %2789 = vmatpush.bf16.msrb.mxu2 %v4418_v59 }
 0x284   : > { %v2466_v5 = vpop.f32.mrf.mxu3  ;;  %3329 = vmatmul.bf16.vlgmr.msrb.gmra.mxu0 %v7049_v2  ;;  %7050 = vst [vmem:[#allocation51_spill] sm:$0xff] %v6486_v52 }
 0x285   : > { %v2417_v47 = vpop.f32.mrf.mxu2 }
 0x286   : > { %v2418_v46 = vadd.f32 %v2417_v47, %v2369_v51  ;;  %v2373_v28 = vpop.f32.mrf.mxu1  ;;  %v5013_v51 = vld [vmem:[#allocation7 + $0x408] sm:$0xf0] }
 0x287   : > { %v4578_v11 = vor.u32 %v5013_v51, %v4577_v39  ;;  %v2374_v27 = vadd.f32 %v2373_v28, %v7053_v20  ;;  %v4968_v28 = vld [vmem:[#allocation7 + $0x2a0] sm:$0xf0] }
 0x288   : > { %v2467_v14 = vadd.f32 %v2466_v5, %v2418_v46  ;;  %v6495_v38 = vpop.f32.mrf.mxu0  ;;  %v7056_v5 = vpack.c.bf16 %v7054_v8, %v7055_v48  ;;  %v7059_v8 = vld [vmem:[#allocation25_spill] sm:$0xff]  ;;  %v5008_v20 = vld [vmem:[#allocation7 + $0x3e0] sm:$0xf0] }
 0x289   : > { %2664 = vmatmul.bf16.gmra.mxu3 %v6076_v50 }
 0x28a   : > { %v6488_v49 = vmul.f32 %v2467_v14, %v2467_v14  ;;  %2615 = vmatmul.bf16.gmra.mxu2 %v6079_v53  ;;  %2838 = vmatpush.bf16.msrb.mxu3 %v4578_v11  ;;  %v4257_v14 = vld [vmem:[#allocation7 + $0x178] sm:$0xf] }
 0x28b   : > { %v4258_v19 = vor.u32 %v4933_v34, %v4257_v14  ;;  %v4397_v34 = vld [vmem:[#allocation7 + $0x290] sm:$0xf]  ;;  %v4928_v14 = vld [vmem:[#allocation7 + $0x160] sm:$0xf0] }
 0x28c   : > { %7051 = vst [vmem:[#allocation52_spill] sm:$0xff] %v6488_v49  ;;  %v2469_v2 = vpop.f32.mrf.mxu3  ;;  %v4398_v11 = vor.u32 %v4968_v28, %v4397_v34  ;;  %v7062_v49 = vld [vmem:[#allocation42_spill] sm:$0xff] }
 0x28d   : > { %v2420_v3 = vpop.f32.mrf.mxu2  ;;  %2740 = vmatpush.bf16.msrb.mxu1 %v4258_v19  ;;  %v4557_v19 = vld [vmem:[#allocation7 + $0x3d0] sm:$0xf] }
 0x28e   : > { %v2421_v45 = vadd.f32 %v2420_v3, %v2372_v56  ;;  %v2376_v47 = vpop.f32.mrf.mxu1  ;;  %2790 = vmatpush.bf16.msrb.mxu2 %v4398_v11 }
 0x28f   : > { %v2377_v48 = vadd.f32 %v2376_v47, %v7059_v8  ;;  %v7061_v47 = vld [vmem:[#allocation26_spill] sm:$0xff] }
 0x290   : > { %v2470_v46 = vadd.f32 %v2469_v2, %v2421_v45  ;;  %v4237_v45 = vld [vmem:[#allocation7 + $0x150] sm:$0xf] }
 0x291   : > { %2571 = vmatmul.bf16.gmra.mxu1 %v6087_v26 }
 0x292   : > { %v6502_v2 = vmul.f32 %v2470_v46, %v2470_v46  ;;  %v6510_v46 = vpop.f32.mrf.mxu0 }
 0x293   : > { %7060 = vst [vmem:[#allocation23_spill] sm:$0xff] %v6510_v46 }
 0x294   : > { %v2471_v7 = vpop.f32.mrf.mxu3  ;;  %3334 = vmatmul.bf16.gmra.mxu0 %v7056_v5  ;;  %7057 = vst [vmem:[#allocation38_spill] sm:$0xff] %v6502_v2 }
 0x295   : > { %v2422_v59 = vpop.f32.mrf.mxu2 }
 0x296   : > { %v2423_v56 = vadd.f32 %v2422_v59, %v2374_v27  ;;  %v2378_v39 = vpop.f32.mrf.mxu1  ;;  %v4238_v27 = vor.u32 %v4928_v14, %v4237_v45  ;;  %v7063_v45 = vld [vmem:[#allocation41_spill] sm:$0xff] }
 0x297   : > { %v2379_v28 = vadd.f32 %v2378_v39, %v7061_v47  ;;  %v7064_v14 = vpack.c.bf16 %v7062_v49, %v7063_v45  ;;  %v7068_v47 = vld [vmem:[#allocation44_spill] sm:$0xff] }
 0x298   : > { %v2472_v51 = vadd.f32 %v2471_v7, %v2423_v56  ;;  %v4558_v56 = vor.u32 %v5008_v20, %v4557_v19  ;;  %2741 = vmatpush.bf16.msrb.mxu1 %v4238_v27 }
 0x299   : > { %2669 = vmatmul.bf16.gmra.mxu3 %v6096_v54 }
 0x29a   : > { %v6504_v3 = vmul.f32 %v2472_v51, %v2472_v51  ;;  %2620 = vmatmul.bf16.gmra.mxu2 %v6101_v41  ;;  %2839 = vmatpush.bf16.msrb.mxu3 %v4558_v56  ;;  %v6517_v46 = vpop.f32.mrf.mxu0 }
 0x29c   : > { %7058 = vst [vmem:[#allocation37_spill] sm:$0xff] %v6504_v3  ;;  %v2474_v5 = vpop.f32.mrf.mxu3 }
 0x29d   : > { %v2425_v59 = vpop.f32.mrf.mxu2 }
 0x29e   : > { %v2426_v51 = vadd.f32 %v2425_v59, %v2377_v48  ;;  %v2381_v52 = vpop.f32.mrf.mxu1 }
 0x29f   : > { %v2382_v39 = vadd.f32 %v2381_v52, %v6323_v25  ;;  %v5067_v25 = vld [vmem:[#allocation8 + $0xb8] sm:$0xff] }
 0x2a0   : > { %v2475_v34 = vadd.f32 %v2474_v5, %v2426_v51  ;;  %3419 = vmatpush.bf16.msra.mxu2 %v5067_v25 }
 0x2a1   : > { %2576 = vmatmul.bf16.gmra.mxu1 %v6109_v12 }
 0x2a2   : > { %v6520_v48 = vmul.f32 %v2475_v34, %v2475_v34  ;;  %v6528_v56 = vpop.f32.mrf.mxu0 }
 0x2a4   : > { %v2476_v8 = vpop.f32.mrf.mxu3  ;;  %3339 = vmatmul.bf16.gmra.mxu0 %v7064_v14  ;;  %7065 = vst [vmem:[#allocation35_spill] sm:$0xff] %v6520_v48  ;;  %v7074_v48 = vld [vmem:[#allocation46_spill] sm:$0xff] }
 0x2a5   : > { %v2427_v7 = vpop.f32.mrf.mxu2 }
 0x2a6   : > { %v2428_v2 = vadd.f32 %v2427_v7, %v2379_v28  ;;  %v2383_v3 = vpop.f32.mrf.mxu1  ;;  %v7069_v28 = vld [vmem:[#allocation43_spill] sm:$0xff] }
 0x2a8   : > { %v2477_v11 = vadd.f32 %v2476_v8, %v2428_v2  ;;  %v7067_v2 = vld [vmem:[#allocation28_spill] sm:$0xff]  ;;  %v7070_v8 = vpack.c.bf16 %v7068_v47, %v7069_v28  ;;  %v5075_v47 = vld [vmem:[#allocation8 + $0xf8] sm:$0xff] }
 0x2a9   : > { %2674 = vmatmul.bf16.gmra.mxu3 %v6122_v24  ;;  %v2384_v51 = vadd.f32 %v2383_v3, %v7067_v2  ;;  %v5059_v28 = vld [vmem:[#allocation8 + $0x78] sm:$0xff] }
 0x2aa   : > { %v6522_v5 = vmul.f32 %v2477_v11, %v2477_v11  ;;  %2625 = vmatmul.bf16.gmra.mxu2 %v6127_v31  ;;  %v6541_v3 = vpop.f32.mrf.mxu0  ;;  %3468 = vmatpush.bf16.msra.mxu3 %v5075_v47 }
 0x2ab   : > { %7071 = vst [vmem:[#allocation39_spill] sm:$0xff] %v6541_v3  ;;  %3370 = vmatpush.bf16.msra.mxu1 %v5059_v28 }
 0x2ac   : > { %7066 = vst [vmem:[#allocation40_spill] sm:$0xff] %v6522_v5  ;;  %v2479_v19 = vpop.f32.mrf.mxu3  ;;  %v5066_v5 = vld [vmem:[#allocation8 + $0xb0] sm:$0xff] }
 0x2ad   : > { %v2430_v20 = vpop.f32.mrf.mxu2  ;;  %3420 = vmatpush.bf16.msra.mxu2 %v5066_v5 }
 0x2ae   : > { %v2431_v27 = vadd.f32 %v2430_v20, %v2382_v39  ;;  %v2386_v7 = vpop.f32.mrf.mxu1  ;;  %v7072_v20 = vld [vmem:[#allocation30_spill] sm:$0xff] }
 0x2b0   : > { %v2480_v59 = vadd.f32 %v2479_v19, %v2431_v27  ;;  %v2387_v27 = vadd.f32 %v2386_v7, %v7072_v20  ;;  %v7075_v7 = vld [vmem:[#allocation45_spill] sm:$0xff] }
 0x2b1   : > { %2581 = vmatmul.bf16.gmra.mxu1 %v6137_v61  ;;  %v7076_v20 = vpack.c.bf16 %v7074_v48, %v7075_v7  ;;  %v5058_v48 = vld [vmem:[#allocation8 + $0x70] sm:$0xff] }
 0x2b2   : > { %v6536_v39 = vmul.f32 %v2480_v59, %v2480_v59  ;;  %v6551_v3 = vpop.f32.mrf.mxu0  ;;  %3371 = vmatpush.bf16.msra.mxu1 %v5058_v48 }
 0x2b4   : > { %v2481_v34 = vpop.f32.mrf.mxu3  ;;  %3344 = vmatmul.bf16.gmra.mxu0 %v7070_v8 }
 0x2b5   : > { %v2432_v52 = vpop.f32.mrf.mxu2 }
 0x2b6   : > { %v2433_v45 = vadd.f32 %v2432_v52, %v2384_v51  ;;  %v2388_v14 = vpop.f32.mrf.mxu1  ;;  %v5083_v52 = vld [vmem:[#allocation8 + $0x138] sm:$0xff] }
 0x2b7   : > { %3517 = vmatpush.bf16.msra.mxu0 %v5083_v52 }
 0x2b8   : > { %v2482_v11 = vadd.f32 %v2481_v34, %v2433_v45  ;;  %v7073_v45 = vld [vmem:[#allocation31_spill] sm:$0xff] }
 0x2b9   : > { %2679 = vmatmul.bf16.gmra.mxu3 %v6152_v44 }
 0x2ba   : > { %v6538_v19 = vmul.f32 %v2482_v11, %v2482_v11  ;;  %2630 = vmatmul.bf16.gmra.mxu2 %v6157_v32  ;;  %v2389_v11 = vadd.f32 %v2388_v14, %v7073_v45  ;;  %v5074_v14 = vld [vmem:[#allocation8 + $0xf0] sm:$0xff] }
 0x2bb   : > { %3469 = vmatpush.bf16.msra.mxu3 %v5074_v14  ;;  %v5082_v45 = vld [vmem:[#allocation8 + $0x130] sm:$0xff] }
 0x2bc   : > { %v2484_v2 = vpop.f32.mrf.mxu3  ;;  %3518 = vmatpush.bf16.msra.mxu0 %v5082_v45 }
 0x2bd   : > { %v2435_v8 = vpop.f32.mrf.mxu2 }
 0x2be   : > { %v2436_v34 = vadd.f32 %v2435_v8, %v2387_v27  ;;  %v2547_v25 = vpop.f32.mrf.mxu1 }
 0x2bf   : > { %v2548_v28 = vadd.f32 %v2547_v25, %v6355_v22  ;;  %v7079_v22 = vld [vmem:[#allocation49_spill] sm:$0xff] }
 0x2c0   : > { %v2485_v59 = vadd.f32 %v2484_v2, %v2436_v34 }
 0x2c1   : > { %2742 = vmatmul.bf16.vlgmr.msrb.gmra.mxu1 %v6998_v17 }
 0x2c2   : > { %v6554_v17 = vmul.f32 %v2485_v59, %v2485_v59 }
 0x2c4   : > { %v2486_v49 = vpop.f32.mrf.mxu3  ;;  %3349 = vmatmul.bf16.gmra.mxu0 %v7076_v20  ;;  %v7078_v20 = vld [vmem:[#allocation50_spill] sm:$0xff] }
 0x2c5   : > { %v2437_v51 = vpop.f32.mrf.mxu2  ;;  %v7080_v25 = vpack.c.bf16 %v7078_v20, %v7079_v22 }
 0x2c6   : > { %v2438_v27 = vadd.f32 %v2437_v51, %v2389_v11  ;;  %v2549_v8 = vpop.f32.mrf.mxu1 }
 0x2c8   : > { %v2487_v47 = vadd.f32 %v2486_v49, %v2438_v27  ;;  %v5065_v27 = vld [vmem:[#allocation8 + $0xa8] sm:$0xff] }
 0x2c9   : > { %2840 = vmatmul.bf16.vlgmr.msrb.gmra.mxu3 %v7002_v43  ;;  %v6562_v43 = vpop.f32.mrf.mxu0  ;;  %3421 = vmatpush.bf16.msra.mxu2 %v5065_v27 }
 0x2ca   : > { %v6556_v2 = vmul.f32 %v2487_v47, %v2487_v47  ;;  %2791 = vmatmul.bf16.vlgmr.msrb.gmra.mxu2 %v7006_v4  ;;  %v7077_v4 = vld [vmem:[#allocation32_spill] sm:$0xff] }
 0x2cb   : > { %v2550_v11 = vadd.f32 %v2549_v8, %v7077_v4  ;;  %v5073_v8 = vld [vmem:[#allocation8 + $0xe8] sm:$0xff] }
 0x2cc   : > { %v2645_v34 = vpop.f32.mrf.mxu3  ;;  %v2998_v51 = vpack.c.bf16 %v6556_v2, %v6554_v17  ;;  %3470 = vmatpush.bf16.msra.mxu3 %v5073_v8 }
 0x2cd   : > { %v2596_v5 = vpop.f32.mrf.mxu2 }
 0x2ce   : > { %v2597_v49 = vadd.f32 %v2596_v5, %v2548_v28  ;;  %v2552_v52 = vpop.f32.mrf.mxu1 }
 0x2cf   : > { %v2553_v4 = vadd.f32 %v2552_v52, %v6371_v18  ;;  %v7082_v18 = vld [vmem:[#allocation53_spill] sm:$0xff] }
 0x2d0   : > { %v2646_v59 = vadd.f32 %v2645_v34, %v2597_v49  ;;  %v5057_v49 = vld [vmem:[#allocation8 + $0x68] sm:$0xff] }
 0x2d1   : > { %2747 = vmatmul.bf16.gmra.mxu1 %v6011_v35  ;;  %v6569_v5 = vpop.f32.mrf.mxu0 }
 0x2d2   : > { %v6572_v35 = vmul.f32 %v2646_v59, %v2646_v59  ;;  %3372 = vmatpush.bf16.msra.mxu1 %v5057_v49  ;;  %v5081_v59 = vld [vmem:[#allocation8 + $0x128] sm:$0xff] }
 0x2d3   : > { %3519 = vmatpush.bf16.msra.mxu0 %v5081_v59 }
 0x2d4   : > { %v2647_v7 = vpop.f32.mrf.mxu3  ;;  %3354 = vmatmul.bf16.gmra.mxu0 %v7080_v25 }
 0x2d5   : > { %v2598_v47 = vpop.f32.mrf.mxu2 }
 0x2d6   : > { %v2599_v14 = vadd.f32 %v2598_v47, %v2550_v11  ;;  %v2554_v48 = vpop.f32.mrf.mxu1  ;;  %v7081_v47 = vld [vmem:[#allocation54_spill] sm:$0xff] }
 0x2d7   : > { %v7083_v52 = vpack.c.bf16 %v7081_v47, %v7082_v18  ;;  %v5080_v18 = vld [vmem:[#allocation8 + $0x120] sm:$0xff] }
 0x2d8   : > { %v2648_v28 = vadd.f32 %v2647_v7, %v2599_v14  ;;  %v5064_v14 = vld [vmem:[#allocation8 + $0xa0] sm:$0xff]  ;;  %3520 = vmatpush.bf16.msra.mxu0 %v5080_v18 }
 0x2d9   : > { %2845 = vmatmul.bf16.gmra.mxu3 %v6018_v30  ;;  %v6581_v25 = vpop.f32.mrf.mxu0  ;;  %3422 = vmatpush.bf16.msra.mxu2 %v5064_v14  ;;  %v7084_v14 = vld [vmem:[#allocation24_spill] sm:$0xff] }
 0x2da   : > { %v6574_v34 = vmul.f32 %v2648_v28, %v2648_v28  ;;  %2796 = vmatmul.bf16.gmra.mxu2 %v6021_v15  ;;  %v2555_v15 = vadd.f32 %v2554_v48, %v6381_v63  ;;  %v5072_v63 = vld [vmem:[#allocation8 + $0xe0] sm:$0xff] }
 0x2db   : > { %v5056_v48 = vld [vmem:[#allocation8 + $0x60] sm:$0xff]  ;;  %3471 = vmatpush.bf16.msra.mxu3 %v5072_v63 }
 0x2dc   : > { %v2964_v45 = vpack.c.bf16 %v6574_v34, %v6572_v35  ;;  %v2650_v11 = vpop.f32.mrf.mxu3  ;;  %3373 = vmatpush.bf16.msra.mxu1 %v5056_v48  ;;  %v7092_v35 = vld [vmem:[#allocation56_spill] sm:$0xff]  ;;  %v7093_v34 = vld [vmem:[#allocation29_spill] sm:$0xff] }
 0x2dd   : > { %v2601_v7 = vpop.f32.mrf.mxu2 }
 0x2de   : > { %v2602_v20 = vadd.f32 %v2601_v7, %v2553_v4  ;;  %v2557_v22 = vpop.f32.mrf.mxu1 }
 0x2df   : > { %v2558_v7 = vadd.f32 %v2557_v22, %v6389_v60  ;;  %v7085_v60 = vld [vmem:[#allocation22_spill] sm:$0xff] }
 0x2e0   : > { %v2651_v30 = vadd.f32 %v2650_v11, %v2602_v20  ;;  %v7086_v22 = vpack.c.bf16 %v7084_v14, %v7085_v60  ;;  %v5079_v60 = vld [vmem:[#allocation8 + $0x118] sm:$0xff] }
 0x2e1   : > { %2752 = vmatmul.bf16.gmra.mxu1 %v6027_v33  ;;  %3521 = vmatpush.bf16.msra.mxu0 %v5079_v60  ;;  %v5078_v60 = vld [vmem:[#allocation8 + $0x110] sm:$0xff] }
 0x2e2   : > { %v6588_v33 = vmul.f32 %v2651_v30, %v2651_v30 }
 0x2e4   : > { %v2652_v27 = vpop.f32.mrf.mxu3  ;;  %3359 = vmatmul.bf16.gmra.mxu0 %v7083_v52 }
 0x2e5   : > { %v2603_v28 = vpop.f32.mrf.mxu2  ;;  %3522 = vmatpush.bf16.msra.mxu0 %v5078_v60 }
 0x2e6   : > { %v2604_v8 = vadd.f32 %v2603_v28, %v2555_v15  ;;  %v2559_v49 = vpop.f32.mrf.mxu1  ;;  %v6596_v15 = vpop.f32.mrf.mxu0  ;;  %v5063_v28 = vld [vmem:[#allocation8 + $0x98] sm:$0xff] }
 0x2e7   : > { %3423 = vmatpush.bf16.msra.mxu2 %v5063_v28 }
 0x2e8   : > { %v2653_v4 = vadd.f32 %v2652_v27, %v2604_v8 }
 0x2e9   : > { %2850 = vmatmul.bf16.gmra.mxu3 %v6036_v13 }
 0x2ea   : > { %v6590_v11 = vmul.f32 %v2653_v4, %v2653_v4  ;;  %2801 = vmatmul.bf16.gmra.mxu2 %v6039_v62  ;;  %v2560_v62 = vadd.f32 %v2559_v49, %v6400_v37  ;;  %v5071_v37 = vld [vmem:[#allocation8 + $0xd8] sm:$0xff] }
 0x2eb   : > { %v5055_v49 = vld [vmem:[#allocation8 + $0x58] sm:$0xff]  ;;  %3472 = vmatpush.bf16.msra.mxu3 %v5071_v37 }
 0x2ec   : > { %v2655_v20 = vpop.f32.mrf.mxu3  ;;  %v2969_v59 = vpack.c.bf16 %v6590_v11, %v6588_v33  ;;  %3374 = vmatpush.bf16.msra.mxu1 %v5055_v49  ;;  %v5054_v49 = vld [vmem:[#allocation8 + $0x50] sm:$0xff]  ;;  %v7101_v11 = vld [vmem:[#allocation39_spill] sm:$0xff] }
 0x2ed   : > { %v2606_v27 = vpop.f32.mrf.mxu2 }
 0x2ee   : > { %v2607_v13 = vadd.f32 %v2606_v27, %v2558_v7  ;;  %v2562_v30 = vpop.f32.mrf.mxu1  ;;  %v6603_v48 = vpop.f32.mrf.mxu0 }
 0x2ef   : > { %v2563_v27 = vadd.f32 %v2562_v30, %v6405_v55  ;;  %v5062_v55 = vld [vmem:[#allocation8 + $0x90] sm:$0xff] }
 0x2f0   : > { %v2656_v47 = vadd.f32 %v2655_v20, %v2607_v13  ;;  %3424 = vmatpush.bf16.msra.mxu2 %v5062_v55  ;;  %3375 = vmatpush.bf16.msra.mxu1 %v5054_v49 }
 0x2f1   : > { %2757 = vmatmul.bf16.gmra.mxu1 %v6047_v36 }
 0x2f2   : > { %v6606_v36 = vmul.f32 %v2656_v47, %v2656_v47 }
 0x2f4   : > { %v2657_v52 = vpop.f32.mrf.mxu3  ;;  %3364 = vmatmul.bf16.gmra.mxu0 %v7086_v22 }
 0x2f5   : > { %v2608_v8 = vpop.f32.mrf.mxu2 }
 0x2f6   : > { %v2609_v4 = vadd.f32 %v2608_v8, %v2560_v62  ;;  %v2564_v63 = vpop.f32.mrf.mxu1  ;;  %v6614_v47 = vpop.f32.mrf.mxu0 }
 0x2f8   : > { %v2658_v7 = vadd.f32 %v2657_v52, %v2609_v4 }
 0x2f9   : > { %2855 = vmatmul.bf16.gmra.mxu3 %v6056_v0 }
 0x2fa   : > { %v6608_v20 = vmul.f32 %v2658_v7, %v2658_v7  ;;  %2806 = vmatmul.bf16.gmra.mxu2 %v6059_v40  ;;  %v2565_v40 = vadd.f32 %v2564_v63, %v6417_v9 }
 0x2fc   : > { %v2660_v13 = vpop.f32.mrf.mxu3  ;;  %v2974_v18 = vpack.c.bf16 %v6608_v20, %v6606_v36 }
 0x2fd   : > { %v2611_v62 = vpop.f32.mrf.mxu2 }
 0x2fe   : > { %v2612_v52 = vadd.f32 %v2611_v62, %v2563_v27  ;;  %v2567_v14 = vpop.f32.mrf.mxu1  ;;  %v6624_v27 = vpop.f32.mrf.mxu0 }
 0x2ff   : > { %v2568_v9 = vadd.f32 %v2567_v14, %v6430_v16 }
 0x300   : > { %v2661_v0 = vadd.f32 %v2660_v13, %v2612_v52 }
 0x301   : > { %2762 = vmatmul.bf16.gmra.mxu1 %v6067_v23  ;;  %v5070_v23 = vld [vmem:[#allocation8 + $0xd0] sm:$0xff] }
 0x302   : > { %v6619_v7 = vmul.f32 %v2661_v0, %v2661_v0  ;;  %3473 = vmatpush.bf16.msra.mxu3 %v5070_v23 }
 0x304   : > { %v2662_v22 = vpop.f32.mrf.mxu3 }
 0x305   : > { %v2613_v30 = vpop.f32.mrf.mxu2 }
 0x306   : > { %v2614_v28 = vadd.f32 %v2613_v30, %v2565_v40  ;;  %v2569_v8 = vpop.f32.mrf.mxu1  ;;  %v6631_v55 = vpop.f32.mrf.mxu0 }
 0x308   : > { %v2663_v4 = vadd.f32 %v2662_v22, %v2614_v28  ;;  %v5061_v22 = vld [vmem:[#allocation8 + $0x88] sm:$0xff] }
 0x309   : > { %2860 = vmatmul.bf16.gmra.mxu3 %v6076_v50  ;;  %3425 = vmatpush.bf16.msra.mxu2 %v5061_v22 }
 0x30a   : > { %v6621_v37 = vmul.f32 %v2663_v4, %v2663_v4  ;;  %2811 = vmatmul.bf16.gmra.mxu2 %v6079_v53  ;;  %v2570_v53 = vadd.f32 %v2569_v8, %v6435_v1  ;;  %v5053_v4 = vld [vmem:[#allocation8 + $0x48] sm:$0xff] }
 0x30b   : > { %3376 = vmatpush.bf16.msra.mxu1 %v5053_v4 }
 0x30c   : > { %v2665_v63 = vpop.f32.mrf.mxu3  ;;  %v2979_v13 = vpack.c.bf16 %v6621_v37, %v6619_v7 }
 0x30d   : > { %v2616_v62 = vpop.f32.mrf.mxu2 }
 0x30e   : > { %v2617_v50 = vadd.f32 %v2616_v62, %v2568_v9  ;;  %v2572_v52 = vpop.f32.mrf.mxu1  ;;  %v5052_v9 = vld [vmem:[#allocation8 + $0x40] sm:$0xff] }
 0x30f   : > { %v2573_v1 = vadd.f32 %v2572_v52, %v6446_v42  ;;  %3377 = vmatpush.bf16.msra.mxu1 %v5052_v9  ;;  %v5060_v42 = vld [vmem:[#allocation8 + $0x80] sm:$0xff] }
 0x310   : > { %v2666_v0 = vadd.f32 %v2665_v63, %v2617_v50  ;;  %v5068_v52 = vld [vmem:[#allocation8 + $0xc0] sm:$0xff]  ;;  %3426 = vmatpush.bf16.msra.mxu2 %v5060_v42 }
 0x311   : > { %2767 = vmatmul.bf16.gmra.mxu1 %v6087_v26  ;;  %v5069_v26 = vld [vmem:[#allocation8 + $0xc8] sm:$0xff] }
 0x312   : > { %v6634_v23 = vmul.f32 %v2666_v0, %v2666_v0  ;;  %3474 = vmatpush.bf16.msra.mxu3 %v5069_v26 }
 0x314   : > { %v2667_v40 = vpop.f32.mrf.mxu3 }
 0x315   : > { %v2618_v16 = vpop.f32.mrf.mxu2 }
 0x316   : > { %v2619_v14 = vadd.f32 %v2618_v16, %v2570_v53  ;;  %v2574_v30 = vpop.f32.mrf.mxu1  ;;  %3475 = vmatpush.bf16.msra.mxu3 %v5068_v52 }
 0x317   : > { %v2575_v53 = vadd.f32 %v2574_v30, %v6457_v29 }
 0x318   : > { %v2668_v28 = vadd.f32 %v2667_v40, %v2619_v14 }
 0x319   : > { %2865 = vmatmul.bf16.gmra.mxu3 %v6096_v54  ;;  %v6642_v54 = vpop.f32.mrf.mxu0 }
 0x31a   : > { %v6636_v49 = vmul.f32 %v2668_v28, %v2668_v28  ;;  %2816 = vmatmul.bf16.gmra.mxu2 %v6101_v41  ;;  %v5077_v41 = vld [vmem:[#allocation8 + $0x108] sm:$0xff] }
 0x31b   : > { %3523 = vmatpush.bf16.msra.mxu0 %v5077_v41  ;;  %v5076_v41 = vld [vmem:[#allocation8 + $0x100] sm:$0xff] }
 0x31c   : > { %v2670_v8 = vpop.f32.mrf.mxu3  ;;  %v2984_v63 = vpack.c.bf16 %v6636_v49, %v6634_v23 }
 0x31d   : > { %v2621_v62 = vpop.f32.mrf.mxu2 }
 0x31e   : > { %v2622_v50 = vadd.f32 %v2621_v62, %v2573_v1  ;;  %v2577_v60 = vpop.f32.mrf.mxu1 }
 0x31f   : > { %v2578_v29 = vadd.f32 %v2577_v60, %v6465_v58  ;;  %3524 = vmatpush.bf16.msra.mxu0 %v5076_v41 }
 0x320   : > { %v2671_v0 = vadd.f32 %v2670_v8, %v2622_v50 }
 0x321   : > { %2772 = vmatmul.bf16.gmra.mxu1 %v6109_v12  ;;  %v6646_v4 = vpop.f32.mrf.mxu0 }
 0x322   : > { %v6649_v26 = vmul.f32 %v2671_v0, %v2671_v0 }
 0x324   : > { %v2672_v40 = vpop.f32.mrf.mxu3 }
 0x325   : > { %v2623_v22 = vpop.f32.mrf.mxu2 }
 0x326   : > { %v2624_v16 = vadd.f32 %v2623_v22, %v2575_v53  ;;  %v2579_v14 = vpop.f32.mrf.mxu1 }
 0x327   : > { %v2580_v0 = vadd.f32 %v2579_v14, %v6476_v21 }
 0x328   : > { %v2673_v28 = vadd.f32 %v2672_v40, %v2624_v16 }
 0x329   : > { %2870 = vmatmul.bf16.gmra.mxu3 %v6122_v24  ;;  %v6658_v24 = vpop.f32.mrf.mxu0 }
 0x32a   : > { %v6651_v12 = vmul.f32 %v2673_v28, %v2673_v28  ;;  %2821 = vmatmul.bf16.gmra.mxu2 %v6127_v31 }
 0x32c   : > { %v2675_v30 = vpop.f32.mrf.mxu3  ;;  %v2989_v1 = vpack.c.bf16 %v6651_v12, %v6649_v26 }
 0x32d   : > { %v2626_v8 = vpop.f32.mrf.mxu2 }
 0x32e   : > { %v2627_v9 = vadd.f32 %v2626_v8, %v2578_v29  ;;  %v2582_v62 = vpop.f32.mrf.mxu1  ;;  %v7087_v8 = vld [vmem:[#allocation55_spill] sm:$0xff] }
 0x330   : > { %v2676_v50 = vadd.f32 %v2675_v30, %v2627_v9 }
 0x331   : > { %2777 = vmatmul.bf16.gmra.mxu1 %v6137_v61  ;;  %v2583_v61 = vadd.f32 %v2582_v62, %v6483_v10  ;;  %v6670_v16 = vpop.f32.mrf.mxu0 }
 0x332   : > { %v6662_v42 = vmul.f32 %v2676_v50, %v2676_v50 }
 0x334   : > { %v2677_v53 = vpop.f32.mrf.mxu3 }
 0x335   : > { %v2628_v31 = vpop.f32.mrf.mxu2 }
 0x336   : > { %v2629_v40 = vadd.f32 %v2628_v31, %v2580_v0  ;;  %v2584_v58 = vpop.f32.mrf.mxu1 }
 0x337   : > { %v2585_v50 = vadd.f32 %v2584_v58, %v6495_v38 }
 0x338   : > { %v2678_v60 = vadd.f32 %v2677_v53, %v2629_v40 }
 0x339   : > { %2875 = vmatmul.bf16.gmra.mxu3 %v6152_v44  ;;  %v7088_v44 = vld [vmem:[#allocation27_spill] sm:$0xff]  ;;  %v6676_v62 = vpop.f32.mrf.mxu0 }
 0x33a   : > { %v6664_v52 = vmul.f32 %v2678_v60, %v2678_v60  ;;  %2826 = vmatmul.bf16.gmra.mxu2 %v6157_v32  ;;  %v7089_v9 = vpack.c.bf16 %v7087_v8, %v7088_v44  ;;  %v7090_v60 = vpack.c.bf16 %v6440_v6, %v6438_v57 }
 0x33c   : > { %v2680_v22 = vpop.f32.mrf.mxu3  ;;  %v2994_v21 = vpack.c.bf16 %v6664_v52, %v6662_v42 }
 0x33d   : > { %v2631_v14 = vpop.f32.mrf.mxu2 }
 0x33e   : > { %v2632_v28 = vadd.f32 %v2631_v14, %v2583_v61  ;;  %v2743_v29 = vpop.f32.mrf.mxu1  ;;  %v7091_v14 = vld [vmem:[#allocation23_spill] sm:$0xff] }
 0x340   : > { %v2681_v30 = vadd.f32 %v2680_v22, %v2632_v28  ;;  %v2744_v28 = vadd.f32 %v2743_v29, %v7091_v14 }
 0x341   : > { %3378 = vmatmul.bf16.vlgmr.msra.gmra.mxu1 %v7089_v9  ;;  %v6691_v8 = vpop.f32.mrf.mxu0 }
 0x342   : > { %v6681_v31 = vmul.f32 %v2681_v30, %v2681_v30 }
 0x344   : > { %v2682_v41 = vpop.f32.mrf.mxu3 }
 0x345   : > { %v2633_v32 = vpop.f32.mrf.mxu2 }
 0x346   : > { %v2634_v0 = vadd.f32 %v2633_v32, %v2585_v50  ;;  %v2745_v10 = vpop.f32.mrf.mxu1 }
 0x347   : > { %v2746_v44 = vadd.f32 %v2745_v10, %v6517_v46 }
 0x348   : > { %v2683_v53 = vadd.f32 %v2682_v41, %v2634_v0 }
 0x349   : > { %3476 = vmatmul.bf16.vlgmr.msra.gmra.mxu3 %v2964_v45  ;;  %v7094_v45 = vpack.c.bf16 %v7092_v35, %v7093_v34  ;;  %v6703_v35 = vpop.f32.mrf.mxu0  ;;  %v7098_v34 = vld [vmem:[#allocation58_spill] sm:$0xff] }
 0x34a   : > { %v6683_v40 = vmul.f32 %v2683_v53, %v2683_v53  ;;  %3427 = vmatmul.bf16.vlgmr.msra.gmra.mxu2 %v7090_v60  ;;  %v7095_v53 = vld [vmem:[#allocation67_spill] sm:$0xff]  ;;  %v7096_v60 = vld [vmem:[#allocation66_spill] sm:$0xff] }
 0x34b   : > { %v7097_v14 = vpack.c.bf16 %v7095_v53, %v7096_v60  ;;  %v7103_v53 = vld [vmem:[#allocation47_spill] sm:$0xff] }
 0x34c   : > { %v2841_v38 = vpop.f32.mrf.mxu3  ;;  %v2999_v58 = vpack.c.bf16 %v6683_v40, %v6681_v31 }
 0x34d   : > { %v2792_v61 = vpop.f32.mrf.mxu2 }
 0x34e   : > { %v2748_v22 = vpop.f32.mrf.mxu1  ;;  %v2793_v30 = vadd.f32 %v2792_v61, %v2744_v28 }
 0x350   : > { %v2842_v6 = vadd.f32 %v2841_v38, %v2793_v30  ;;  %v2749_v38 = vadd.f32 %v2748_v22, %v6528_v56 }
 0x351   : > { %3383 = vmatmul.bf16.gmra.mxu1 %v7094_v45  ;;  %v7099_v45 = vld [vmem:[#allocation57_spill] sm:$0xff] }
 0x352   : > { %v2885_v29 = vmul.f32 %v2842_v6, %v2842_v6  ;;  %v7100_v30 = vpack.c.bf16 %v7098_v34, %v7099_v45  ;;  %v7105_v34 = vld [vmem:[#allocation59_spill] sm:$0xff]  ;;  %v7106_v45 = vld [vmem:[#allocation33_spill] sm:$0xff] }
 0x354   : > { %v2843_v9 = vpop.f32.mrf.mxu3 }
 0x355   : > { %v2794_v57 = vpop.f32.mrf.mxu2 }
 0x356   : > { %v2795_v50 = vadd.f32 %v2794_v57, %v2746_v44  ;;  %v2750_v41 = vpop.f32.mrf.mxu1 }
 0x358   : > { %v2844_v32 = vadd.f32 %v2843_v9, %v2795_v50  ;;  %v6710_v9 = vpop.f32.mrf.mxu0 }
 0x359   : > { %3481 = vmatmul.bf16.gmra.mxu3 %v2969_v59  ;;  %v2751_v59 = vadd.f32 %v2750_v41, %v7101_v11 }
 0x35a   : > { %v2890_v0 = vmul.f32 %v2844_v32, %v2844_v32  ;;  %3432 = vmatmul.bf16.gmra.mxu2 %v7097_v14 }
 0x35c   : > { %v2965_v61 = vpack.c.bf16 %v2890_v0, %v2885_v29  ;;  %v2846_v46 = vpop.f32.mrf.mxu3  ;;  %v7102_v0 = vld [vmem:[#allocation48_spill] sm:$0xff] }
 0x35d   : > { %v2797_v10 = vpop.f32.mrf.mxu2  ;;  %v7104_v60 = vpack.c.bf16 %v7102_v0, %v7103_v53 }
 0x35e   : > { %v2753_v28 = vpop.f32.mrf.mxu1  ;;  %3525 = vmatmul.bf16.vlgmr.msra.gmra.mxu0 %v2965_v61  ;;  %v2798_v33 = vadd.f32 %v2797_v10, %v2749_v38 }
 0x360   : > { %v2847_v6 = vadd.f32 %v2846_v46, %v2798_v33  ;;  %v6718_v38 = vpop.f32.mrf.mxu0  ;;  %v2754_v46 = vadd.f32 %v2753_v28, %v6551_v3 }
 0x361   : > { %3388 = vmatmul.bf16.gmra.mxu1 %v7100_v30  ;;  %v7107_v30 = vpack.c.bf16 %v7105_v34, %v7106_v45 }
 0x362   : > { %v2895_v56 = vmul.f32 %v2847_v6, %v2847_v6 }
 0x364   : > { %v2848_v44 = vpop.f32.mrf.mxu3 }
 0x365   : > { %v2799_v57 = vpop.f32.mrf.mxu2 }
 0x366   : > { %v2800_v50 = vadd.f32 %v2799_v57, %v2751_v59  ;;  %v2755_v32 = vpop.f32.mrf.mxu1 }
 0x367   : > { %v2756_v20 = vadd.f32 %v2755_v32, %v6562_v43 }
 0x368   : > { %v2849_v29 = vadd.f32 %v2848_v44, %v2800_v50  ;;  %v6725_v6 = vpop.f32.mrf.mxu0  ;;  %v7108_v50 = vld [vmem:[#allocation52_spill] sm:$0xff] }
 0x369   : > { %3486 = vmatmul.bf16.gmra.mxu3 %v2974_v18 }
 0x36a   : > { %v2900_v22 = vmul.f32 %v2849_v29, %v2849_v29  ;;  %3437 = vmatmul.bf16.gmra.mxu2 %v7104_v60  ;;  %v7109_v29 = vld [vmem:[#allocation51_spill] sm:$0xff]  ;;  %v7111_v60 = vld [vmem:[#allocation36_spill] sm:$0xff] }
 0x36c   : > { %v2851_v14 = vpop.f32.mrf.mxu3  ;;  %v2970_v41 = vpack.c.bf16 %v2900_v22, %v2895_v56  ;;  %v7110_v56 = vpack.c.bf16 %v7108_v50, %v7109_v29  ;;  %v7118_v50 = vld [vmem:[#allocation60_spill] sm:$0xff] }
 0x36d   : > { %v2802_v61 = vpop.f32.mrf.mxu2 }
 0x36e   : > { %v2758_v10 = vpop.f32.mrf.mxu1  ;;  %3530 = vmatmul.bf16.gmra.mxu0 %v2970_v41  ;;  %v2803_v36 = vadd.f32 %v2802_v61, %v2754_v46 }
 0x36f   : > { %v2759_v53 = vadd.f32 %v2758_v10, %v6569_v5 }
 0x370   : > { %v2852_v11 = vadd.f32 %v2851_v14, %v2803_v36  ;;  %v7112_v14 = vld [vmem:[#allocation34_spill] sm:$0xff]  ;;  %v6737_v7 = vpop.f32.mrf.mxu0 }
 0x371   : > { %3393 = vmatmul.bf16.gmra.mxu1 %v7107_v30  ;;  %v7113_v41 = vpack.c.bf16 %v7111_v60, %v7112_v14  ;;  %v7120_v14 = vld [vmem:[#allocation40_spill] sm:$0xff] }
 0x372   : > { %v2905_v3 = vmul.f32 %v2852_v11, %v2852_v11 }
 0x374   : > { %v2853_v18 = vpop.f32.mrf.mxu3 }
 0x375   : > { %v2804_v33 = vpop.f32.mrf.mxu2 }
 0x376   : > { %v2805_v59 = vadd.f32 %v2804_v33, %v2756_v20  ;;  %v2760_v44 = vpop.f32.mrf.mxu1  ;;  %v7114_v20 = vld [vmem:[#allocation37_spill] sm:$0xff] }
 0x377   : > { %v2761_v37 = vadd.f32 %v2760_v44, %v6581_v25 }
 0x378   : > { %v2854_v57 = vadd.f32 %v2853_v18, %v2805_v59  ;;  %v7115_v18 = vld [vmem:[#allocation38_spill] sm:$0xff] }
 0x379   : > { %3491 = vmatmul.bf16.gmra.mxu3 %v2979_v13  ;;  %v7116_v33 = vpack.c.bf16 %v7114_v20, %v7115_v18 }
 0x37a   : > { %v2910_v28 = vmul.f32 %v2854_v57, %v2854_v57  ;;  %3442 = vmatmul.bf16.gmra.mxu2 %v7110_v56  ;;  %v6746_v57 = vpop.f32.mrf.mxu0 }
 0x37c   : > { %v2856_v22 = vpop.f32.mrf.mxu3  ;;  %v2975_v43 = vpack.c.bf16 %v2910_v28, %v2905_v3  ;;  %v7117_v28 = vld [vmem:[#allocation61_spill] sm:$0xff] }
 0x37d   : > { %v2807_v32 = vpop.f32.mrf.mxu2  ;;  %v7119_v29 = vpack.c.bf16 %v7117_v28, %v7118_v50 }
 0x37e   : > { %v2763_v0 = vpop.f32.mrf.mxu1  ;;  %3535 = vmatmul.bf16.gmra.mxu0 %v2975_v43  ;;  %v2808_v61 = vadd.f32 %v2807_v32, %v2759_v53 }
 0x37f   : > { %v2764_v3 = vadd.f32 %v2763_v0, %v6596_v15 }
 0x380   : > { %v2857_v34 = vadd.f32 %v2856_v22, %v2808_v61 }
 0x381   : > { %3398 = vmatmul.bf16.gmra.mxu1 %v7113_v41  ;;  %v7121_v41 = vld [vmem:[#allocation35_spill] sm:$0xff] }
 0x382   : > { %v2915_v5 = vmul.f32 %v2857_v34, %v2857_v34  ;;  %v6753_v53 = vpop.f32.mrf.mxu0  ;;  %v7122_v61 = vpack.c.bf16 %v7120_v14, %v7121_v41 }
 0x384   : > { %v2858_v13 = vpop.f32.mrf.mxu3 }
 0x385   : > { %v2809_v46 = vpop.f32.mrf.mxu2 }
 0x386   : > { %v2810_v45 = vadd.f32 %v2809_v46, %v2761_v37  ;;  %v2765_v30 = vpop.f32.mrf.mxu1 }
 0x387   : > { %v2766_v49 = vadd.f32 %v2765_v30, %v6603_v48  ;;  %v7123_v30 = vld [vmem:[#allocation63_spill] sm:$0xff] }
 0x388   : > { %v2859_v36 = vadd.f32 %v2858_v13, %v2810_v45 }
 0x389   : > { %3496 = vmatmul.bf16.gmra.mxu3 %v2984_v63 }
 0x38a   : > { %v2920_v10 = vmul.f32 %v2859_v36, %v2859_v36  ;;  %3447 = vmatmul.bf16.gmra.mxu2 %v7116_v33  ;;  %v6762_v45 = vpop.f32.mrf.mxu0  ;;  %v7124_v36 = vld [vmem:[#allocation62_spill] sm:$0xff] }
 0x38c   : > { %v2861_v11 = vpop.f32.mrf.mxu3  ;;  %v2980_v59 = vpack.c.bf16 %v2920_v10, %v2915_v5  ;;  %v7125_v5 = vpack.c.bf16 %v7123_v30, %v7124_v36 }
 0x38d   : > { %v2812_v25 = vpop.f32.mrf.mxu2 }
 0x38e   : > { %v2768_v44 = vpop.f32.mrf.mxu1  ;;  %3540 = vmatmul.bf16.gmra.mxu0 %v2980_v59  ;;  %v2813_v23 = vadd.f32 %v2812_v25, %v2764_v3  ;;  %v7126_v25 = vpack.c.bf16 %v6538_v19, %v6536_v39 }
 0x38f   : > { %v2769_v34 = vadd.f32 %v2768_v44, %v6614_v47 }
 0x390   : > { %v2862_v22 = vadd.f32 %v2861_v11, %v2813_v23  ;;  %v7127_v23 = vld [vmem:[#allocation65_spill] sm:$0xff] }
 0x391   : > { %3403 = vmatmul.bf16.gmra.mxu1 %v7119_v29 }
 0x392   : > { %v2925_v15 = vmul.f32 %v2862_v22, %v2862_v22  ;;  %v6774_v44 = vpop.f32.mrf.mxu0 }
 0x394   : > { %v2863_v63 = vpop.f32.mrf.mxu3 }
 0x395   : > { %v2814_v56 = vpop.f32.mrf.mxu2 }
 0x396   : > { %v2815_v43 = vadd.f32 %v2814_v56, %v2766_v49  ;;  %v2770_v32 = vpop.f32.mrf.mxu1  ;;  %v7128_v49 = vld [vmem:[#allocation64_spill] sm:$0xff] }
 0x397   : > { %v2771_v12 = vadd.f32 %v2770_v32, %v6624_v27 }
 0x398   : > { %v2864_v60 = vadd.f32 %v2863_v63, %v2815_v43  ;;  %v7129_v63 = vpack.c.bf16 %v7127_v23, %v7128_v49 }
 0x399   : > { %3501 = vmatmul.bf16.gmra.mxu3 %v2989_v1 }
 0x39a   : > { %v2930_v0 = vmul.f32 %v2864_v60, %v2864_v60  ;;  %3452 = vmatmul.bf16.gmra.mxu2 %v7122_v61  ;;  %v6781_v56 = vpop.f32.mrf.mxu0 }
 0x39c   : > { %v2866_v37 = vpop.f32.mrf.mxu3  ;;  %v2985_v48 = vpack.c.bf16 %v2930_v0, %v2925_v15 }
 0x39d   : > { %v2817_v13 = vpop.f32.mrf.mxu2 }
 0x39e   : > { %v2773_v46 = vpop.f32.mrf.mxu1  ;;  %3545 = vmatmul.bf16.gmra.mxu0 %v2985_v48  ;;  %v2818_v26 = vadd.f32 %v2817_v13, %v2769_v34 }
 0x39f   : > { %v2774_v29 = vadd.f32 %v2773_v46, %v6631_v55 }
 0x3a0   : > { %v2867_v20 = vadd.f32 %v2866_v37, %v2818_v26 }
 0x3a1   : > { %3408 = vmatmul.bf16.gmra.mxu1 %v7125_v5 }
 0x3a2   : > { %v2935_v47 = vmul.f32 %v2867_v20, %v2867_v20  ;;  %v6789_v41 = vpop.f32.mrf.mxu0 }
 0x3a4   : > { %v2868_v1 = vpop.f32.mrf.mxu3 }
 0x3a5   : > { %v2819_v10 = vpop.f32.mrf.mxu2 }
 0x3a6   : > { %v2820_v18 = vadd.f32 %v2819_v10, %v2771_v12  ;;  %v2775_v33 = vpop.f32.mrf.mxu1 }
 0x3a7   : > { %v2776_v52 = vadd.f32 %v2775_v33, %v6642_v54  ;;  %v3333_v33 = vadd.f32 1e-06, %v6676_v62 }
 0x3a8   : > { %v2869_v11 = vadd.f32 %v2868_v1, %v2820_v18 }
 0x3a9   : > { %3506 = vmatmul.bf16.gmra.mxu3 %v2994_v21 }
 0x3aa   : > { %v2940_v59 = vmul.f32 %v2869_v11, %v2869_v11  ;;  %3457 = vmatmul.bf16.gmra.mxu2 %v7126_v25  ;;  %v6793_v17 = vpop.f32.mrf.mxu0 }
 0x3ac   : > { %v2871_v3 = vpop.f32.mrf.mxu3  ;;  %v2990_v27 = vpack.c.bf16 %v2940_v59, %v2935_v47 }
 0x3ad   : > { %v2822_v28 = vpop.f32.mrf.mxu2 }
 0x3ae   : > { %v2778_v50 = vpop.f32.mrf.mxu1  ;;  %3550 = vmatmul.bf16.gmra.mxu0 %v2990_v27  ;;  %v2823_v42 = vadd.f32 %v2822_v28, %v2774_v29  ;;  %v3647_v29 = vlaneseq }
 0x3af   : > { %v2779_v61 = vadd.f32 %v2778_v50, %v6646_v4  ;;  %v3331_v4 = vadd.f32 1e-06, %v6670_v16  ;;  %v3336_v16 = vadd.f32 1e-06, %v6691_v8 }
 0x3b0   : > { %v2872_v19 = vadd.f32 %v2871_v3, %v2823_v42 }
 0x3b1   : > { %3413 = vmatmul.bf16.gmra.mxu1 %v7129_v63 }
 0x3b2   : > { %v2945_v55 = vmul.f32 %v2872_v19, %v2872_v19  ;;  %v6796_v12 = vpop.f32.mrf.mxu0 }
 0x3b4   : > { %v2873_v21 = vpop.f32.mrf.mxu3 }
 0x3b5   : > { %v2824_v39 = vpop.f32.mrf.mxu2 }
 0x3b6   : > { %v2825_v22 = vadd.f32 %v2824_v39, %v2776_v52  ;;  %v2780_v43 = vpop.f32.mrf.mxu1  ;;  %v3648_v39 = vshrl.u32 %v3647_v29, 7 }
 0x3b7   : > { %v2781_v48 = vadd.f32 %v2780_v43, %v6658_v24 }
 0x3b8   : > { %v2874_v32 = vadd.f32 %v2873_v21, %v2825_v22 }
 0x3b9   : > { %3511 = vmatmul.bf16.gmra.mxu3 %v2999_v58 }
 0x3ba   : > { %v2950_v60 = vmul.f32 %v2874_v32, %v2874_v32  ;;  %3462 = vmatmul.bf16.gmra.mxu2 %v2998_v51  ;;  %v3649_v32 = vadd.s32 8, %v3648_v39 }
 0x3bc   : > { %v2876_v15 = vpop.f32.mrf.mxu3  ;;  %v2995_v54 = vpack.c.bf16 %v2950_v60, %v2945_v55  ;;  %v3338_v55 = vadd.f32 1e-06, %v6703_v35  ;;  %vm3682_vm6 = vcmp.lt.s32.totalorder %v3649_v32, 11 }
 0x3bd   : > { %v2827_v0 = vpop.f32.mrf.mxu2 }
 0x3be   : > { %v3379_v14 = vpop.f32.mrf.mxu1  ;;  %3555 = vmatmul.bf16.gmra.mxu0 %v2995_v54  ;;  %v2828_v37 = vadd.f32 %v2827_v0, %v2779_v61 }
 0x3bf   : > { %v3380_v24 = vadd.f32 %v3379_v14, %v3331_v4 }
 0x3c0   : > { %v2877_v58 = vadd.f32 %v2876_v15, %v2828_v37 }
 0x3c2   : > { %v2955_v2 = vmul.f32 %v2877_v58, %v2877_v58 }
 0x3c4   : > { %v2878_v31 = vpop.f32.mrf.mxu3 }
 0x3c5   : > { %v2829_v40 = vpop.f32.mrf.mxu2 }
 0x3c6   : > { %v2830_v13 = vadd.f32 %v2829_v40, %v2781_v48  ;;  %v3381_v46 = vpop.f32.mrf.mxu1 }
 0x3c7   : > { %v3382_v59 = vadd.f32 %v3381_v46, %v3333_v33 }
 0x3c8   : > { %v2879_v34 = vadd.f32 %v2878_v31, %v2830_v13  ;;  %v3341_v13 = vadd.f32 1e-06, %v6710_v9  ;;  %v3343_v9 = vadd.f32 1e-06, %v6718_v38 }
 0x3ca   : > { %v2960_v51 = vmul.f32 %v2879_v34, %v2879_v34 }
 0x3cc   : > { %v3477_v30 = vpop.f32.mrf.mxu3  ;;  %v3000_v36 = vpack.c.bf16 %v2960_v51, %v2955_v2 }
 0x3cd   : > { %v3428_v5 = vpop.f32.mrf.mxu2 }
 0x3ce   : > { %v3384_v26 = vpop.f32.mrf.mxu1  ;;  %3560 = vmatmul.bf16.gmra.mxu0 %v3000_v36  ;;  %v3429_v20 = vadd.f32 %v3428_v5, %v3380_v24 }
 0x3cf   : > { %v3385_v42 = vadd.f32 %v3384_v26, %v3336_v16  ;;  %v3346_v16 = vadd.f32 1e-06, %v6725_v6 }
 0x3d0   : > { %v3478_v11 = vadd.f32 %v3477_v30, %v3429_v20 }
 0x3d4   : > { %v3479_v1 = vpop.f32.mrf.mxu3 }
 0x3d5   : > { %v3430_v10 = vpop.f32.mrf.mxu2 }
 0x3d6   : > { %v3386_v18 = vpop.f32.mrf.mxu1  ;;  %v3431_v28 = vadd.f32 %v3430_v10, %v3382_v59 }
 0x3d7   : > { %v3387_v8 = vadd.f32 %v3386_v18, %v3338_v55 }
 0x3d8   : > { %v3480_v23 = vadd.f32 %v3479_v1, %v3431_v28 }
 0x3db   : > { %v3526_v47 = vpop.f32.mrf.mxu0 }
 0x3dc   : > { %v3527_v25 = vadd.f32 %v3526_v47, %v3478_v11  ;;  %v3482_v3 = vpop.f32.mrf.mxu3 }
 0x3dd   : > { %v3433_v27 = vpop.f32.mrf.mxu2 }
 0x3de   : > { %5214 = vlog2.f32 %v3527_v25  ;;  %v3389_v50 = vpop.f32.mrf.mxu1  ;;  %v3434_v22 = vadd.f32 %v3433_v27, %v3385_v42 }
 0x3df   : > { %v3390_v51 = vadd.f32 %v3389_v50, %v3341_v13 }
 0x3e0   : > { %v3483_v60 = vadd.f32 %v3482_v3, %v3434_v22  ;;  %v3348_v22 = vadd.f32 1e-06, %v6737_v7 }
 0x3e3   : > { %v3528_v49 = vpop.f32.mrf.mxu0 }
 0x3e4   : > { %v5215_v63 = vpop.eup %5214  ;;  %v3529_v52 = vadd.f32 %v3528_v49, %v3480_v23  ;;  %v3484_v21 = vpop.f32.mrf.mxu3 }
 0x3e5   : > { %v3435_v62 = vpop.f32.mrf.mxu2  ;;  %v3567_v19 = vmul.f32 0.6931472, %v5215_v63 }
 0x3e6   : > { %5216 = vlog2.f32 %v3529_v52  ;;  %v3391_v43 = vpop.f32.mrf.mxu1  ;;  %v3436_v48 = vadd.f32 %v3435_v62, %v3387_v8 }
 0x3e7   : > { %3598 = vxpose.xlu1.b32.start [1/16] %v3567_v19, 128  ;;  %v3392_v59 = vadd.f32 %v3391_v43, %v3343_v9 }
 0x3e8   : > { %v3485_v35 = vadd.f32 %v3484_v21, %v3436_v48 }
 0x3eb   : > { %v3531_v15 = vpop.f32.mrf.mxu0 }
 0x3ec   : > { %v5217_v54 = vpop.eup %5216  ;;  %v3532_v0 = vadd.f32 %v3531_v15, %v3483_v60  ;;  %v3487_v14 = vpop.f32.mrf.mxu3 }
 0x3ed   : > { %v3569_v61 = vmul.f32 0.6931472, %v5217_v54  ;;  %v3438_v37 = vpop.f32.mrf.mxu2 }
 0x3ee   : > { %5218 = vlog2.f32 %v3532_v0  ;;  %v3394_v40 = vpop.f32.mrf.mxu1  ;;  %v3439_v1 = vadd.f32 %v3438_v37, %v3390_v51 }
 0x3ef   : > { %v3730_v31 = vsel %vm3682_vm6, %v3569_v61, 0.0  ;;  %3599 = vxpose.xlu1.b32.cont [2/16] %v3569_v61, 128  ;;  %v3395_v42 = vadd.f32 %v3394_v40, %v3346_v16  ;;  %v3351_v61 = vadd.f32 1e-06, %v6746_v57 }
 0x3f0   : > { %v3745_v58 = vadd.f32 %v3730_v31, %v3567_v19  ;;  %v3488_v33 = vadd.f32 %v3487_v14, %v3439_v1 }
 0x3f2   : > { %v3760_v46 = vrot.slane %v3745_v58, 4 }
 0x3f3   : > { %v3533_v34 = vpop.f32.mrf.mxu0 }
 0x3f4   : > { %v5219_v2 = vpop.eup %5218  ;;  %v3761_v30 = vadd.f32 %v3760_v46, %v3745_v58  ;;  %v3534_v36 = vadd.f32 %v3533_v34, %v3485_v35  ;;  %v3489_v5 = vpop.f32.mrf.mxu3 }
 0x3f5   : > { %v3571_v26 = vmul.f32 0.6931472, %v5219_v2  ;;  %v3440_v4 = vpop.f32.mrf.mxu2  ;;  %v3353_v2 = vadd.f32 1e-06, %v6753_v53 }
 0x3f6   : > { %v3762_v24 = vrot.slane %v3761_v30, 2  ;;  %5220 = vlog2.f32 %v3534_v36  ;;  %v3396_v20 = vpop.f32.mrf.mxu1  ;;  %v3441_v29 = vadd.f32 %v3440_v4, %v3392_v59 }
 0x3f7   : > { %3600 = vxpose.xlu1.b32.cont [3/16] %v3571_v26, 128  ;;  %v3397_v60 = vadd.f32 %v3396_v20, %v3348_v22  ;;  %v3356_v20 = vadd.f32 1e-06, %v6762_v45 }
 0x3f8   : > { %v3763_v10 = vadd.f32 %v3762_v24, %v3761_v30  ;;  %v3490_v38 = vadd.f32 %v3489_v5, %v3441_v29 }
 0x3fa   : > { %v3764_v18 = vrot.slane %v3763_v10, 1 }
 0x3fb   : > { %v3536_v11 = vpop.f32.mrf.mxu0 }
 0x3fc   : > { %v5221_v47 = vpop.eup %5220  ;;  %v3765_v25 = vadd.f32 %v3764_v18, %v3763_v10  ;;  %v3537_v3 = vadd.f32 %v3536_v11, %v3488_v33  ;;  %v3492_v27 = vpop.f32.mrf.mxu3 }
 0x3fd   : > { %v3573_v28 = vmul.f32 0.6931472, %v5221_v47  ;;  %v3443_v50 = vpop.f32.mrf.mxu2 }
 0x3fe   : > { %5222 = vlog2.f32 %v3537_v3  ;;  %3766 = vst [vmem:[%s6804_s11] sm:$0xff] %v3765_v25  ;;  %v3399_v23 = vpop.f32.mrf.mxu1  ;;  %v3444_v19 = vadd.f32 %v3443_v50, %v3395_v42  ;;  %v3361_v42 = vadd.f32 1e-06, %v6781_v56 }
 0x3ff   : > { %3601 = vxpose.xlu1.b32.cont [4/16] %v3573_v28, 128  ;;  %v3400_v40 = vadd.f32 %v3399_v23, %v3351_v61 }
 0x400   : > { %v3493_v43 = vadd.f32 %v3492_v27, %v3444_v19  ;;  %v3358_v27 = vadd.f32 1e-06, %v6774_v44 }
 0x403   : > { %v3538_v49 = vpop.f32.mrf.mxu0 }
 0x404   : > { %v5223_v63 = vpop.eup %5222  ;;  %v3539_v52 = vadd.f32 %v3538_v49, %v3490_v38  ;;  %v3494_v21 = vpop.f32.mrf.mxu3 }
 0x405   : > { %v3575_v39 = vmul.f32 0.6931472, %v5223_v63  ;;  %v3445_v62 = vpop.f32.mrf.mxu2 }
 0x406   : > { %5224 = vlog2.f32 %v3539_v52  ;;  %v3401_v8 = vpop.f32.mrf.mxu1  ;;  %v3446_v14 = vadd.f32 %v3445_v62, %v3397_v60  ;;  %v3363_v60 = vadd.f32 1e-06, %v6789_v41 }
 0x407   : > { %3602 = vxpose.xlu1.b32.cont [5/16] %v3575_v39, 128  ;;  %v3402_v5 = vadd.f32 %v3401_v8, %v3353_v2 }
 0x408   : > { %v3495_v37 = vadd.f32 %v3494_v21, %v3446_v14 }
 0x40b   : > { %v3541_v32 = vpop.f32.mrf.mxu0 }
 0x40c   : > { %v5225_v55 = vpop.eup %5224  ;;  %v3542_v15 = vadd.f32 %v3541_v32, %v3493_v43  ;;  %v3497_v6 = vpop.f32.mrf.mxu3 }
 0x40d   : > { %v3577_v54 = vmul.f32 0.6931472, %v5225_v55  ;;  %v3448_v0 = vpop.f32.mrf.mxu2 }
 0x40e   : > { %5226 = vlog2.f32 %v3542_v15  ;;  %v3449_v35 = vadd.f32 %v3448_v0, %v3400_v40  ;;  %v3404_v34 = vpop.f32.mrf.mxu1 }
 0x40f   : > { %3603 = vxpose.xlu1.b32.cont [6/16] %v3577_v54, 128  ;;  %v3405_v11 = vadd.f32 %v3404_v34, %v3356_v20 }
 0x410   : > { %v3498_v51 = vadd.f32 %v3497_v6, %v3449_v35 }
 0x413   : > { %v3543_v48 = vpop.f32.mrf.mxu0 }
 0x414   : > { %v5227_v31 = vpop.eup %5226  ;;  %v3544_v58 = vadd.f32 %v3543_v48, %v3495_v37  ;;  %v3499_v13 = vpop.f32.mrf.mxu3 }
 0x415   : > { %v3579_v7 = vmul.f32 0.6931472, %v5227_v31  ;;  %v3450_v46 = vpop.f32.mrf.mxu2  ;;  %v3366_v31 = vadd.f32 1e-06, %v6793_v17 }
 0x416   : > { %5228 = vlog2.f32 %v3544_v58  ;;  %v3451_v24 = vadd.f32 %v3450_v46, %v3402_v5  ;;  %v3406_v10 = vpop.f32.mrf.mxu1 }
 0x417   : > { %3604 = vxpose.xlu1.b32.cont [7/16] %v3579_v7, 128  ;;  %v3407_v38 = vadd.f32 %v3406_v10, %v3358_v27 }
 0x418   : > { %v3500_v9 = vadd.f32 %v3499_v13, %v3451_v24 }
 0x41b   : > { %v3546_v30 = vpop.f32.mrf.mxu0 }
 0x41c   : > { %v5229_v36 = vpop.eup %5228  ;;  %v3547_v26 = vadd.f32 %v3546_v30, %v3498_v51  ;;  %v3502_v1 = vpop.f32.mrf.mxu3  ;;  %v3368_v51 = vadd.f32 1e-06, %v6796_v12 }
 0x41d   : > { %v3581_v57 = vmul.f32 0.6931472, %v5229_v36  ;;  %v3453_v4 = vpop.f32.mrf.mxu2 }
 0x41e   : > { %5230 = vlog2.f32 %v3547_v26  ;;  %v3454_v25 = vadd.f32 %v3453_v4, %v3405_v11  ;;  %v3409_v50 = vpop.f32.mrf.mxu1 }
 0x41f   : > { %3605 = vxpose.xlu1.b32.cont [8/16] %v3581_v57, 128  ;;  %v3410_v19 = vadd.f32 %v3409_v50, %v3361_v42 }
 0x420   : > { %v3503_v28 = vadd.f32 %v3502_v1, %v3454_v25 }
 0x423   : > { %v3548_v18 = vpop.f32.mrf.mxu0 }
 0x424   : > { %v5231_v33 = vpop.eup %5230  ;;  %v3549_v47 = vadd.f32 %v3548_v18, %v3500_v9  ;;  %v3504_v3 = vpop.f32.mrf.mxu3 }
 0x425   : > { %v3583_v53 = vmul.f32 0.6931472, %v5231_v33  ;;  %v3455_v59 = vpop.f32.mrf.mxu2 }
 0x426   : > { %5232 = vlog2.f32 %v3549_v47  ;;  %v3456_v63 = vadd.f32 %v3455_v59, %v3407_v38  ;;  %v3411_v44 = vpop.f32.mrf.mxu1 }
 0x427   : > { %3606 = vxpose.xlu1.b32.cont [9/16] %v3583_v53, 128  ;;  %v3412_v8 = vadd.f32 %v3411_v44, %v3363_v60 }
 0x428   : > { %v3505_v52 = vadd.f32 %v3504_v3, %v3456_v63 }
 0x42b   : > { %v3551_v29 = vpop.f32.mrf.mxu0 }
 0x42c   : > { %v5233_v16 = vpop.eup %5232  ;;  %v3552_v23 = vadd.f32 %v3551_v29, %v3503_v28  ;;  %v3507_v21 = vpop.f32.mrf.mxu3 }
 0x42d   : > { %v3585_v45 = vmul.f32 0.6931472, %v5233_v16  ;;  %v3458_v49 = vpop.f32.mrf.mxu2 }
 0x42e   : > { %5234 = vlog2.f32 %v3552_v23  ;;  %v3459_v32 = vadd.f32 %v3458_v49, %v3410_v19  ;;  %v3414_v37 = vpop.f32.mrf.mxu1 }
 0x42f   : > { %3607 = vxpose.xlu1.b32.cont [10/16] %v3585_v45, 128  ;;  %v3415_v13 = vadd.f32 %v3414_v37, %v3366_v31 }
 0x430   : > { %v3508_v15 = vadd.f32 %v3507_v21, %v3459_v32 }
 0x433   : > { %v3553_v39 = vpop.f32.mrf.mxu0 }
 0x434   : > { %v5235_v62 = vpop.eup %5234  ;;  %v3554_v22 = vadd.f32 %v3553_v39, %v3505_v52  ;;  %v3509_v14 = vpop.f32.mrf.mxu3 }
 0x435   : > { %v3587_v43 = vmul.f32 0.6931472, %v5235_v62  ;;  %v3460_v55 = vpop.f32.mrf.mxu2 }
 0x436   : > { %5236 = vlog2.f32 %v3554_v22  ;;  %v3461_v61 = vadd.f32 %v3460_v55, %v3412_v8  ;;  %v3416_v2 = vpop.f32.mrf.mxu1 }
 0x437   : > { %3608 = vxpose.xlu1.b32.cont [11/16] %v3587_v43, 128  ;;  %v3417_v57 = vadd.f32 %v3416_v2, %v3368_v51 }
 0x438   : > { %v3510_v40 = vadd.f32 %v3509_v14, %v3461_v61 }
 0x43b   : > { %v3556_v6 = vpop.f32.mrf.mxu0 }
 0x43c   : > { %v5237_v54 = vpop.eup %5236  ;;  %v3557_v0 = vadd.f32 %v3556_v6, %v3508_v15  ;;  %v3512_v34 = vpop.f32.mrf.mxu3 }
 0x43d   : > { %v3589_v56 = vmul.f32 0.6931472, %v5237_v54  ;;  %v3463_v48 = vpop.f32.mrf.mxu2 }
 0x43e   : > { %5238 = vlog2.f32 %v3557_v0  ;;  %v3464_v35 = vadd.f32 %v3463_v48, %v3415_v13 }
 0x43f   : > { %3609 = vxpose.xlu1.b32.cont [12/16] %v3589_v56, 128 }
 0x440   : > { %v3513_v30 = vadd.f32 %v3512_v34, %v3464_v35 }
 0x443   : > { %v3558_v58 = vpop.f32.mrf.mxu0 }
 0x444   : > { %v5239_v7 = vpop.eup %5238  ;;  %v3559_v46 = vadd.f32 %v3558_v58, %v3510_v40  ;;  %v3514_v1 = vpop.f32.mrf.mxu3 }
 0x445   : > { %v3591_v41 = vmul.f32 0.6931472, %v5239_v7  ;;  %v3465_v36 = vpop.f32.mrf.mxu2 }
 0x446   : > { %5240 = vlog2.f32 %v3559_v46  ;;  %v3466_v24 = vadd.f32 %v3465_v36, %v3417_v57 }
 0x447   : > { %3610 = vxpose.xlu1.b32.cont [13/16] %v3591_v41, 128 }
 0x448   : > { %v3515_v10 = vadd.f32 %v3514_v1, %v3466_v24 }
 0x44b   : > { %v3561_v5 = vpop.f32.mrf.mxu0 }
 0x44c   : > { %v5241_v26 = vpop.eup %5240  ;;  %v3562_v4 = vadd.f32 %v3561_v5, %v3513_v30 }
 0x44d   : > { %v3593_v17 = vmul.f32 0.6931472, %v5241_v26 }
 0x44e   : > { %5242 = vlog2.f32 %v3562_v4 }
 0x44f   : > { %3611 = vxpose.xlu1.b32.cont [14/16] %v3593_v17, 128 }
 0x453   : > { %v3563_v20 = vpop.f32.mrf.mxu0 }
 0x454   : > { %v5243_v9 = vpop.eup %5242  ;;  %v3564_v18 = vadd.f32 %v3563_v20, %v3515_v10 }
 0x455   : > { %v3595_v33 = vmul.f32 0.6931472, %v5243_v9 }
 0x456   : > { %5244 = vlog2.f32 %v3564_v18 }
 0x457   : > { %3612 = vxpose.xlu1.b32.cont [15/16] %v3595_v33, 128 }
 0x45c   : > { %v5245_v12 = vpop.eup %5244 }
 0x45d   : > { %v3597_v11 = vmul.f32 0.6931472, %v5245_v12 }
 0x45f   : > { %3613 = vxpose.xlu1.b32.end [16/16] %v3597_v11, 128 }
 0x460   : > { %5393 = shalt.err (!%p5390_p0)
}
 0x461   : > { %5123 = dma.vmem_to_hbm [thread:$0]  (%p5616_p7), %s3805_s9, 128, %s3807_s14, %s3773_s16  }
 0x462   : > { %s6835_s24 = scalar_lea.vmem [#allocation10], %s3981_s8  ;;  %s5084_s8 = sshll.u32 %s5484_s21, 7 }
 0x463   : > { %s3785_s25 = scalar_lea.hbm %s6896_s4, %s5084_s8  ;;  %s3786_s11 = sshll.u32 %s6835_s24, 4  ;;  %s3787_s11 = int_to_ptr.vmem [resolvable:$true] %s3786_s11 }
 0x464   : > { %s3788_s7 = sshll.u32 %s3785_s25, 4  ;;  %s3768_s28 = scalar_lea.sflag [#allocation4], %s5649_s15  ;;  %s3789_s7 = int_to_ptr.hbm [resolvable:$true] %s3788_s7 }
 0x465   : > { %s5408_s12 = sshra.s32 %s3789_s7, 4  ;;  %s5414_s14 = scalar_lea.hbm %s6896_s4, 256  ;;  %s5409_s12 = int_to_ptr.hbm [resolvable:$true] %s5408_s12 }
 0x466   : > { %s5410_s13 = scalar_lea.hbm %s5409_s12, 128  ;;  %p5415_p2 = scmp.lt.s32.totalorder %s5409_s12, %s6896_s4 }
 0x467   : > { %p5411_p3 = scmp.ne.s32.totalorder %s5409_s12, %s5410_s13  ;;  %p5416_p1 = scmp.lt.s32.totalorder %s5414_s14, %s5410_s13 }
 0x469   : > { %p5412_p5 = pnand %p5411_p3, %p5616_p7  ;;  %p5417_p4 = por %p5416_p1, %p5415_p2 }
 0x46b   : > { %p5413_p9 = pneg %p5412_p5 }
 0x46d   : > { %p5418_p8 = pnand %p5417_p4, %p5413_p9 }
 0x48b   : > { %v3614_v47 = vpop.trf.xlu1 }
 0x48c   : > { %3630 = vst [vmem:[%s6835_s24] sm:$0xff] %v3614_v47 }
 0x493   : > { %v3615_v53 = vpop.trf.xlu1 }
 0x494   : > { %3631 = vst [vmem:[%s6835_s24 + $0x8] sm:$0xff] %v3615_v53 }
 0x49b   : > { %v3616_v59 = vpop.trf.xlu1 }
 0x49c   : > { %3632 = vst [vmem:[%s6835_s24 + $0x10] sm:$0xff] %v3616_v59 }
 0x4a3   : > { %v3617_v25 = vpop.trf.xlu1 }
 0x4a4   : > { %3633 = vst [vmem:[%s6835_s24 + $0x18] sm:$0xff] %v3617_v25 }
 0x4ab   : > { %v3618_v3 = vpop.trf.xlu1 }
 0x4ac   : > { %3634 = vst [vmem:[%s6835_s24 + $0x20] sm:$0xff] %v3618_v3 }
 0x4b3   : > { %v3619_v27 = vpop.trf.xlu1 }
 0x4b4   : > { %3635 = vst [vmem:[%s6835_s24 + $0x28] sm:$0xff] %v3619_v27 }
 0x4bb   : > { %v3620_v28 = vpop.trf.xlu1 }
 0x4bc   : > { %3636 = vst [vmem:[%s6835_s24 + $0x30] sm:$0xff] %v3620_v28 }
 0x4c3   : > { %v3621_v50 = vpop.trf.xlu1 }
 0x4c4   : > { %3637 = vst [vmem:[%s6835_s24 + $0x38] sm:$0xff] %v3621_v50 }
 0x4cb   : > { %v3622_v29 = vpop.trf.xlu1 }
 0x4cc   : > { %3638 = vst [vmem:[%s6835_s24 + $0x40] sm:$0xff] %v3622_v29 }
 0x4d3   : > { %v3623_v16 = vpop.trf.xlu1 }
 0x4d4   : > { %3639 = vst [vmem:[%s6835_s24 + $0x48] sm:$0xff] %v3623_v16 }
 0x4db   : > { %v3624_v38 = vpop.trf.xlu1 }
 0x4dc   : > { %3640 = vst [vmem:[%s6835_s24 + $0x50] sm:$0xff] %v3624_v38 }
 0x4e3   : > { %v3625_v23 = vpop.trf.xlu1 }
 0x4e4   : > { %3641 = vst [vmem:[%s6835_s24 + $0x58] sm:$0xff] %v3625_v23 }
 0x4eb   : > { %v3626_v45 = vpop.trf.xlu1 }
 0x4ec   : > { %3642 = vst [vmem:[%s6835_s24 + $0x60] sm:$0xff] %v3626_v45 }
 0x4f3   : > { %v3627_v49 = vpop.trf.xlu1 }
 0x4f4   : > { %3643 = vst [vmem:[%s6835_s24 + $0x68] sm:$0xff] %v3627_v49 }
 0x4fb   : > { %v3628_v63 = vpop.trf.xlu1 }
 0x4fc   : > { %3644 = vst [vmem:[%s6835_s24 + $0x70] sm:$0xff] %v3628_v63 }
 0x503   : > { %v3629_v42 = vpop.trf.xlu1 }
 0x504   : > { %3645 = vst [vmem:[%s6835_s24 + $0x78] sm:$0xff] %v3629_v42 }
 0x505   : > { %5421 = shalt.err (!%p5418_p8)
}
 0x506   : > { %s5505_s15 = smov 128   ;;  %s5506_s10 = smov 8  }
 0x507   : > { %5122 = dma.vmem_to_hbm [thread:$0]  (%p5616_p7), %s3787_s11, 2048, %s3789_s7, %s3768_s28, %s5505_s15, %s5505_s15, %s5506_s10  }
 0x508 PF: > { %s3818_s17 = sand.u32 1, %s5472_s18   ;;  %p5141_p10 = pnand %p3975_p11, %p5582_p6 }
 0x509   : > { %s3819_s0 = scalar_lea.sflag [#allocation4], %s3818_s17 }
 0x50a   : > { %p5142_p12 = pneg %p5141_p10 }
 0x50c   : > { %5463 = dma.done.wait (%p5142_p12), %s3819_s0, 2048  }
 0x50d   : > { %5465 = vsyncadd (%p5142_p12), %s3819_s0, 4294965248  ;;  %s3829_s2 = scalar_lea.sflag [#allocation12], %s3818_s17 }
 0x50e   : > { %5467 = dma.done.wait (%p5142_p12), %s3829_s2, 128  }
 0x50f   : > { %5469 = vsyncadd (%p5142_p12), %s3829_s2, 4294967168  ;;  %s29_s23 = sadd.s32 1, %s5492_s23   ;;  %s7130_s30 = sld [smem:[#allocation21_spill]] }
 0x510   : > { %p26_p13 = scmp.ge.s32.totalorder %s29_s23, 4   ;;  %s7131_s21 = sld [smem:[#allocation19_spill]] }
 0x511   : > { %s7132_s22 = sld [smem:[#allocation20_spill]]  ;;  %s7133_s18 = smov %s5476_s19 }
 0x512   : > { %s7134_s19 = smov %s5480_s20  ;;  %28 = sbr.rel (!%p26_p13) target bundleno = 15 (0xf), region = 119 }
 0x515   : > { %s7135_s20 = smov %s7130_s30 }
 0x517   :  { %3835 = vsyncpa [#allocation3], 1 }
 0x518   :  { %3837 = vsyncpa [#allocation3 + $0x1], 1 }
 0x519   :  { %3838 = vsyncpa [#allocation6], 1 }
 0x51a   :  { %3840 = vsyncpa [#allocation6 + $0x1], 1 }
 0x51b   :  { %3841 = vsyncpa [#allocation9], 1 }
 0x51c   :  { %3842 = vsyncpa [#allocation4], 1 }
 0x51d   :  { %3844 = vsyncpa [#allocation4 + $0x1], 1 }
 0x51e   :  { %3845 = vsyncpa [#allocation12], 1 }
 0x51f   :  { %3847 = vsyncpa [#allocation12 + $0x1], 1 }

</bundles_post_ra>
